<compile_context>
chip_gen: v5e
topology: v5e:2x2
jax: 0.10.0
libtpu: 0.0.40
codegen_flags: <defaults>
</compile_context>

<pallas_src>
import functools
import math

import jax
import jax.numpy as jnp
from jax.experimental import pallas as pl
from jax.experimental.pallas import tpu as pltpu


# ------------------------------- Pallas kernel ------------------------------ #

def decoder_forward_kernel(
    x_ref,
    sa_wqkv, sa_bqkv, sa_wo, sa_bo, ln1_g, ln1_b,
    ca_wq, ca_bq, ca_wkv, ca_bkv, ca_wo, ca_bo, ln2_g, ln2_b,
    ff1_w, ff1_b, ff2_w, ff2_b, ln3_g, ln3_b,
    fc_w, fc_b,
    o_ref,
    x_carry,
    *, num_heads, seq_len, batch_per_block, eps):
    """Grid = (row_blocks, layers).  One invocation applies ONE decoder layer to a slab of
    batch_per_block*seq_len rows; the activation is carried in `x_carry` (VMEM scratch).

    x_ref: (R, D) input slab (also the cross-attention memory, identical for every layer).
    Weight refs hold one layer's bf16 (Din, Dout) matrix (layer axis squeezed by BlockSpec);
    bias / LayerNorm refs hold f32 (1, Dout) rows.  fc_* are layer-independent.
    """
    f32, bf16 = jnp.float32, jnp.bfloat16
    l = pl.program_id(1)

    R, D = x_carry.shape
    H, S, Bt = num_heads, seq_len, batch_per_block
    dh = D // H

    # ---- init the carried activation on the first layer of this row block ----
    @pl.when(l == 0)
    def _():
        x_carry[...] = x_ref[...].astype(f32)

    def matmul_bias(a, w_bf16, b_f32):
        # a: (M, K) f32 -> bf16 for the MXU; f32 accumulation; f32 bias add (VPU).
        return jnp.dot(a.astype(bf16), w_bf16, preferred_element_type=f32) + b_f32

    def layernorm(y, g, b):
        # PyTorch LayerNorm semantics (biased variance), f32 statistics.
        mu = jnp.mean(y, axis=-1, keepdims=True)
        var = jnp.mean((y - mu) ** 2, axis=-1, keepdims=True)
        return (y - mu) * jax.lax.rsqrt(var + eps) * g + b

    def attention(q, k, v, wo, bo):
        # q, k, v: (R, D) f32 slabs.  q is already scaled (1/sqrt(dh) folded into Wq).
        # Softmax is computed per batch element (no cross-batch attention); the output
        # projection is accumulated per head (no lane-dim concatenate).
        # TODO(synk): for long sequences switch to a flash-style online-softmax KV tiling.
        acc = jnp.zeros((R, D), f32)
        for h in range(H):
            c0, c1 = h * dh, (h + 1) * dh
            qh = q[:, c0:c1].astype(bf16)
            kh = k[:, c0:c1].astype(bf16)
            vh = v[:, c0:c1].astype(bf16)
            ctx_rows = []
            for b in range(Bt):
                r0, r1 = b * S, (b + 1) * S
                s = jax.lax.dot_general(qh[r0:r1], kh[r0:r1],
                                        (((1,), (1,)), ((), ())),
                                        preferred_element_type=f32)          # (S, S)
                m = jnp.max(s, axis=-1, keepdims=True)
                p = jnp.exp(s - m)                                           # f32 softmax
                p = p * pl.reciprocal(jnp.sum(p, axis=-1, keepdims=True), approx=True)
                ctx_rows.append(jnp.dot(p.astype(bf16), vh[r0:r1],
                                        preferred_element_type=f32))         # (S, dh)
            ctx_h = ctx_rows[0] if Bt == 1 else jnp.concatenate(ctx_rows, axis=0)  # (R, dh)
            acc = acc + jnp.dot(ctx_h.astype(bf16), wo[c0:c1, :],
                                preferred_element_type=f32)                  # out-proj slice
        return acc + bo

    x = x_carry[...]                         # (R, D) carried activation
    mem = x_ref[...].astype(f32)             # cross-attention memory == decoder input

    # ---- self-attention (single fused QKV projection on the whole slab) ----
    qkv = matmul_bias(x, sa_wqkv[...], sa_bqkv[...])                         # (R, 3D)
    sa = attention(qkv[:, 0:D], qkv[:, D:2 * D], qkv[:, 2 * D:3 * D],
                   sa_wo[...], sa_bo[...])
    x = layernorm(x + sa, ln1_g[...], ln1_b[...])

    # ---- cross-attention over memory (fused K/V projection) ----
    q = matmul_bias(x, ca_wq[...], ca_bq[...])                               # (R, D)
    kv = matmul_bias(mem, ca_wkv[...], ca_bkv[...])                          # (R, 2D)
    ca = attention(q, kv[:, 0:D], kv[:, D:2 * D], ca_wo[...], ca_bo[...])
    x = layernorm(x + ca, ln2_g[...], ln2_b[...])

    # ---- feed-forward (FF1 + ReLU + FF2 fused) ----
    h1 = jnp.maximum(matmul_bias(x, ff1_w[...], ff1_b[...]), 0.0)            # (R, F)
    ff = matmul_bias(h1, ff2_w[...], ff2_b[...])                             # (R, D)
    x = layernorm(x + ff, ln3_g[...], ln3_b[...])

    x_carry[...] = x                          # carry to the next layer

    # ---- final fc head (lane-padded output, written once on the last layer) ----
    @pl.when(l == pl.num_programs(1) - 1)
    def _():
        o_ref[...] = (jnp.dot(x.astype(bf16), fc_w[...], preferred_element_type=f32)
                      + fc_b[...]).astype(o_ref.dtype)


# ------------------------------ Pallas wrapper ------------------------------ #

_LAYER_PARAMS = (
    "sa_wqkv", "sa_bqkv", "sa_wo", "sa_bo", "ln1_g", "ln1_b",
    "ca_wq", "ca_bq", "ca_wkv", "ca_bkv", "ca_wo", "ca_bo", "ln2_g", "ln2_b",
    "ff1_w", "ff1_b", "ff2_w", "ff2_b", "ln3_g", "ln3_b",
)
_HEAD_PARAMS = ("fc_w", "fc_b")


def _layer_spec(shape):
    # Stacked (L, *rest) parameter -> per-layer block, layer axis squeezed, streamed over l.
    rest = tuple(shape[1:])
    zeros = (0,) * len(rest)
    return pl.BlockSpec((None,) + rest, lambda r, l, _z=zeros: (l,) + _z)


def _const_spec(shape):
    # Layer-independent parameter -> full-array block, constant across the grid.
    zeros = (0,) * len(shape)
    return pl.BlockSpec(tuple(shape), lambda r, l, _z=zeros: _z)


def _pick_batch_per_block(B, S, target_rows=256, max_rows=1024):
    """Smallest divisor of B with Bt*S >= target_rows, else largest with Bt*S <= max_rows."""
    best = 1
    for c in range(1, B + 1):
        if B % c == 0 and c * S <= max_rows:
            best = c
            if c * S >= target_rows:
                break
    return best


def _vmem_limit_bytes(kparams, R, D, F, out_pad, L):
    layer_bytes = sum(int(kparams[n].size) * kparams[n].dtype.itemsize
                      for n in _LAYER_PARAMS) // L
    head_bytes = sum(int(kparams[n].size) * kparams[n].dtype.itemsize for n in _HEAD_PARAMS)
    act_bytes = R * (2 * D + out_pad) * 4 * 2          # streamed x/out blocks + carry scratch
    work_bytes = R * (6 * D + F) * 4                   # qkv / kv / ffn f32 intermediates
    need = 2 * layer_bytes + head_bytes + act_bytes + work_bytes   # x2: double-buffered weights
    return int(min(max(2 * need, 32 * 2 ** 20), 96 * 2 ** 20))


def transformer_decoder_forward(x, kparams, *, num_heads, out_dim, batch_per_block=None):
    """Equivalent of TransformerDecoder.forward.  x: (B, S, D) -> (B, S, output_dim)."""
    B, S, D = x.shape
    L = kparams["sa_wqkv"].shape[0]
    F = kparams["ff1_w"].shape[-1]
    out_pad = kparams["fc_w"].shape[-1]
    assert D % num_heads == 0

    Bt = _pick_batch_per_block(B, S) if batch_per_block is None else batch_per_block
    assert B % Bt == 0
    R = Bt * S
    assert R % 8 == 0 or R == B * S, "row block must satisfy the (8,128) sublane rule"

    x2 = x.reshape(B * S, D)
    layer_args = [kparams[n] for n in _LAYER_PARAMS]
    head_args = [kparams[n] for n in _HEAD_PARAMS]

    in_specs = [pl.BlockSpec((R, D), lambda r, l: (r, 0))]        # slab of Bt*S rows
    in_specs += [_layer_spec(a.shape) for a in layer_args]        # streamed per layer
    in_specs += [_const_spec(a.shape) for a in head_args]         # fc head: resident

    out = pl.pallas_call(
        functools.partial(decoder_forward_kernel, num_heads=num_heads,
                          seq_len=S, batch_per_block=Bt, eps=1e-5),
        out_shape=jax.ShapeDtypeStruct((B * S, out_pad), x.dtype),
        grid=(B // Bt, L),
        in_specs=in_specs,
        out_specs=pl.BlockSpec((R, out_pad), lambda r, l: (r, 0)),
        scratch_shapes=[pltpu.VMEM((R, D), jnp.float32)],         # carried activation
        compiler_params=pltpu.CompilerParams(
            dimension_semantics=("parallel", "arbitrary"),
            vmem_limit_bytes=_vmem_limit_bytes(kparams, R, D, F, out_pad, L)),
    )(x2, *layer_args, *head_args)

    return out.reshape(B, S, out_pad)[..., :out_dim]


# --------------------------- Parameter preparation --------------------------- #

def prepare_params(torch_params, d_model, num_heads):
    """One-time conversion from PyTorch layout to kernel layout (outside the hot path):
    weights transposed to (Din, Dout), stacked over layers, cast to bf16 (MXU-native);
    the 1/sqrt(dh) softmax scale folded into Wq/bq; biases / LayerNorm params kept f32
    as (1, Dout) rows; fc head zero-padded to a multiple of 128 output lanes."""
    D = d_model
    dh = D // num_heads
    scale = 1.0 / math.sqrt(dh)
    bf16, f32 = jnp.bfloat16, jnp.float32
    layers = torch_params["layers"]

    def stack_w(fn):
        return jnp.stack([fn(p).astype(bf16) for p in layers])

    def stack_v(fn):
        return jnp.stack([fn(p).reshape(1, -1).astype(f32) for p in layers])

    def scaled_in_w(w):   # (3D, D): scale the q rows, transpose to (D, 3D)
        return jnp.concatenate([w[:D] * scale, w[D:]], axis=0).T

    def scaled_in_b(b):   # (3D,): scale the q entries
        return jnp.concatenate([b[:D] * scale, b[D:]], axis=0)

    params = {
        "sa_wqkv": stack_w(lambda p: scaled_in_w(p["sa_in_w"])),   # (L, D, 3D)
        "sa_bqkv": stack_v(lambda p: scaled_in_b(p["sa_in_b"])),   # (L, 1, 3D)
        "sa_wo":   stack_w(lambda p: p["sa_out_w"].T),             # (L, D, D)
        "sa_bo":   stack_v(lambda p: p["sa_out_b"]),
        "ln1_g":   stack_v(lambda p: p["ln1_w"]),
        "ln1_b":   stack_v(lambda p: p["ln1_b"]),
        "ca_wq":   stack_w(lambda p: (p["ca_in_w"][:D] * scale).T),  # (L, D, D)
        "ca_bq":   stack_v(lambda p: p["ca_in_b"][:D] * scale),
        "ca_wkv":  stack_w(lambda p: p["ca_in_w"][D:].T),            # (L, D, 2D)
        "ca_bkv":  stack_v(lambda p: p["ca_in_b"][D:]),
        "ca_wo":   stack_w(lambda p: p["ca_out_w"].T),
        "ca_bo":   stack_v(lambda p: p["ca_out_b"]),
        "ln2_g":   stack_v(lambda p: p["ln2_w"]),
        "ln2_b":   stack_v(lambda p: p["ln2_b"]),
        "ff1_w":   stack_w(lambda p: p["ff1_w"].T),                  # (L, D, F)
        "ff1_b":   stack_v(lambda p: p["ff1_b"]),
        "ff2_w":   stack_w(lambda p: p["ff2_w"].T),                  # (L, F, D)
        "ff2_b":   stack_v(lambda p: p["ff2_b"]),
        "ln3_g":   stack_v(lambda p: p["ln3_w"]),
        "ln3_b":   stack_v(lambda p: p["ln3_b"]),
    }

    out_dim = torch_params["fc_w"].shape[0]
    out_pad = ((out_dim + 127) // 128) * 128
    fc_w = jnp.zeros((D, out_pad), f32).at[:, :out_dim].set(torch_params["fc_w"].T)
    fc_b = jnp.zeros((1, out_pad), f32).at[0, :out_dim].set(torch_params["fc_b"])
    params["fc_w"] = fc_w.astype(bf16)         # (D, out_pad)  lane-dense output
    params["fc_b"] = fc_b                      # (1, out_pad)
    return params


# ------------------------------ Parameter init ------------------------------ #

def init_params(key, d_model, hidden_dim, num_heads, num_layers, output_dim):
    """PyTorch-layout parameters (weights are (Dout, Din) like nn.Linear / in_proj_weight)."""
    def w(key, shape, scale=0.05):
        return scale * jax.random.normal(key, shape, dtype=jnp.float32)

    layers = []
    for l in range(num_layers):
        ks = jax.random.split(jax.random.fold_in(key, l), 12)
        layers.append({
            "sa_in_w": w(ks[0], (3 * d_model, d_model)),
            "sa_in_b": w(ks[1], (3 * d_model,)),
            "sa_out_w": w(ks[2], (d_model, d_model)),
            "sa_out_b": w(ks[3], (d_model,)),
            "ca_in_w": w(ks[4], (3 * d_model, d_model)),
            "ca_in_b": w(ks[5], (3 * d_model,)),
            "ca_out_w": w(ks[6], (d_model, d_model)),
            "ca_out_b": w(ks[7], (d_model,)),
            "ff1_w": w(ks[8], (hidden_dim, d_model)),
            "ff1_b": w(ks[9], (hidden_dim,)),
            "ff2_w": w(ks[10], (d_model, hidden_dim)),
            "ff2_b": w(ks[11], (d_model,)),
            "ln1_w": jnp.ones((d_model,), jnp.float32),
            "ln1_b": jnp.zeros((d_model,), jnp.float32),
            "ln2_w": jnp.ones((d_model,), jnp.float32),
            "ln2_b": jnp.zeros((d_model,), jnp.float32),
            "ln3_w": jnp.ones((d_model,), jnp.float32),
            "ln3_b": jnp.zeros((d_model,), jnp.float32),
        })
    kfc1, kfc2 = jax.random.split(jax.random.fold_in(key, 1000))
    return {
        "layers": layers,
        "fc_w": w(kfc1, (output_dim, d_model)),
        "fc_b": w(kfc2, (output_dim,)),
    }


# ---------------------------- Pure-JAX reference ----------------------------- #

def reference_forward(x, torch_params, num_heads, eps=1e-5):
    B, S, D = x.shape
    H, dh = num_heads, D // num_heads

    def ln(y, g, b):
        mu = y.mean(-1, keepdims=True)
        var = ((y - mu) ** 2).mean(-1, keepdims=True)
        return (y - mu) / jnp.sqrt(var + eps) * g + b

    def mha(q_in, kv_in, w_in, b_in, w_out, b_out):
        q = q_in @ w_in[:D].T + b_in[:D]
        k = kv_in @ w_in[D:2 * D].T + b_in[D:2 * D]
        v = kv_in @ w_in[2 * D:].T + b_in[2 * D:]
        q = q.reshape(B, S, H, dh).transpose(0, 2, 1, 3)
        k = k.reshape(B, S, H, dh).transpose(0, 2, 1, 3)
        v = v.reshape(B, S, H, dh).transpose(0, 2, 1, 3)
        s = jnp.einsum("bhqd,bhkd->bhqk", q, k) / math.sqrt(dh)
        p = jax.nn.softmax(s, axis=-1)
        ctx = jnp.einsum("bhqk,bhkd->bhqd", p, v).transpose(0, 2, 1, 3).reshape(B, S, D)
        return ctx @ w_out.T + b_out

    h = x
    mem = x
    for p_ in torch_params["layers"]:
        h = ln(h + mha(h, h, p_["sa_in_w"], p_["sa_in_b"], p_["sa_out_w"], p_["sa_out_b"]),
               p_["ln1_w"], p_["ln1_b"])
        h = ln(h + mha(h, mem, p_["ca_in_w"], p_["ca_in_b"], p_["ca_out_w"], p_["ca_out_b"]),
               p_["ln2_w"], p_["ln2_b"])
        ff = jnp.maximum(h @ p_["ff1_w"].T + p_["ff1_b"], 0.0) @ p_["ff2_w"].T + p_["ff2_b"]
        h = ln(h + ff, p_["ln3_w"], p_["ln3_b"])
    return h @ torch_params["fc_w"].T + torch_params["fc_b"]


# ----------------------------------- Main ----------------------------------- #

if __name__ == "__main__":
    # Small, module-consistent shapes.
    B, S = 2, 8
    input_dim, hidden_dim, num_heads, num_layers, output_dim = 32, 64, 4, 2, 16

    key = jax.random.PRNGKey(0)
    kx, kp = jax.random.split(key)
    x = jax.random.normal(kx, (B, S, input_dim), dtype=jnp.float32)

    torch_params = init_params(kp, input_dim, hidden_dim, num_heads, num_layers, output_dim)
    kparams = prepare_params(torch_params, input_dim, num_heads)   # transpose/stack/fold, once

    fwd = jax.jit(functools.partial(transformer_decoder_forward,
                                    num_heads=num_heads, out_dim=output_dim))
    out = fwd(x, kparams)
    jax.block_until_ready(out)

    assert out.shape == (B, S, output_dim)
    assert bool(jnp.all(jnp.isfinite(out)))

    ref = reference_forward(x, torch_params, num_heads)
    max_err = float(jnp.max(jnp.abs(out - ref)))
    assert max_err < 5e-2, f"kernel/reference mismatch: max abs err {max_err}"

    print("KERNEL_OK")
</pallas_src>

<mosaic_0001>
module attributes {stable_mosaic.version = 11 : i64} {
  func.func @decoder_forward_kernel(%arg0: i32, %arg1: i32, %arg2: memref<16x32xf32, #tpu.memory_space<vmem>>, %arg3: memref<1x32x96xbf16, #tpu.memory_space<vmem>>, %arg4: memref<1x1x96xf32, #tpu.memory_space<vmem>>, %arg5: memref<1x32x32xbf16, #tpu.memory_space<vmem>>, %arg6: memref<1x1x32xf32, #tpu.memory_space<vmem>>, %arg7: memref<1x1x32xf32, #tpu.memory_space<vmem>>, %arg8: memref<1x1x32xf32, #tpu.memory_space<vmem>>, %arg9: memref<1x32x32xbf16, #tpu.memory_space<vmem>>, %arg10: memref<1x1x32xf32, #tpu.memory_space<vmem>>, %arg11: memref<1x32x64xbf16, #tpu.memory_space<vmem>>, %arg12: memref<1x1x64xf32, #tpu.memory_space<vmem>>, %arg13: memref<1x32x32xbf16, #tpu.memory_space<vmem>>, %arg14: memref<1x1x32xf32, #tpu.memory_space<vmem>>, %arg15: memref<1x1x32xf32, #tpu.memory_space<vmem>>, %arg16: memref<1x1x32xf32, #tpu.memory_space<vmem>>, %arg17: memref<1x32x64xbf16, #tpu.memory_space<vmem>>, %arg18: memref<1x1x64xf32, #tpu.memory_space<vmem>>, %arg19: memref<1x64x32xbf16, #tpu.memory_space<vmem>>, %arg20: memref<1x1x32xf32, #tpu.memory_space<vmem>>, %arg21: memref<1x1x32xf32, #tpu.memory_space<vmem>>, %arg22: memref<1x1x32xf32, #tpu.memory_space<vmem>>, %arg23: memref<32x128xbf16, #tpu.memory_space<vmem>>, %arg24: memref<1x128xf32, #tpu.memory_space<vmem>>, %arg25: memref<16x128xf32, #tpu.memory_space<vmem>>, %arg26: memref<16x32xf32, #tpu.memory_space<vmem>>) attributes {dimension_semantics = [#tpu.dimension_semantics<parallel>, #tpu.dimension_semantics<arbitrary>], iteration_bounds = array<i64: 1, 2>, scalar_prefetch = 0 : i64, scratch_operands = 1 : i64, tpu.core_type = #tpu.core_type<tc>, window_params = [{transform_indices = @transform_0, window_bounds = array<i64: 16, 32>}, {transform_indices = @transform_1, window_bounds = array<i64: 1, 32, 96>}, {transform_indices = @transform_2, window_bounds = array<i64: 1, 1, 96>}, {transform_indices = @transform_3, window_bounds = array<i64: 1, 32, 32>}, {transform_indices = @transform_4, window_bounds = array<i64: 1, 1, 32>}, {transform_indices = @transform_5, window_bounds = array<i64: 1, 1, 32>}, {transform_indices = @transform_6, window_bounds = array<i64: 1, 1, 32>}, {transform_indices = @transform_7, window_bounds = array<i64: 1, 32, 32>}, {transform_indices = @transform_8, window_bounds = array<i64: 1, 1, 32>}, {transform_indices = @transform_9, window_bounds = array<i64: 1, 32, 64>}, {transform_indices = @transform_10, window_bounds = array<i64: 1, 1, 64>}, {transform_indices = @transform_11, window_bounds = array<i64: 1, 32, 32>}, {transform_indices = @transform_12, window_bounds = array<i64: 1, 1, 32>}, {transform_indices = @transform_13, window_bounds = array<i64: 1, 1, 32>}, {transform_indices = @transform_14, window_bounds = array<i64: 1, 1, 32>}, {transform_indices = @transform_15, window_bounds = array<i64: 1, 32, 64>}, {transform_indices = @transform_16, window_bounds = array<i64: 1, 1, 64>}, {transform_indices = @transform_17, window_bounds = array<i64: 1, 64, 32>}, {transform_indices = @transform_18, window_bounds = array<i64: 1, 1, 32>}, {transform_indices = @transform_19, window_bounds = array<i64: 1, 1, 32>}, {transform_indices = @transform_20, window_bounds = array<i64: 1, 1, 32>}, {pipeline_mode = #tpu.pipeline_mode<synchronous>, transform_indices = @transform_21, window_bounds = array<i64: 32, 128>}, {pipeline_mode = #tpu.pipeline_mode<synchronous>, transform_indices = @transform_22, window_bounds = array<i64: 1, 128>}, {transform_indices = @transform_23, window_bounds = array<i64: 16, 128>}]} {
    %c0_i32 = arith.constant 0 : i32
    %0 = arith.cmpi eq, %arg1, %c0_i32 : i32
    %1 = arith.extui %0 : i1 to i32
    %c0_i32_0 = arith.constant 0 : i32
    %2 = arith.cmpi ne, %1, %c0_i32_0 : i32
    scf.if %2 {
      %c0_161 = arith.constant 0 : index
      %c0_162 = arith.constant 0 : index
      %495 = vector.load %arg2[%c0_161, %c0_162] : memref<16x32xf32, #tpu.memory_space<vmem>>, vector<16x32xf32>
      %c0_163 = arith.constant 0 : index
      %c0_164 = arith.constant 0 : index
      %496 = vector.load %arg26[%c0_163, %c0_164] : memref<16x32xf32, #tpu.memory_space<vmem>>, vector<16x32xf32>
      tpu.vector_store %arg26[%c0_163, %c0_164], %495 {strides = array<i32>} : memref<16x32xf32, #tpu.memory_space<vmem>>, vector<16x32xf32>,
    } else {
    }
    %c0 = arith.constant 0 : index
    %c0_1 = arith.constant 0 : index
    %3 = vector.load %arg26[%c0, %c0_1] : memref<16x32xf32, #tpu.memory_space<vmem>>, vector<16x32xf32>
    %c0_2 = arith.constant 0 : index
    %c0_3 = arith.constant 0 : index
    %4 = vector.load %arg2[%c0_2, %c0_3] : memref<16x32xf32, #tpu.memory_space<vmem>>, vector<16x32xf32>
    %c0_4 = arith.constant 0 : index
    %c0_5 = arith.constant 0 : index
    %c0_6 = arith.constant 0 : index
    %5 = vector.load %arg3[%c0_4, %c0_5, %c0_6] : memref<1x32x96xbf16, #tpu.memory_space<vmem>>, vector<1x32x96xbf16>
    %6 = vector.shape_cast %5 : vector<1x32x96xbf16> to vector<32x96xbf16>
    %c0_7 = arith.constant 0 : index
    %c0_8 = arith.constant 0 : index
    %c0_9 = arith.constant 0 : index
    %7 = vector.load %arg4[%c0_7, %c0_8, %c0_9] : memref<1x1x96xf32, #tpu.memory_space<vmem>>, vector<1x1x96xf32>
    %8 = vector.shape_cast %7 : vector<1x1x96xf32> to vector<1x96xf32>
    %9 = arith.truncf %3 : vector<16x32xf32> to vector<16x32xbf16>
    %cst = arith.constant dense<0.000000e+00> : vector<16x96xf32>
    %10 = tpu.matmul %9, %6, %cst {dimension_numbers = #tpu.dot_dimension_numbers<[1], [0], [0], [1], [0, 0, 1, 1], [], []>} : vector<16x32xbf16>, vector<32x96xbf16>, vector<16x96xf32> -> vector<16x96xf32>
    %11 = vector.broadcast %8 : vector<1x96xf32> to vector<16x96xf32>
    %12 = arith.addf %10, %11 : vector<16x96xf32>
    %13 = vector.extract_strided_slice %12 {offsets = [0, 0], sizes = [16, 32], strides = [1, 1]} : vector<16x96xf32> to vector<16x32xf32>
    %14 = vector.extract_strided_slice %12 {offsets = [0, 32], sizes = [16, 32], strides = [1, 1]} : vector<16x96xf32> to vector<16x32xf32>
    %15 = vector.extract_strided_slice %12 {offsets = [0, 64], sizes = [16, 32], strides = [1, 1]} : vector<16x96xf32> to vector<16x32xf32>
    %c0_10 = arith.constant 0 : index
    %c0_11 = arith.constant 0 : index
    %c0_12 = arith.constant 0 : index
    %16 = vector.load %arg5[%c0_10, %c0_11, %c0_12] : memref<1x32x32xbf16, #tpu.memory_space<vmem>>, vector<1x32x32xbf16>
    %17 = vector.shape_cast %16 : vector<1x32x32xbf16> to vector<32x32xbf16>
    %c0_13 = arith.constant 0 : index
    %c0_14 = arith.constant 0 : index
    %c0_15 = arith.constant 0 : index
    %18 = vector.load %arg6[%c0_13, %c0_14, %c0_15] : memref<1x1x32xf32, #tpu.memory_space<vmem>>, vector<1x1x32xf32>
    %19 = vector.shape_cast %18 : vector<1x1x32xf32> to vector<1x32xf32>
    %cst_16 = arith.constant 0.000000e+00 : f32
    %20 = vector.broadcast %cst_16 : f32 to vector<16x32xf32>
    %21 = vector.extract_strided_slice %13 {offsets = [0, 0], sizes = [16, 8], strides = [1, 1]} : vector<16x32xf32> to vector<16x8xf32>
    %22 = arith.truncf %21 : vector<16x8xf32> to vector<16x8xbf16>
    %23 = vector.extract_strided_slice %14 {offsets = [0, 0], sizes = [16, 8], strides = [1, 1]} : vector<16x32xf32> to vector<16x8xf32>
    %24 = arith.truncf %23 : vector<16x8xf32> to vector<16x8xbf16>
    %25 = vector.extract_strided_slice %15 {offsets = [0, 0], sizes = [16, 8], strides = [1, 1]} : vector<16x32xf32> to vector<16x8xf32>
    %26 = arith.truncf %25 : vector<16x8xf32> to vector<16x8xbf16>
    %27 = vector.extract_strided_slice %22 {offsets = [0, 0], sizes = [8, 8], strides = [1, 1]} : vector<16x8xbf16> to vector<8x8xbf16>
    %28 = vector.extract_strided_slice %24 {offsets = [0, 0], sizes = [8, 8], strides = [1, 1]} : vector<16x8xbf16> to vector<8x8xbf16>
    %cst_17 = arith.constant dense<0.000000e+00> : vector<8x8xf32>
    %29 = tpu.matmul %27, %28, %cst_17 {dimension_numbers = #tpu.dot_dimension_numbers<[1], [1], [0], [0], [0, 0, 1, 0], [], []>} : vector<8x8xbf16>, vector<8x8xbf16>, vector<8x8xf32> -> vector<8x8xf32>
    %cst_18 = arith.constant dense<0xFF800000> : vector<8xf32>
    %30 = vector.multi_reduction <maximumf>, %29, %cst_18 [1] : vector<8x8xf32> to vector<8xf32>
    %31 = vector.shape_cast %30 : vector<8xf32> to vector<8x1xf32>
    %32 = vector.broadcast %31 : vector<8x1xf32> to vector<8x8xf32>
    %33 = arith.subf %29, %32 : vector<8x8xf32>
    %34 = math.exp %33 : vector<8x8xf32>
    %cst_19 = arith.constant dense<0.000000e+00> : vector<8xf32>
    %35 = vector.multi_reduction <add>, %34, %cst_19 [1] : vector<8x8xf32> to vector<8xf32>
    %36 = vector.shape_cast %35 : vector<8xf32> to vector<8x1xf32>
    %37 = tpu.reciprocal %36 {approx = true} : vector<8x1xf32> -> vector<8x1xf32>
    %38 = vector.broadcast %37 : vector<8x1xf32> to vector<8x8xf32>
    %39 = arith.mulf %34, %38 : vector<8x8xf32>
    %40 = arith.truncf %39 : vector<8x8xf32> to vector<8x8xbf16>
    %41 = vector.extract_strided_slice %26 {offsets = [0, 0], sizes = [8, 8], strides = [1, 1]} : vector<16x8xbf16> to vector<8x8xbf16>
    %cst_20 = arith.constant dense<0.000000e+00> : vector<8x8xf32>
    %42 = tpu.matmul %40, %41, %cst_20 {dimension_numbers = #tpu.dot_dimension_numbers<[1], [0], [0], [1], [0, 0, 1, 1], [], []>} : vector<8x8xbf16>, vector<8x8xbf16>, vector<8x8xf32> -> vector<8x8xf32>
    %43 = vector.extract_strided_slice %22 {offsets = [8, 0], sizes = [8, 8], strides = [1, 1]} : vector<16x8xbf16> to vector<8x8xbf16>
    %44 = vector.extract_strided_slice %24 {offsets = [8, 0], sizes = [8, 8], strides = [1, 1]} : vector<16x8xbf16> to vector<8x8xbf16>
    %cst_21 = arith.constant dense<0.000000e+00> : vector<8x8xf32>
    %45 = tpu.matmul %43, %44, %cst_21 {dimension_numbers = #tpu.dot_dimension_numbers<[1], [1], [0], [0], [0, 0, 1, 0], [], []>} : vector<8x8xbf16>, vector<8x8xbf16>, vector<8x8xf32> -> vector<8x8xf32>
    %cst_22 = arith.constant dense<0xFF800000> : vector<8xf32>
    %46 = vector.multi_reduction <maximumf>, %45, %cst_22 [1] : vector<8x8xf32> to vector<8xf32>
    %47 = vector.shape_cast %46 : vector<8xf32> to vector<8x1xf32>
    %48 = vector.broadcast %47 : vector<8x1xf32> to vector<8x8xf32>
    %49 = arith.subf %45, %48 : vector<8x8xf32>
    %50 = math.exp %49 : vector<8x8xf32>
    %cst_23 = arith.constant dense<0.000000e+00> : vector<8xf32>
    %51 = vector.multi_reduction <add>, %50, %cst_23 [1] : vector<8x8xf32> to vector<8xf32>
    %52 = vector.shape_cast %51 : vector<8xf32> to vector<8x1xf32>
    %53 = tpu.reciprocal %52 {approx = true} : vector<8x1xf32> -> vector<8x1xf32>
    %54 = vector.broadcast %53 : vector<8x1xf32> to vector<8x8xf32>
    %55 = arith.mulf %50, %54 : vector<8x8xf32>
    %56 = arith.truncf %55 : vector<8x8xf32> to vector<8x8xbf16>
    %57 = vector.extract_strided_slice %26 {offsets = [8, 0], sizes = [8, 8], strides = [1, 1]} : vector<16x8xbf16> to vector<8x8xbf16>
    %cst_24 = arith.constant dense<0.000000e+00> : vector<8x8xf32>
    %58 = tpu.matmul %56, %57, %cst_24 {dimension_numbers = #tpu.dot_dimension_numbers<[1], [0], [0], [1], [0, 0, 1, 1], [], []>} : vector<8x8xbf16>, vector<8x8xbf16>, vector<8x8xf32> -> vector<8x8xf32>
    %59 = tpu.concatenate %42, %58 in 0 : vector<8x8xf32>, vector<8x8xf32> -> vector<16x8xf32>
    %60 = arith.truncf %59 : vector<16x8xf32> to vector<16x8xbf16>
    %61 = vector.extract_strided_slice %17 {offsets = [0, 0], sizes = [8, 32], strides = [1, 1]} : vector<32x32xbf16> to vector<8x32xbf16>
    %cst_25 = arith.constant dense<0.000000e+00> : vector<16x32xf32>
    %62 = tpu.matmul %60, %61, %cst_25 {dimension_numbers = #tpu.dot_dimension_numbers<[1], [0], [0], [1], [0, 0, 1, 1], [], []>} : vector<16x8xbf16>, vector<8x32xbf16>, vector<16x32xf32> -> vector<16x32xf32>
    %63 = arith.addf %20, %62 : vector<16x32xf32>
    %64 = vector.extract_strided_slice %13 {offsets = [0, 8], sizes = [16, 8], strides = [1, 1]} : vector<16x32xf32> to vector<16x8xf32>
    %65 = arith.truncf %64 : vector<16x8xf32> to vector<16x8xbf16>
    %66 = vector.extract_strided_slice %14 {offsets = [0, 8], sizes = [16, 8], strides = [1, 1]} : vector<16x32xf32> to vector<16x8xf32>
    %67 = arith.truncf %66 : vector<16x8xf32> to vector<16x8xbf16>
    %68 = vector.extract_strided_slice %15 {offsets = [0, 8], sizes = [16, 8], strides = [1, 1]} : vector<16x32xf32> to vector<16x8xf32>
    %69 = arith.truncf %68 : vector<16x8xf32> to vector<16x8xbf16>
    %70 = vector.extract_strided_slice %65 {offsets = [0, 0], sizes = [8, 8], strides = [1, 1]} : vector<16x8xbf16> to vector<8x8xbf16>
    %71 = vector.extract_strided_slice %67 {offsets = [0, 0], sizes = [8, 8], strides = [1, 1]} : vector<16x8xbf16> to vector<8x8xbf16>
    %cst_26 = arith.constant dense<0.000000e+00> : vector<8x8xf32>
    %72 = tpu.matmul %70, %71, %cst_26 {dimension_numbers = #tpu.dot_dimension_numbers<[1], [1], [0], [0], [0, 0, 1, 0], [], []>} : vector<8x8xbf16>, vector<8x8xbf16>, vector<8x8xf32> -> vector<8x8xf32>
    %cst_27 = arith.constant dense<0xFF800000> : vector<8xf32>
    %73 = vector.multi_reduction <maximumf>, %72, %cst_27 [1] : vector<8x8xf32> to vector<8xf32>
    %74 = vector.shape_cast %73 : vector<8xf32> to vector<8x1xf32>
    %75 = vector.broadcast %74 : vector<8x1xf32> to vector<8x8xf32>
    %76 = arith.subf %72, %75 : vector<8x8xf32>
    %77 = math.exp %76 : vector<8x8xf32>
    %cst_28 = arith.constant dense<0.000000e+00> : vector<8xf32>
    %78 = vector.multi_reduction <add>, %77, %cst_28 [1] : vector<8x8xf32> to vector<8xf32>
    %79 = vector.shape_cast %78 : vector<8xf32> to vector<8x1xf32>
    %80 = tpu.reciprocal %79 {approx = true} : vector<8x1xf32> -> vector<8x1xf32>
    %81 = vector.broadcast %80 : vector<8x1xf32> to vector<8x8xf32>
    %82 = arith.mulf %77, %81 : vector<8x8xf32>
    %83 = arith.truncf %82 : vector<8x8xf32> to vector<8x8xbf16>
    %84 = vector.extract_strided_slice %69 {offsets = [0, 0], sizes = [8, 8], strides = [1, 1]} : vector<16x8xbf16> to vector<8x8xbf16>
    %cst_29 = arith.constant dense<0.000000e+00> : vector<8x8xf32>
    %85 = tpu.matmul %83, %84, %cst_29 {dimension_numbers = #tpu.dot_dimension_numbers<[1], [0], [0], [1], [0, 0, 1, 1], [], []>} : vector<8x8xbf16>, vector<8x8xbf16>, vector<8x8xf32> -> vector<8x8xf32>
    %86 = vector.extract_strided_slice %65 {offsets = [8, 0], sizes = [8, 8], strides = [1, 1]} : vector<16x8xbf16> to vector<8x8xbf16>
    %87 = vector.extract_strided_slice %67 {offsets = [8, 0], sizes = [8, 8], strides = [1, 1]} : vector<16x8xbf16> to vector<8x8xbf16>
    %cst_30 = arith.constant dense<0.000000e+00> : vector<8x8xf32>
    %88 = tpu.matmul %86, %87, %cst_30 {dimension_numbers = #tpu.dot_dimension_numbers<[1], [1], [0], [0], [0, 0, 1, 0], [], []>} : vector<8x8xbf16>, vector<8x8xbf16>, vector<8x8xf32> -> vector<8x8xf32>
    %cst_31 = arith.constant dense<0xFF800000> : vector<8xf32>
    %89 = vector.multi_reduction <maximumf>, %88, %cst_31 [1] : vector<8x8xf32> to vector<8xf32>
    %90 = vector.shape_cast %89 : vector<8xf32> to vector<8x1xf32>
    %91 = vector.broadcast %90 : vector<8x1xf32> to vector<8x8xf32>
    %92 = arith.subf %88, %91 : vector<8x8xf32>
    %93 = math.exp %92 : vector<8x8xf32>
    %cst_32 = arith.constant dense<0.000000e+00> : vector<8xf32>
    %94 = vector.multi_reduction <add>, %93, %cst_32 [1] : vector<8x8xf32> to vector<8xf32>
    %95 = vector.shape_cast %94 : vector<8xf32> to vector<8x1xf32>
    %96 = tpu.reciprocal %95 {approx = true} : vector<8x1xf32> -> vector<8x1xf32>
    %97 = vector.broadcast %96 : vector<8x1xf32> to vector<8x8xf32>
    %98 = arith.mulf %93, %97 : vector<8x8xf32>
    %99 = arith.truncf %98 : vector<8x8xf32> to vector<8x8xbf16>
    %100 = vector.extract_strided_slice %69 {offsets = [8, 0], sizes = [8, 8], strides = [1, 1]} : vector<16x8xbf16> to vector<8x8xbf16>
    %cst_33 = arith.constant dense<0.000000e+00> : vector<8x8xf32>
    %101 = tpu.matmul %99, %100, %cst_33 {dimension_numbers = #tpu.dot_dimension_numbers<[1], [0], [0], [1], [0, 0, 1, 1], [], []>} : vector<8x8xbf16>, vector<8x8xbf16>, vector<8x8xf32> -> vector<8x8xf32>
    %102 = tpu.concatenate %85, %101 in 0 : vector<8x8xf32>, vector<8x8xf32> -> vector<16x8xf32>
    %103 = arith.truncf %102 : vector<16x8xf32> to vector<16x8xbf16>
    %104 = vector.extract_strided_slice %17 {offsets = [8, 0], sizes = [8, 32], strides = [1, 1]} : vector<32x32xbf16> to vector<8x32xbf16>
    %cst_34 = arith.constant dense<0.000000e+00> : vector<16x32xf32>
    %105 = tpu.matmul %103, %104, %cst_34 {dimension_numbers = #tpu.dot_dimension_numbers<[1], [0], [0], [1], [0, 0, 1, 1], [], []>} : vector<16x8xbf16>, vector<8x32xbf16>, vector<16x32xf32> -> vector<16x32xf32>
    %106 = arith.addf %63, %105 : vector<16x32xf32>
    %107 = vector.extract_strided_slice %13 {offsets = [0, 16], sizes = [16, 8], strides = [1, 1]} : vector<16x32xf32> to vector<16x8xf32>
    %108 = arith.truncf %107 : vector<16x8xf32> to vector<16x8xbf16>
    %109 = vector.extract_strided_slice %14 {offsets = [0, 16], sizes = [16, 8], strides = [1, 1]} : vector<16x32xf32> to vector<16x8xf32>
    %110 = arith.truncf %109 : vector<16x8xf32> to vector<16x8xbf16>
    %111 = vector.extract_strided_slice %15 {offsets = [0, 16], sizes = [16, 8], strides = [1, 1]} : vector<16x32xf32> to vector<16x8xf32>
    %112 = arith.truncf %111 : vector<16x8xf32> to vector<16x8xbf16>
    %113 = vector.extract_strided_slice %108 {offsets = [0, 0], sizes = [8, 8], strides = [1, 1]} : vector<16x8xbf16> to vector<8x8xbf16>
    %114 = vector.extract_strided_slice %110 {offsets = [0, 0], sizes = [8, 8], strides = [1, 1]} : vector<16x8xbf16> to vector<8x8xbf16>
    %cst_35 = arith.constant dense<0.000000e+00> : vector<8x8xf32>
    %115 = tpu.matmul %113, %114, %cst_35 {dimension_numbers = #tpu.dot_dimension_numbers<[1], [1], [0], [0], [0, 0, 1, 0], [], []>} : vector<8x8xbf16>, vector<8x8xbf16>, vector<8x8xf32> -> vector<8x8xf32>
    %cst_36 = arith.constant dense<0xFF800000> : vector<8xf32>
    %116 = vector.multi_reduction <maximumf>, %115, %cst_36 [1] : vector<8x8xf32> to vector<8xf32>
    %117 = vector.shape_cast %116 : vector<8xf32> to vector<8x1xf32>
    %118 = vector.broadcast %117 : vector<8x1xf32> to vector<8x8xf32>
    %119 = arith.subf %115, %118 : vector<8x8xf32>
    %120 = math.exp %119 : vector<8x8xf32>
    %cst_37 = arith.constant dense<0.000000e+00> : vector<8xf32>
    %121 = vector.multi_reduction <add>, %120, %cst_37 [1] : vector<8x8xf32> to vector<8xf32>
    %122 = vector.shape_cast %121 : vector<8xf32> to vector<8x1xf32>
    %123 = tpu.reciprocal %122 {approx = true} : vector<8x1xf32> -> vector<8x1xf32>
    %124 = vector.broadcast %123 : vector<8x1xf32> to vector<8x8xf32>
    %125 = arith.mulf %120, %124 : vector<8x8xf32>
    %126 = arith.truncf %125 : vector<8x8xf32> to vector<8x8xbf16>
    %127 = vector.extract_strided_slice %112 {offsets = [0, 0], sizes = [8, 8], strides = [1, 1]} : vector<16x8xbf16> to vector<8x8xbf16>
    %cst_38 = arith.constant dense<0.000000e+00> : vector<8x8xf32>
    %128 = tpu.matmul %126, %127, %cst_38 {dimension_numbers = #tpu.dot_dimension_numbers<[1], [0], [0], [1], [0, 0, 1, 1], [], []>} : vector<8x8xbf16>, vector<8x8xbf16>, vector<8x8xf32> -> vector<8x8xf32>
    %129 = vector.extract_strided_slice %108 {offsets = [8, 0], sizes = [8, 8], strides = [1, 1]} : vector<16x8xbf16> to vector<8x8xbf16>
    %130 = vector.extract_strided_slice %110 {offsets = [8, 0], sizes = [8, 8], strides = [1, 1]} : vector<16x8xbf16> to vector<8x8xbf16>
    %cst_39 = arith.constant dense<0.000000e+00> : vector<8x8xf32>
    %131 = tpu.matmul %129, %130, %cst_39 {dimension_numbers = #tpu.dot_dimension_numbers<[1], [1], [0], [0], [0, 0, 1, 0], [], []>} : vector<8x8xbf16>, vector<8x8xbf16>, vector<8x8xf32> -> vector<8x8xf32>
    %cst_40 = arith.constant dense<0xFF800000> : vector<8xf32>
    %132 = vector.multi_reduction <maximumf>, %131, %cst_40 [1] : vector<8x8xf32> to vector<8xf32>
    %133 = vector.shape_cast %132 : vector<8xf32> to vector<8x1xf32>
    %134 = vector.broadcast %133 : vector<8x1xf32> to vector<8x8xf32>
    %135 = arith.subf %131, %134 : vector<8x8xf32>
    %136 = math.exp %135 : vector<8x8xf32>
    %cst_41 = arith.constant dense<0.000000e+00> : vector<8xf32>
    %137 = vector.multi_reduction <add>, %136, %cst_41 [1] : vector<8x8xf32> to vector<8xf32>
    %138 = vector.shape_cast %137 : vector<8xf32> to vector<8x1xf32>
    %139 = tpu.reciprocal %138 {approx = true} : vector<8x1xf32> -> vector<8x1xf32>
    %140 = vector.broadcast %139 : vector<8x1xf32> to vector<8x8xf32>
    %141 = arith.mulf %136, %140 : vector<8x8xf32>
    %142 = arith.truncf %141 : vector<8x8xf32> to vector<8x8xbf16>
    %143 = vector.extract_strided_slice %112 {offsets = [8, 0], sizes = [8, 8], strides = [1, 1]} : vector<16x8xbf16> to vector<8x8xbf16>
    %cst_42 = arith.constant dense<0.000000e+00> : vector<8x8xf32>
    %144 = tpu.matmul %142, %143, %cst_42 {dimension_numbers = #tpu.dot_dimension_numbers<[1], [0], [0], [1], [0, 0, 1, 1], [], []>} : vector<8x8xbf16>, vector<8x8xbf16>, vector<8x8xf32> -> vector<8x8xf32>
    %145 = tpu.concatenate %128, %144 in 0 : vector<8x8xf32>, vector<8x8xf32> -> vector<16x8xf32>
    %146 = arith.truncf %145 : vector<16x8xf32> to vector<16x8xbf16>
    %147 = vector.extract_strided_slice %17 {offsets = [16, 0], sizes = [8, 32], strides = [1, 1]} : vector<32x32xbf16> to vector<8x32xbf16>
    %cst_43 = arith.constant dense<0.000000e+00> : vector<16x32xf32>
    %148 = tpu.matmul %146, %147, %cst_43 {dimension_numbers = #tpu.dot_dimension_numbers<[1], [0], [0], [1], [0, 0, 1, 1], [], []>} : vector<16x8xbf16>, vector<8x32xbf16>, vector<16x32xf32> -> vector<16x32xf32>
    %149 = arith.addf %106, %148 : vector<16x32xf32>
    %150 = vector.extract_strided_slice %13 {offsets = [0, 24], sizes = [16, 8], strides = [1, 1]} : vector<16x32xf32> to vector<16x8xf32>
    %151 = arith.truncf %150 : vector<16x8xf32> to vector<16x8xbf16>
    %152 = vector.extract_strided_slice %14 {offsets = [0, 24], sizes = [16, 8], strides = [1, 1]} : vector<16x32xf32> to vector<16x8xf32>
    %153 = arith.truncf %152 : vector<16x8xf32> to vector<16x8xbf16>
    %154 = vector.extract_strided_slice %15 {offsets = [0, 24], sizes = [16, 8], strides = [1, 1]} : vector<16x32xf32> to vector<16x8xf32>
    %155 = arith.truncf %154 : vector<16x8xf32> to vector<16x8xbf16>
    %156 = vector.extract_strided_slice %151 {offsets = [0, 0], sizes = [8, 8], strides = [1, 1]} : vector<16x8xbf16> to vector<8x8xbf16>
    %157 = vector.extract_strided_slice %153 {offsets = [0, 0], sizes = [8, 8], strides = [1, 1]} : vector<16x8xbf16> to vector<8x8xbf16>
    %cst_44 = arith.constant dense<0.000000e+00> : vector<8x8xf32>
    %158 = tpu.matmul %156, %157, %cst_44 {dimension_numbers = #tpu.dot_dimension_numbers<[1], [1], [0], [0], [0, 0, 1, 0], [], []>} : vector<8x8xbf16>, vector<8x8xbf16>, vector<8x8xf32> -> vector<8x8xf32>
    %cst_45 = arith.constant dense<0xFF800000> : vector<8xf32>
    %159 = vector.multi_reduction <maximumf>, %158, %cst_45 [1] : vector<8x8xf32> to vector<8xf32>
    %160 = vector.shape_cast %159 : vector<8xf32> to vector<8x1xf32>
    %161 = vector.broadcast %160 : vector<8x1xf32> to vector<8x8xf32>
    %162 = arith.subf %158, %161 : vector<8x8xf32>
    %163 = math.exp %162 : vector<8x8xf32>
    %cst_46 = arith.constant dense<0.000000e+00> : vector<8xf32>
    %164 = vector.multi_reduction <add>, %163, %cst_46 [1] : vector<8x8xf32> to vector<8xf32>
    %165 = vector.shape_cast %164 : vector<8xf32> to vector<8x1xf32>
    %166 = tpu.reciprocal %165 {approx = true} : vector<8x1xf32> -> vector<8x1xf32>
    %167 = vector.broadcast %166 : vector<8x1xf32> to vector<8x8xf32>
    %168 = arith.mulf %163, %167 : vector<8x8xf32>
    %169 = arith.truncf %168 : vector<8x8xf32> to vector<8x8xbf16>
    %170 = vector.extract_strided_slice %155 {offsets = [0, 0], sizes = [8, 8], strides = [1, 1]} : vector<16x8xbf16> to vector<8x8xbf16>
    %cst_47 = arith.constant dense<0.000000e+00> : vector<8x8xf32>
    %171 = tpu.matmul %169, %170, %cst_47 {dimension_numbers = #tpu.dot_dimension_numbers<[1], [0], [0], [1], [0, 0, 1, 1], [], []>} : vector<8x8xbf16>, vector<8x8xbf16>, vector<8x8xf32> -> vector<8x8xf32>
    %172 = vector.extract_strided_slice %151 {offsets = [8, 0], sizes = [8, 8], strides = [1, 1]} : vector<16x8xbf16> to vector<8x8xbf16>
    %173 = vector.extract_strided_slice %153 {offsets = [8, 0], sizes = [8, 8], strides = [1, 1]} : vector<16x8xbf16> to vector<8x8xbf16>
    %cst_48 = arith.constant dense<0.000000e+00> : vector<8x8xf32>
    %174 = tpu.matmul %172, %173, %cst_48 {dimension_numbers = #tpu.dot_dimension_numbers<[1], [1], [0], [0], [0, 0, 1, 0], [], []>} : vector<8x8xbf16>, vector<8x8xbf16>, vector<8x8xf32> -> vector<8x8xf32>
    %cst_49 = arith.constant dense<0xFF800000> : vector<8xf32>
    %175 = vector.multi_reduction <maximumf>, %174, %cst_49 [1] : vector<8x8xf32> to vector<8xf32>
    %176 = vector.shape_cast %175 : vector<8xf32> to vector<8x1xf32>
    %177 = vector.broadcast %176 : vector<8x1xf32> to vector<8x8xf32>
    %178 = arith.subf %174, %177 : vector<8x8xf32>
    %179 = math.exp %178 : vector<8x8xf32>
    %cst_50 = arith.constant dense<0.000000e+00> : vector<8xf32>
    %180 = vector.multi_reduction <add>, %179, %cst_50 [1] : vector<8x8xf32> to vector<8xf32>
    %181 = vector.shape_cast %180 : vector<8xf32> to vector<8x1xf32>
    %182 = tpu.reciprocal %181 {approx = true} : vector<8x1xf32> -> vector<8x1xf32>
    %183 = vector.broadcast %182 : vector<8x1xf32> to vector<8x8xf32>
    %184 = arith.mulf %179, %183 : vector<8x8xf32>
    %185 = arith.truncf %184 : vector<8x8xf32> to vector<8x8xbf16>
    %186 = vector.extract_strided_slice %155 {offsets = [8, 0], sizes = [8, 8], strides = [1, 1]} : vector<16x8xbf16> to vector<8x8xbf16>
    %cst_51 = arith.constant dense<0.000000e+00> : vector<8x8xf32>
    %187 = tpu.matmul %185, %186, %cst_51 {dimension_numbers = #tpu.dot_dimension_numbers<[1], [0], [0], [1], [0, 0, 1, 1], [], []>} : vector<8x8xbf16>, vector<8x8xbf16>, vector<8x8xf32> -> vector<8x8xf32>
    %188 = tpu.concatenate %171, %187 in 0 : vector<8x8xf32>, vector<8x8xf32> -> vector<16x8xf32>
    %189 = arith.truncf %188 : vector<16x8xf32> to vector<16x8xbf16>
    %190 = vector.extract_strided_slice %17 {offsets = [24, 0], sizes = [8, 32], strides = [1, 1]} : vector<32x32xbf16> to vector<8x32xbf16>
    %cst_52 = arith.constant dense<0.000000e+00> : vector<16x32xf32>
    %191 = tpu.matmul %189, %190, %cst_52 {dimension_numbers = #tpu.dot_dimension_numbers<[1], [0], [0], [1], [0, 0, 1, 1], [], []>} : vector<16x8xbf16>, vector<8x32xbf16>, vector<16x32xf32> -> vector<16x32xf32>
    %192 = arith.addf %149, %191 : vector<16x32xf32>
    %193 = vector.broadcast %19 : vector<1x32xf32> to vector<16x32xf32>
    %194 = arith.addf %192, %193 : vector<16x32xf32>
    %195 = arith.addf %3, %194 : vector<16x32xf32>
    %c0_53 = arith.constant 0 : index
    %c0_54 = arith.constant 0 : index
    %c0_55 = arith.constant 0 : index
    %196 = vector.load %arg7[%c0_53, %c0_54, %c0_55] : memref<1x1x32xf32, #tpu.memory_space<vmem>>, vector<1x1x32xf32>
    %197 = vector.shape_cast %196 : vector<1x1x32xf32> to vector<1x32xf32>
    %c0_56 = arith.constant 0 : index
    %c0_57 = arith.constant 0 : index
    %c0_58 = arith.constant 0 : index
    %198 = vector.load %arg8[%c0_56, %c0_57, %c0_58] : memref<1x1x32xf32, #tpu.memory_space<vmem>>, vector<1x1x32xf32>
    %199 = vector.shape_cast %198 : vector<1x1x32xf32> to vector<1x32xf32>
    %cst_59 = arith.constant dense<0.000000e+00> : vector<16xf32>
    %200 = vector.multi_reduction <add>, %195, %cst_59 [1] : vector<16x32xf32> to vector<16xf32>
    %201 = vector.shape_cast %200 : vector<16xf32> to vector<16x1xf32>
    %cst_60 = arith.constant 3.200000e+01 : f32
    %202 = vector.broadcast %cst_60 : f32 to vector<16x1xf32>
    %203 = arith.divf %201, %202 : vector<16x1xf32>
    %204 = vector.broadcast %203 : vector<16x1xf32> to vector<16x32xf32>
    %205 = arith.subf %195, %204 : vector<16x32xf32>
    %206 = arith.mulf %205, %205 : vector<16x32xf32>
    %cst_61 = arith.constant dense<0.000000e+00> : vector<16xf32>
    %207 = vector.multi_reduction <add>, %206, %cst_61 [1] : vector<16x32xf32> to vector<16xf32>
    %208 = vector.shape_cast %207 : vector<16xf32> to vector<16x1xf32>
    %cst_62 = arith.constant 3.200000e+01 : f32
    %209 = vector.broadcast %cst_62 : f32 to vector<16x1xf32>
    %210 = arith.divf %208, %209 : vector<16x1xf32>
    %211 = vector.broadcast %203 : vector<16x1xf32> to vector<16x32xf32>
    %212 = arith.subf %195, %211 : vector<16x32xf32>
    %cst_63 = arith.constant 9.99999974E-6 : f32
    %213 = vector.broadcast %cst_63 : f32 to vector<16x1xf32>
    %214 = arith.addf %210, %213 : vector<16x1xf32>
    %215 = math.rsqrt %214 : vector<16x1xf32>
    %216 = vector.broadcast %215 : vector<16x1xf32> to vector<16x32xf32>
    %217 = arith.mulf %212, %216 : vector<16x32xf32>
    %218 = vector.broadcast %197 : vector<1x32xf32> to vector<16x32xf32>
    %219 = arith.mulf %217, %218 : vector<16x32xf32>
    %220 = vector.broadcast %199 : vector<1x32xf32> to vector<16x32xf32>
    %221 = arith.addf %219, %220 : vector<16x32xf32>
    %c0_64 = arith.constant 0 : index
    %c0_65 = arith.constant 0 : index
    %c0_66 = arith.constant 0 : index
    %222 = vector.load %arg9[%c0_64, %c0_65, %c0_66] : memref<1x32x32xbf16, #tpu.memory_space<vmem>>, vector<1x32x32xbf16>
    %223 = vector.shape_cast %222 : vector<1x32x32xbf16> to vector<32x32xbf16>
    %c0_67 = arith.constant 0 : index
    %c0_68 = arith.constant 0 : index
    %c0_69 = arith.constant 0 : index
    %224 = vector.load %arg10[%c0_67, %c0_68, %c0_69] : memref<1x1x32xf32, #tpu.memory_space<vmem>>, vector<1x1x32xf32>
    %225 = vector.shape_cast %224 : vector<1x1x32xf32> to vector<1x32xf32>
    %226 = arith.truncf %221 : vector<16x32xf32> to vector<16x32xbf16>
    %cst_70 = arith.constant dense<0.000000e+00> : vector<16x32xf32>
    %227 = tpu.matmul %226, %223, %cst_70 {dimension_numbers = #tpu.dot_dimension_numbers<[1], [0], [0], [1], [0, 0, 1, 1], [], []>} : vector<16x32xbf16>, vector<32x32xbf16>, vector<16x32xf32> -> vector<16x32xf32>
    %228 = vector.broadcast %225 : vector<1x32xf32> to vector<16x32xf32>
    %229 = arith.addf %227, %228 : vector<16x32xf32>
    %c0_71 = arith.constant 0 : index
    %c0_72 = arith.constant 0 : index
    %c0_73 = arith.constant 0 : index
    %230 = vector.load %arg11[%c0_71, %c0_72, %c0_73] : memref<1x32x64xbf16, #tpu.memory_space<vmem>>, vector<1x32x64xbf16>
    %231 = vector.shape_cast %230 : vector<1x32x64xbf16> to vector<32x64xbf16>
    %c0_74 = arith.constant 0 : index
    %c0_75 = arith.constant 0 : index
    %c0_76 = arith.constant 0 : index
    %232 = vector.load %arg12[%c0_74, %c0_75, %c0_76] : memref<1x1x64xf32, #tpu.memory_space<vmem>>, vector<1x1x64xf32>
    %233 = vector.shape_cast %232 : vector<1x1x64xf32> to vector<1x64xf32>
    %234 = arith.truncf %4 : vector<16x32xf32> to vector<16x32xbf16>
    %cst_77 = arith.constant dense<0.000000e+00> : vector<16x64xf32>
    %235 = tpu.matmul %234, %231, %cst_77 {dimension_numbers = #tpu.dot_dimension_numbers<[1], [0], [0], [1], [0, 0, 1, 1], [], []>} : vector<16x32xbf16>, vector<32x64xbf16>, vector<16x64xf32> -> vector<16x64xf32>
    %236 = vector.broadcast %233 : vector<1x64xf32> to vector<16x64xf32>
    %237 = arith.addf %235, %236 : vector<16x64xf32>
    %238 = vector.extract_strided_slice %237 {offsets = [0, 0], sizes = [16, 32], strides = [1, 1]} : vector<16x64xf32> to vector<16x32xf32>
    %239 = vector.extract_strided_slice %237 {offsets = [0, 32], sizes = [16, 32], strides = [1, 1]} : vector<16x64xf32> to vector<16x32xf32>
    %c0_78 = arith.constant 0 : index
    %c0_79 = arith.constant 0 : index
    %c0_80 = arith.constant 0 : index
    %240 = vector.load %arg13[%c0_78, %c0_79, %c0_80] : memref<1x32x32xbf16, #tpu.memory_space<vmem>>, vector<1x32x32xbf16>
    %241 = vector.shape_cast %240 : vector<1x32x32xbf16> to vector<32x32xbf16>
    %c0_81 = arith.constant 0 : index
    %c0_82 = arith.constant 0 : index
    %c0_83 = arith.constant 0 : index
    %242 = vector.load %arg14[%c0_81, %c0_82, %c0_83] : memref<1x1x32xf32, #tpu.memory_space<vmem>>, vector<1x1x32xf32>
    %243 = vector.shape_cast %242 : vector<1x1x32xf32> to vector<1x32xf32>
    %cst_84 = arith.constant 0.000000e+00 : f32
    %244 = vector.broadcast %cst_84 : f32 to vector<16x32xf32>
    %245 = vector.extract_strided_slice %229 {offsets = [0, 0], sizes = [16, 8], strides = [1, 1]} : vector<16x32xf32> to vector<16x8xf32>
    %246 = arith.truncf %245 : vector<16x8xf32> to vector<16x8xbf16>
    %247 = vector.extract_strided_slice %238 {offsets = [0, 0], sizes = [16, 8], strides = [1, 1]} : vector<16x32xf32> to vector<16x8xf32>
    %248 = arith.truncf %247 : vector<16x8xf32> to vector<16x8xbf16>
    %249 = vector.extract_strided_slice %239 {offsets = [0, 0], sizes = [16, 8], strides = [1, 1]} : vector<16x32xf32> to vector<16x8xf32>
    %250 = arith.truncf %249 : vector<16x8xf32> to vector<16x8xbf16>
    %251 = vector.extract_strided_slice %246 {offsets = [0, 0], sizes = [8, 8], strides = [1, 1]} : vector<16x8xbf16> to vector<8x8xbf16>
    %252 = vector.extract_strided_slice %248 {offsets = [0, 0], sizes = [8, 8], strides = [1, 1]} : vector<16x8xbf16> to vector<8x8xbf16>
    %cst_85 = arith.constant dense<0.000000e+00> : vector<8x8xf32>
    %253 = tpu.matmul %251, %252, %cst_85 {dimension_numbers = #tpu.dot_dimension_numbers<[1], [1], [0], [0], [0, 0, 1, 0], [], []>} : vector<8x8xbf16>, vector<8x8xbf16>, vector<8x8xf32> -> vector<8x8xf32>
    %cst_86 = arith.constant dense<0xFF800000> : vector<8xf32>
    %254 = vector.multi_reduction <maximumf>, %253, %cst_86 [1] : vector<8x8xf32> to vector<8xf32>
    %255 = vector.shape_cast %254 : vector<8xf32> to vector<8x1xf32>
    %256 = vector.broadcast %255 : vector<8x1xf32> to vector<8x8xf32>
    %257 = arith.subf %253, %256 : vector<8x8xf32>
    %258 = math.exp %257 : vector<8x8xf32>
    %cst_87 = arith.constant dense<0.000000e+00> : vector<8xf32>
    %259 = vector.multi_reduction <add>, %258, %cst_87 [1] : vector<8x8xf32> to vector<8xf32>
    %260 = vector.shape_cast %259 : vector<8xf32> to vector<8x1xf32>
    %261 = tpu.reciprocal %260 {approx = true} : vector<8x1xf32> -> vector<8x1xf32>
    %262 = vector.broadcast %261 : vector<8x1xf32> to vector<8x8xf32>
    %263 = arith.mulf %258, %262 : vector<8x8xf32>
    %264 = arith.truncf %263 : vector<8x8xf32> to vector<8x8xbf16>
    %265 = vector.extract_strided_slice %250 {offsets = [0, 0], sizes = [8, 8], strides = [1, 1]} : vector<16x8xbf16> to vector<8x8xbf16>
    %cst_88 = arith.constant dense<0.000000e+00> : vector<8x8xf32>
    %266 = tpu.matmul %264, %265, %cst_88 {dimension_numbers = #tpu.dot_dimension_numbers<[1], [0], [0], [1], [0, 0, 1, 1], [], []>} : vector<8x8xbf16>, vector<8x8xbf16>, vector<8x8xf32> -> vector<8x8xf32>
    %267 = vector.extract_strided_slice %246 {offsets = [8, 0], sizes = [8, 8], strides = [1, 1]} : vector<16x8xbf16> to vector<8x8xbf16>
    %268 = vector.extract_strided_slice %248 {offsets = [8, 0], sizes = [8, 8], strides = [1, 1]} : vector<16x8xbf16> to vector<8x8xbf16>
    %cst_89 = arith.constant dense<0.000000e+00> : vector<8x8xf32>
    %269 = tpu.matmul %267, %268, %cst_89 {dimension_numbers = #tpu.dot_dimension_numbers<[1], [1], [0], [0], [0, 0, 1, 0], [], []>} : vector<8x8xbf16>, vector<8x8xbf16>, vector<8x8xf32> -> vector<8x8xf32>
    %cst_90 = arith.constant dense<0xFF800000> : vector<8xf32>
    %270 = vector.multi_reduction <maximumf>, %269, %cst_90 [1] : vector<8x8xf32> to vector<8xf32>
    %271 = vector.shape_cast %270 : vector<8xf32> to vector<8x1xf32>
    %272 = vector.broadcast %271 : vector<8x1xf32> to vector<8x8xf32>
    %273 = arith.subf %269, %272 : vector<8x8xf32>
    %274 = math.exp %273 : vector<8x8xf32>
    %cst_91 = arith.constant dense<0.000000e+00> : vector<8xf32>
    %275 = vector.multi_reduction <add>, %274, %cst_91 [1] : vector<8x8xf32> to vector<8xf32>
    %276 = vector.shape_cast %275 : vector<8xf32> to vector<8x1xf32>
    %277 = tpu.reciprocal %276 {approx = true} : vector<8x1xf32> -> vector<8x1xf32>
    %278 = vector.broadcast %277 : vector<8x1xf32> to vector<8x8xf32>
    %279 = arith.mulf %274, %278 : vector<8x8xf32>
    %280 = arith.truncf %279 : vector<8x8xf32> to vector<8x8xbf16>
    %281 = vector.extract_strided_slice %250 {offsets = [8, 0], sizes = [8, 8], strides = [1, 1]} : vector<16x8xbf16> to vector<8x8xbf16>
    %cst_92 = arith.constant dense<0.000000e+00> : vector<8x8xf32>
    %282 = tpu.matmul %280, %281, %cst_92 {dimension_numbers = #tpu.dot_dimension_numbers<[1], [0], [0], [1], [0, 0, 1, 1], [], []>} : vector<8x8xbf16>, vector<8x8xbf16>, vector<8x8xf32> -> vector<8x8xf32>
    %283 = tpu.concatenate %266, %282 in 0 : vector<8x8xf32>, vector<8x8xf32> -> vector<16x8xf32>
    %284 = arith.truncf %283 : vector<16x8xf32> to vector<16x8xbf16>
    %285 = vector.extract_strided_slice %241 {offsets = [0, 0], sizes = [8, 32], strides = [1, 1]} : vector<32x32xbf16> to vector<8x32xbf16>
    %cst_93 = arith.constant dense<0.000000e+00> : vector<16x32xf32>
    %286 = tpu.matmul %284, %285, %cst_93 {dimension_numbers = #tpu.dot_dimension_numbers<[1], [0], [0], [1], [0, 0, 1, 1], [], []>} : vector<16x8xbf16>, vector<8x32xbf16>, vector<16x32xf32> -> vector<16x32xf32>
    %287 = arith.addf %244, %286 : vector<16x32xf32>
    %288 = vector.extract_strided_slice %229 {offsets = [0, 8], sizes = [16, 8], strides = [1, 1]} : vector<16x32xf32> to vector<16x8xf32>
    %289 = arith.truncf %288 : vector<16x8xf32> to vector<16x8xbf16>
    %290 = vector.extract_strided_slice %238 {offsets = [0, 8], sizes = [16, 8], strides = [1, 1]} : vector<16x32xf32> to vector<16x8xf32>
    %291 = arith.truncf %290 : vector<16x8xf32> to vector<16x8xbf16>
    %292 = vector.extract_strided_slice %239 {offsets = [0, 8], sizes = [16, 8], strides = [1, 1]} : vector<16x32xf32> to vector<16x8xf32>
    %293 = arith.truncf %292 : vector<16x8xf32> to vector<16x8xbf16>
    %294 = vector.extract_strided_slice %289 {offsets = [0, 0], sizes = [8, 8], strides = [1, 1]} : vector<16x8xbf16> to vector<8x8xbf16>
    %295 = vector.extract_strided_slice %291 {offsets = [0, 0], sizes = [8, 8], strides = [1, 1]} : vector<16x8xbf16> to vector<8x8xbf16>
    %cst_94 = arith.constant dense<0.000000e+00> : vector<8x8xf32>
    %296 = tpu.matmul %294, %295, %cst_94 {dimension_numbers = #tpu.dot_dimension_numbers<[1], [1], [0], [0], [0, 0, 1, 0], [], []>} : vector<8x8xbf16>, vector<8x8xbf16>, vector<8x8xf32> -> vector<8x8xf32>
    %cst_95 = arith.constant dense<0xFF800000> : vector<8xf32>
    %297 = vector.multi_reduction <maximumf>, %296, %cst_95 [1] : vector<8x8xf32> to vector<8xf32>
    %298 = vector.shape_cast %297 : vector<8xf32> to vector<8x1xf32>
    %299 = vector.broadcast %298 : vector<8x1xf32> to vector<8x8xf32>
    %300 = arith.subf %296, %299 : vector<8x8xf32>
    %301 = math.exp %300 : vector<8x8xf32>
    %cst_96 = arith.constant dense<0.000000e+00> : vector<8xf32>
    %302 = vector.multi_reduction <add>, %301, %cst_96 [1] : vector<8x8xf32> to vector<8xf32>
    %303 = vector.shape_cast %302 : vector<8xf32> to vector<8x1xf32>
    %304 = tpu.reciprocal %303 {approx = true} : vector<8x1xf32> -> vector<8x1xf32>
    %305 = vector.broadcast %304 : vector<8x1xf32> to vector<8x8xf32>
    %306 = arith.mulf %301, %305 : vector<8x8xf32>
    %307 = arith.truncf %306 : vector<8x8xf32> to vector<8x8xbf16>
    %308 = vector.extract_strided_slice %293 {offsets = [0, 0], sizes = [8, 8], strides = [1, 1]} : vector<16x8xbf16> to vector<8x8xbf16>
    %cst_97 = arith.constant dense<0.000000e+00> : vector<8x8xf32>
    %309 = tpu.matmul %307, %308, %cst_97 {dimension_numbers = #tpu.dot_dimension_numbers<[1], [0], [0], [1], [0, 0, 1, 1], [], []>} : vector<8x8xbf16>, vector<8x8xbf16>, vector<8x8xf32> -> vector<8x8xf32>
    %310 = vector.extract_strided_slice %289 {offsets = [8, 0], sizes = [8, 8], strides = [1, 1]} : vector<16x8xbf16> to vector<8x8xbf16>
    %311 = vector.extract_strided_slice %291 {offsets = [8, 0], sizes = [8, 8], strides = [1, 1]} : vector<16x8xbf16> to vector<8x8xbf16>
    %cst_98 = arith.constant dense<0.000000e+00> : vector<8x8xf32>
    %312 = tpu.matmul %310, %311, %cst_98 {dimension_numbers = #tpu.dot_dimension_numbers<[1], [1], [0], [0], [0, 0, 1, 0], [], []>} : vector<8x8xbf16>, vector<8x8xbf16>, vector<8x8xf32> -> vector<8x8xf32>
    %cst_99 = arith.constant dense<0xFF800000> : vector<8xf32>
    %313 = vector.multi_reduction <maximumf>, %312, %cst_99 [1] : vector<8x8xf32> to vector<8xf32>
    %314 = vector.shape_cast %313 : vector<8xf32> to vector<8x1xf32>
    %315 = vector.broadcast %314 : vector<8x1xf32> to vector<8x8xf32>
    %316 = arith.subf %312, %315 : vector<8x8xf32>
    %317 = math.exp %316 : vector<8x8xf32>
    %cst_100 = arith.constant dense<0.000000e+00> : vector<8xf32>
    %318 = vector.multi_reduction <add>, %317, %cst_100 [1] : vector<8x8xf32> to vector<8xf32>
    %319 = vector.shape_cast %318 : vector<8xf32> to vector<8x1xf32>
    %320 = tpu.reciprocal %319 {approx = true} : vector<8x1xf32> -> vector<8x1xf32>
    %321 = vector.broadcast %320 : vector<8x1xf32> to vector<8x8xf32>
    %322 = arith.mulf %317, %321 : vector<8x8xf32>
    %323 = arith.truncf %322 : vector<8x8xf32> to vector<8x8xbf16>
    %324 = vector.extract_strided_slice %293 {offsets = [8, 0], sizes = [8, 8], strides = [1, 1]} : vector<16x8xbf16> to vector<8x8xbf16>
    %cst_101 = arith.constant dense<0.000000e+00> : vector<8x8xf32>
    %325 = tpu.matmul %323, %324, %cst_101 {dimension_numbers = #tpu.dot_dimension_numbers<[1], [0], [0], [1], [0, 0, 1, 1], [], []>} : vector<8x8xbf16>, vector<8x8xbf16>, vector<8x8xf32> -> vector<8x8xf32>
    %326 = tpu.concatenate %309, %325 in 0 : vector<8x8xf32>, vector<8x8xf32> -> vector<16x8xf32>
    %327 = arith.truncf %326 : vector<16x8xf32> to vector<16x8xbf16>
    %328 = vector.extract_strided_slice %241 {offsets = [8, 0], sizes = [8, 32], strides = [1, 1]} : vector<32x32xbf16> to vector<8x32xbf16>
    %cst_102 = arith.constant dense<0.000000e+00> : vector<16x32xf32>
    %329 = tpu.matmul %327, %328, %cst_102 {dimension_numbers = #tpu.dot_dimension_numbers<[1], [0], [0], [1], [0, 0, 1, 1], [], []>} : vector<16x8xbf16>, vector<8x32xbf16>, vector<16x32xf32> -> vector<16x32xf32>
    %330 = arith.addf %287, %329 : vector<16x32xf32>
    %331 = vector.extract_strided_slice %229 {offsets = [0, 16], sizes = [16, 8], strides = [1, 1]} : vector<16x32xf32> to vector<16x8xf32>
    %332 = arith.truncf %331 : vector<16x8xf32> to vector<16x8xbf16>
    %333 = vector.extract_strided_slice %238 {offsets = [0, 16], sizes = [16, 8], strides = [1, 1]} : vector<16x32xf32> to vector<16x8xf32>
    %334 = arith.truncf %333 : vector<16x8xf32> to vector<16x8xbf16>
    %335 = vector.extract_strided_slice %239 {offsets = [0, 16], sizes = [16, 8], strides = [1, 1]} : vector<16x32xf32> to vector<16x8xf32>
    %336 = arith.truncf %335 : vector<16x8xf32> to vector<16x8xbf16>
    %337 = vector.extract_strided_slice %332 {offsets = [0, 0], sizes = [8, 8], strides = [1, 1]} : vector<16x8xbf16> to vector<8x8xbf16>
    %338 = vector.extract_strided_slice %334 {offsets = [0, 0], sizes = [8, 8], strides = [1, 1]} : vector<16x8xbf16> to vector<8x8xbf16>
    %cst_103 = arith.constant dense<0.000000e+00> : vector<8x8xf32>
    %339 = tpu.matmul %337, %338, %cst_103 {dimension_numbers = #tpu.dot_dimension_numbers<[1], [1], [0], [0], [0, 0, 1, 0], [], []>} : vector<8x8xbf16>, vector<8x8xbf16>, vector<8x8xf32> -> vector<8x8xf32>
    %cst_104 = arith.constant dense<0xFF800000> : vector<8xf32>
    %340 = vector.multi_reduction <maximumf>, %339, %cst_104 [1] : vector<8x8xf32> to vector<8xf32>
    %341 = vector.shape_cast %340 : vector<8xf32> to vector<8x1xf32>
    %342 = vector.broadcast %341 : vector<8x1xf32> to vector<8x8xf32>
    %343 = arith.subf %339, %342 : vector<8x8xf32>
    %344 = math.exp %343 : vector<8x8xf32>
    %cst_105 = arith.constant dense<0.000000e+00> : vector<8xf32>
    %345 = vector.multi_reduction <add>, %344, %cst_105 [1] : vector<8x8xf32> to vector<8xf32>
    %346 = vector.shape_cast %345 : vector<8xf32> to vector<8x1xf32>
    %347 = tpu.reciprocal %346 {approx = true} : vector<8x1xf32> -> vector<8x1xf32>
    %348 = vector.broadcast %347 : vector<8x1xf32> to vector<8x8xf32>
    %349 = arith.mulf %344, %348 : vector<8x8xf32>
    %350 = arith.truncf %349 : vector<8x8xf32> to vector<8x8xbf16>
    %351 = vector.extract_strided_slice %336 {offsets = [0, 0], sizes = [8, 8], strides = [1, 1]} : vector<16x8xbf16> to vector<8x8xbf16>
    %cst_106 = arith.constant dense<0.000000e+00> : vector<8x8xf32>
    %352 = tpu.matmul %350, %351, %cst_106 {dimension_numbers = #tpu.dot_dimension_numbers<[1], [0], [0], [1], [0, 0, 1, 1], [], []>} : vector<8x8xbf16>, vector<8x8xbf16>, vector<8x8xf32> -> vector<8x8xf32>
    %353 = vector.extract_strided_slice %332 {offsets = [8, 0], sizes = [8, 8], strides = [1, 1]} : vector<16x8xbf16> to vector<8x8xbf16>
    %354 = vector.extract_strided_slice %334 {offsets = [8, 0], sizes = [8, 8], strides = [1, 1]} : vector<16x8xbf16> to vector<8x8xbf16>
    %cst_107 = arith.constant dense<0.000000e+00> : vector<8x8xf32>
    %355 = tpu.matmul %353, %354, %cst_107 {dimension_numbers = #tpu.dot_dimension_numbers<[1], [1], [0], [0], [0, 0, 1, 0], [], []>} : vector<8x8xbf16>, vector<8x8xbf16>, vector<8x8xf32> -> vector<8x8xf32>
    %cst_108 = arith.constant dense<0xFF800000> : vector<8xf32>
    %356 = vector.multi_reduction <maximumf>, %355, %cst_108 [1] : vector<8x8xf32> to vector<8xf32>
    %357 = vector.shape_cast %356 : vector<8xf32> to vector<8x1xf32>
    %358 = vector.broadcast %357 : vector<8x1xf32> to vector<8x8xf32>
    %359 = arith.subf %355, %358 : vector<8x8xf32>
    %360 = math.exp %359 : vector<8x8xf32>
    %cst_109 = arith.constant dense<0.000000e+00> : vector<8xf32>
    %361 = vector.multi_reduction <add>, %360, %cst_109 [1] : vector<8x8xf32> to vector<8xf32>
    %362 = vector.shape_cast %361 : vector<8xf32> to vector<8x1xf32>
    %363 = tpu.reciprocal %362 {approx = true} : vector<8x1xf32> -> vector<8x1xf32>
    %364 = vector.broadcast %363 : vector<8x1xf32> to vector<8x8xf32>
    %365 = arith.mulf %360, %364 : vector<8x8xf32>
    %366 = arith.truncf %365 : vector<8x8xf32> to vector<8x8xbf16>
    %367 = vector.extract_strided_slice %336 {offsets = [8, 0], sizes = [8, 8], strides = [1, 1]} : vector<16x8xbf16> to vector<8x8xbf16>
    %cst_110 = arith.constant dense<0.000000e+00> : vector<8x8xf32>
    %368 = tpu.matmul %366, %367, %cst_110 {dimension_numbers = #tpu.dot_dimension_numbers<[1], [0], [0], [1], [0, 0, 1, 1], [], []>} : vector<8x8xbf16>, vector<8x8xbf16>, vector<8x8xf32> -> vector<8x8xf32>
    %369 = tpu.concatenate %352, %368 in 0 : vector<8x8xf32>, vector<8x8xf32> -> vector<16x8xf32>
    %370 = arith.truncf %369 : vector<16x8xf32> to vector<16x8xbf16>
    %371 = vector.extract_strided_slice %241 {offsets = [16, 0], sizes = [8, 32], strides = [1, 1]} : vector<32x32xbf16> to vector<8x32xbf16>
    %cst_111 = arith.constant dense<0.000000e+00> : vector<16x32xf32>
    %372 = tpu.matmul %370, %371, %cst_111 {dimension_numbers = #tpu.dot_dimension_numbers<[1], [0], [0], [1], [0, 0, 1, 1], [], []>} : vector<16x8xbf16>, vector<8x32xbf16>, vector<16x32xf32> -> vector<16x32xf32>
    %373 = arith.addf %330, %372 : vector<16x32xf32>
    %374 = vector.extract_strided_slice %229 {offsets = [0, 24], sizes = [16, 8], strides = [1, 1]} : vector<16x32xf32> to vector<16x8xf32>
    %375 = arith.truncf %374 : vector<16x8xf32> to vector<16x8xbf16>
    %376 = vector.extract_strided_slice %238 {offsets = [0, 24], sizes = [16, 8], strides = [1, 1]} : vector<16x32xf32> to vector<16x8xf32>
    %377 = arith.truncf %376 : vector<16x8xf32> to vector<16x8xbf16>
    %378 = vector.extract_strided_slice %239 {offsets = [0, 24], sizes = [16, 8], strides = [1, 1]} : vector<16x32xf32> to vector<16x8xf32>
    %379 = arith.truncf %378 : vector<16x8xf32> to vector<16x8xbf16>
    %380 = vector.extract_strided_slice %375 {offsets = [0, 0], sizes = [8, 8], strides = [1, 1]} : vector<16x8xbf16> to vector<8x8xbf16>
    %381 = vector.extract_strided_slice %377 {offsets = [0, 0], sizes = [8, 8], strides = [1, 1]} : vector<16x8xbf16> to vector<8x8xbf16>
    %cst_112 = arith.constant dense<0.000000e+00> : vector<8x8xf32>
    %382 = tpu.matmul %380, %381, %cst_112 {dimension_numbers = #tpu.dot_dimension_numbers<[1], [1], [0], [0], [0, 0, 1, 0], [], []>} : vector<8x8xbf16>, vector<8x8xbf16>, vector<8x8xf32> -> vector<8x8xf32>
    %cst_113 = arith.constant dense<0xFF800000> : vector<8xf32>
    %383 = vector.multi_reduction <maximumf>, %382, %cst_113 [1] : vector<8x8xf32> to vector<8xf32>
    %384 = vector.shape_cast %383 : vector<8xf32> to vector<8x1xf32>
    %385 = vector.broadcast %384 : vector<8x1xf32> to vector<8x8xf32>
    %386 = arith.subf %382, %385 : vector<8x8xf32>
    %387 = math.exp %386 : vector<8x8xf32>
    %cst_114 = arith.constant dense<0.000000e+00> : vector<8xf32>
    %388 = vector.multi_reduction <add>, %387, %cst_114 [1] : vector<8x8xf32> to vector<8xf32>
    %389 = vector.shape_cast %388 : vector<8xf32> to vector<8x1xf32>
    %390 = tpu.reciprocal %389 {approx = true} : vector<8x1xf32> -> vector<8x1xf32>
    %391 = vector.broadcast %390 : vector<8x1xf32> to vector<8x8xf32>
    %392 = arith.mulf %387, %391 : vector<8x8xf32>
    %393 = arith.truncf %392 : vector<8x8xf32> to vector<8x8xbf16>
    %394 = vector.extract_strided_slice %379 {offsets = [0, 0], sizes = [8, 8], strides = [1, 1]} : vector<16x8xbf16> to vector<8x8xbf16>
    %cst_115 = arith.constant dense<0.000000e+00> : vector<8x8xf32>
    %395 = tpu.matmul %393, %394, %cst_115 {dimension_numbers = #tpu.dot_dimension_numbers<[1], [0], [0], [1], [0, 0, 1, 1], [], []>} : vector<8x8xbf16>, vector<8x8xbf16>, vector<8x8xf32> -> vector<8x8xf32>
    %396 = vector.extract_strided_slice %375 {offsets = [8, 0], sizes = [8, 8], strides = [1, 1]} : vector<16x8xbf16> to vector<8x8xbf16>
    %397 = vector.extract_strided_slice %377 {offsets = [8, 0], sizes = [8, 8], strides = [1, 1]} : vector<16x8xbf16> to vector<8x8xbf16>
    %cst_116 = arith.constant dense<0.000000e+00> : vector<8x8xf32>
    %398 = tpu.matmul %396, %397, %cst_116 {dimension_numbers = #tpu.dot_dimension_numbers<[1], [1], [0], [0], [0, 0, 1, 0], [], []>} : vector<8x8xbf16>, vector<8x8xbf16>, vector<8x8xf32> -> vector<8x8xf32>
    %cst_117 = arith.constant dense<0xFF800000> : vector<8xf32>
    %399 = vector.multi_reduction <maximumf>, %398, %cst_117 [1] : vector<8x8xf32> to vector<8xf32>
    %400 = vector.shape_cast %399 : vector<8xf32> to vector<8x1xf32>
    %401 = vector.broadcast %400 : vector<8x1xf32> to vector<8x8xf32>
    %402 = arith.subf %398, %401 : vector<8x8xf32>
    %403 = math.exp %402 : vector<8x8xf32>
    %cst_118 = arith.constant dense<0.000000e+00> : vector<8xf32>
    %404 = vector.multi_reduction <add>, %403, %cst_118 [1] : vector<8x8xf32> to vector<8xf32>
    %405 = vector.shape_cast %404 : vector<8xf32> to vector<8x1xf32>
    %406 = tpu.reciprocal %405 {approx = true} : vector<8x1xf32> -> vector<8x1xf32>
    %407 = vector.broadcast %406 : vector<8x1xf32> to vector<8x8xf32>
    %408 = arith.mulf %403, %407 : vector<8x8xf32>
    %409 = arith.truncf %408 : vector<8x8xf32> to vector<8x8xbf16>
    %410 = vector.extract_strided_slice %379 {offsets = [8, 0], sizes = [8, 8], strides = [1, 1]} : vector<16x8xbf16> to vector<8x8xbf16>
    %cst_119 = arith.constant dense<0.000000e+00> : vector<8x8xf32>
    %411 = tpu.matmul %409, %410, %cst_119 {dimension_numbers = #tpu.dot_dimension_numbers<[1], [0], [0], [1], [0, 0, 1, 1], [], []>} : vector<8x8xbf16>, vector<8x8xbf16>, vector<8x8xf32> -> vector<8x8xf32>
    %412 = tpu.concatenate %395, %411 in 0 : vector<8x8xf32>, vector<8x8xf32> -> vector<16x8xf32>
    %413 = arith.truncf %412 : vector<16x8xf32> to vector<16x8xbf16>
    %414 = vector.extract_strided_slice %241 {offsets = [24, 0], sizes = [8, 32], strides = [1, 1]} : vector<32x32xbf16> to vector<8x32xbf16>
    %cst_120 = arith.constant dense<0.000000e+00> : vector<16x32xf32>
    %415 = tpu.matmul %413, %414, %cst_120 {dimension_numbers = #tpu.dot_dimension_numbers<[1], [0], [0], [1], [0, 0, 1, 1], [], []>} : vector<16x8xbf16>, vector<8x32xbf16>, vector<16x32xf32> -> vector<16x32xf32>
    %416 = arith.addf %373, %415 : vector<16x32xf32>
    %417 = vector.broadcast %243 : vector<1x32xf32> to vector<16x32xf32>
    %418 = arith.addf %416, %417 : vector<16x32xf32>
    %419 = arith.addf %221, %418 : vector<16x32xf32>
    %c0_121 = arith.constant 0 : index
    %c0_122 = arith.constant 0 : index
    %c0_123 = arith.constant 0 : index
    %420 = vector.load %arg15[%c0_121, %c0_122, %c0_123] : memref<1x1x32xf32, #tpu.memory_space<vmem>>, vector<1x1x32xf32>
    %421 = vector.shape_cast %420 : vector<1x1x32xf32> to vector<1x32xf32>
    %c0_124 = arith.constant 0 : index
    %c0_125 = arith.constant 0 : index
    %c0_126 = arith.constant 0 : index
    %422 = vector.load %arg16[%c0_124, %c0_125, %c0_126] : memref<1x1x32xf32, #tpu.memory_space<vmem>>, vector<1x1x32xf32>
    %423 = vector.shape_cast %422 : vector<1x1x32xf32> to vector<1x32xf32>
    %cst_127 = arith.constant dense<0.000000e+00> : vector<16xf32>
    %424 = vector.multi_reduction <add>, %419, %cst_127 [1] : vector<16x32xf32> to vector<16xf32>
    %425 = vector.shape_cast %424 : vector<16xf32> to vector<16x1xf32>
    %cst_128 = arith.constant 3.200000e+01 : f32
    %426 = vector.broadcast %cst_128 : f32 to vector<16x1xf32>
    %427 = arith.divf %425, %426 : vector<16x1xf32>
    %428 = vector.broadcast %427 : vector<16x1xf32> to vector<16x32xf32>
    %429 = arith.subf %419, %428 : vector<16x32xf32>
    %430 = arith.mulf %429, %429 : vector<16x32xf32>
    %cst_129 = arith.constant dense<0.000000e+00> : vector<16xf32>
    %431 = vector.multi_reduction <add>, %430, %cst_129 [1] : vector<16x32xf32> to vector<16xf32>
    %432 = vector.shape_cast %431 : vector<16xf32> to vector<16x1xf32>
    %cst_130 = arith.constant 3.200000e+01 : f32
    %433 = vector.broadcast %cst_130 : f32 to vector<16x1xf32>
    %434 = arith.divf %432, %433 : vector<16x1xf32>
    %435 = vector.broadcast %427 : vector<16x1xf32> to vector<16x32xf32>
    %436 = arith.subf %419, %435 : vector<16x32xf32>
    %cst_131 = arith.constant 9.99999974E-6 : f32
    %437 = vector.broadcast %cst_131 : f32 to vector<16x1xf32>
    %438 = arith.addf %434, %437 : vector<16x1xf32>
    %439 = math.rsqrt %438 : vector<16x1xf32>
    %440 = vector.broadcast %439 : vector<16x1xf32> to vector<16x32xf32>
    %441 = arith.mulf %436, %440 : vector<16x32xf32>
    %442 = vector.broadcast %421 : vector<1x32xf32> to vector<16x32xf32>
    %443 = arith.mulf %441, %442 : vector<16x32xf32>
    %444 = vector.broadcast %423 : vector<1x32xf32> to vector<16x32xf32>
    %445 = arith.addf %443, %444 : vector<16x32xf32>
    %c0_132 = arith.constant 0 : index
    %c0_133 = arith.constant 0 : index
    %c0_134 = arith.constant 0 : index
    %446 = vector.load %arg17[%c0_132, %c0_133, %c0_134] : memref<1x32x64xbf16, #tpu.memory_space<vmem>>, vector<1x32x64xbf16>
    %447 = vector.shape_cast %446 : vector<1x32x64xbf16> to vector<32x64xbf16>
    %c0_135 = arith.constant 0 : index
    %c0_136 = arith.constant 0 : index
    %c0_137 = arith.constant 0 : index
    %448 = vector.load %arg18[%c0_135, %c0_136, %c0_137] : memref<1x1x64xf32, #tpu.memory_space<vmem>>, vector<1x1x64xf32>
    %449 = vector.shape_cast %448 : vector<1x1x64xf32> to vector<1x64xf32>
    %450 = arith.truncf %445 : vector<16x32xf32> to vector<16x32xbf16>
    %cst_138 = arith.constant dense<0.000000e+00> : vector<16x64xf32>
    %451 = tpu.matmul %450, %447, %cst_138 {dimension_numbers = #tpu.dot_dimension_numbers<[1], [0], [0], [1], [0, 0, 1, 1], [], []>} : vector<16x32xbf16>, vector<32x64xbf16>, vector<16x64xf32> -> vector<16x64xf32>
    %452 = vector.broadcast %449 : vector<1x64xf32> to vector<16x64xf32>
    %453 = arith.addf %451, %452 : vector<16x64xf32>
    %cst_139 = arith.constant 0.000000e+00 : f32
    %454 = vector.broadcast %cst_139 : f32 to vector<16x64xf32>
    %455 = arith.maximumf %453, %454 : vector<16x64xf32>
    %c0_140 = arith.constant 0 : index
    %c0_141 = arith.constant 0 : index
    %c0_142 = arith.constant 0 : index
    %456 = vector.load %arg19[%c0_140, %c0_141, %c0_142] : memref<1x64x32xbf16, #tpu.memory_space<vmem>>, vector<1x64x32xbf16>
    %457 = vector.shape_cast %456 : vector<1x64x32xbf16> to vector<64x32xbf16>
    %c0_143 = arith.constant 0 : index
    %c0_144 = arith.constant 0 : index
    %c0_145 = arith.constant 0 : index
    %458 = vector.load %arg20[%c0_143, %c0_144, %c0_145] : memref<1x1x32xf32, #tpu.memory_space<vmem>>, vector<1x1x32xf32>
    %459 = vector.shape_cast %458 : vector<1x1x32xf32> to vector<1x32xf32>
    %460 = arith.truncf %455 : vector<16x64xf32> to vector<16x64xbf16>
    %cst_146 = arith.constant dense<0.000000e+00> : vector<16x32xf32>
    %461 = tpu.matmul %460, %457, %cst_146 {dimension_numbers = #tpu.dot_dimension_numbers<[1], [0], [0], [1], [0, 0, 1, 1], [], []>} : vector<16x64xbf16>, vector<64x32xbf16>, vector<16x32xf32> -> vector<16x32xf32>
    %462 = vector.broadcast %459 : vector<1x32xf32> to vector<16x32xf32>
    %463 = arith.addf %461, %462 : vector<16x32xf32>
    %464 = arith.addf %445, %463 : vector<16x32xf32>
    %c0_147 = arith.constant 0 : index
    %c0_148 = arith.constant 0 : index
    %c0_149 = arith.constant 0 : index
    %465 = vector.load %arg21[%c0_147, %c0_148, %c0_149] : memref<1x1x32xf32, #tpu.memory_space<vmem>>, vector<1x1x32xf32>
    %466 = vector.shape_cast %465 : vector<1x1x32xf32> to vector<1x32xf32>
    %c0_150 = arith.constant 0 : index
    %c0_151 = arith.constant 0 : index
    %c0_152 = arith.constant 0 : index
    %467 = vector.load %arg22[%c0_150, %c0_151, %c0_152] : memref<1x1x32xf32, #tpu.memory_space<vmem>>, vector<1x1x32xf32>
    %468 = vector.shape_cast %467 : vector<1x1x32xf32> to vector<1x32xf32>
    %cst_153 = arith.constant dense<0.000000e+00> : vector<16xf32>
    %469 = vector.multi_reduction <add>, %464, %cst_153 [1] : vector<16x32xf32> to vector<16xf32>
    %470 = vector.shape_cast %469 : vector<16xf32> to vector<16x1xf32>
    %cst_154 = arith.constant 3.200000e+01 : f32
    %471 = vector.broadcast %cst_154 : f32 to vector<16x1xf32>
    %472 = arith.divf %470, %471 : vector<16x1xf32>
    %473 = vector.broadcast %472 : vector<16x1xf32> to vector<16x32xf32>
    %474 = arith.subf %464, %473 : vector<16x32xf32>
    %475 = arith.mulf %474, %474 : vector<16x32xf32>
    %cst_155 = arith.constant dense<0.000000e+00> : vector<16xf32>
    %476 = vector.multi_reduction <add>, %475, %cst_155 [1] : vector<16x32xf32> to vector<16xf32>
    %477 = vector.shape_cast %476 : vector<16xf32> to vector<16x1xf32>
    %cst_156 = arith.constant 3.200000e+01 : f32
    %478 = vector.broadcast %cst_156 : f32 to vector<16x1xf32>
    %479 = arith.divf %477, %478 : vector<16x1xf32>
    %480 = vector.broadcast %472 : vector<16x1xf32> to vector<16x32xf32>
    %481 = arith.subf %464, %480 : vector<16x32xf32>
    %cst_157 = arith.constant 9.99999974E-6 : f32
    %482 = vector.broadcast %cst_157 : f32 to vector<16x1xf32>
    %483 = arith.addf %479, %482 : vector<16x1xf32>
    %484 = math.rsqrt %483 : vector<16x1xf32>
    %485 = vector.broadcast %484 : vector<16x1xf32> to vector<16x32xf32>
    %486 = arith.mulf %481, %485 : vector<16x32xf32>
    %487 = vector.broadcast %466 : vector<1x32xf32> to vector<16x32xf32>
    %488 = arith.mulf %486, %487 : vector<16x32xf32>
    %489 = vector.broadcast %468 : vector<1x32xf32> to vector<16x32xf32>
    %490 = arith.addf %488, %489 : vector<16x32xf32>
    %c0_158 = arith.constant 0 : index
    %c0_159 = arith.constant 0 : index
    %491 = vector.load %arg26[%c0_158, %c0_159] : memref<16x32xf32, #tpu.memory_space<vmem>>, vector<16x32xf32>
    tpu.vector_store %arg26[%c0_158, %c0_159], %490 {strides = array<i32>} : memref<16x32xf32, #tpu.memory_space<vmem>>, vector<16x32xf32>,
    %c1_i32 = arith.constant 1 : i32
    %492 = arith.cmpi eq, %arg1, %c1_i32 : i32
    %493 = arith.extui %492 : i1 to i32
    %c0_i32_160 = arith.constant 0 : i32
    %494 = arith.cmpi ne, %493, %c0_i32_160 : i32
    scf.if %494 {
      %495 = arith.truncf %490 : vector<16x32xf32> to vector<16x32xbf16>
      %c0_161 = arith.constant 0 : index
      %c0_162 = arith.constant 0 : index
      %496 = vector.load %arg23[%c0_161, %c0_162] : memref<32x128xbf16, #tpu.memory_space<vmem>>, vector<32x128xbf16>
      %cst_163 = arith.constant dense<0.000000e+00> : vector<16x128xf32>
      %497 = tpu.matmul %495, %496, %cst_163 {dimension_numbers = #tpu.dot_dimension_numbers<[1], [0], [0], [1], [0, 0, 1, 1], [], []>} : vector<16x32xbf16>, vector<32x128xbf16>, vector<16x128xf32> -> vector<16x128xf32>
      %c0_164 = arith.constant 0 : index
      %c0_165 = arith.constant 0 : index
      %498 = vector.load %arg24[%c0_164, %c0_165] : memref<1x128xf32, #tpu.memory_space<vmem>>, vector<1x128xf32>
      %499 = vector.broadcast %498 : vector<1x128xf32> to vector<16x128xf32>
      %500 = arith.addf %497, %499 : vector<16x128xf32>
      %c0_166 = arith.constant 0 : index
      %c0_167 = arith.constant 0 : index
      %501 = vector.load %arg25[%c0_166, %c0_167] : memref<16x128xf32, #tpu.memory_space<vmem>>, vector<16x128xf32>
      tpu.vector_store %arg25[%c0_166, %c0_167], %500 {strides = array<i32>} : memref<16x128xf32, #tpu.memory_space<vmem>>, vector<16x128xf32>,
    } else {
    }
    return
  }
  func.func @transform_0(%arg0: i32, %arg1: i32) -> (i32, i32) {
    %c0_i32 = arith.constant 0 : i32
    %c0_i32_0 = arith.constant 0 : i32
    return %arg0, %c0_i32 : i32, i32
  }
  func.func @transform_1(%arg0: i32, %arg1: i32) -> (i32, i32, i32) {
    %c0_i32 = arith.constant 0 : i32
    %c0_i32_0 = arith.constant 0 : i32
    %c0_i32_1 = arith.constant 0 : i32
    return %arg1, %c0_i32, %c0_i32_0 : i32, i32, i32
  }
  func.func @transform_2(%arg0: i32, %arg1: i32) -> (i32, i32, i32) {
    %c0_i32 = arith.constant 0 : i32
    %c0_i32_0 = arith.constant 0 : i32
    %c0_i32_1 = arith.constant 0 : i32
    return %arg1, %c0_i32, %c0_i32_0 : i32, i32, i32
  }
  func.func @transform_3(%arg0: i32, %arg1: i32) -> (i32, i32, i32) {
    %c0_i32 = arith.constant 0 : i32
    %c0_i32_0 = arith.constant 0 : i32
    %c0_i32_1 = arith.constant 0 : i32
    return %arg1, %c0_i32, %c0_i32_0 : i32, i32, i32
  }
  func.func @transform_4(%arg0: i32, %arg1: i32) -> (i32, i32, i32) {
    %c0_i32 = arith.constant 0 : i32
    %c0_i32_0 = arith.constant 0 : i32
    %c0_i32_1 = arith.constant 0 : i32
    return %arg1, %c0_i32, %c0_i32_0 : i32, i32, i32
  }
  func.func @transform_5(%arg0: i32, %arg1: i32) -> (i32, i32, i32) {
    %c0_i32 = arith.constant 0 : i32
    %c0_i32_0 = arith.constant 0 : i32
    %c0_i32_1 = arith.constant 0 : i32
    return %arg1, %c0_i32, %c0_i32_0 : i32, i32, i32
  }
  func.func @transform_6(%arg0: i32, %arg1: i32) -> (i32, i32, i32) {
    %c0_i32 = arith.constant 0 : i32
    %c0_i32_0 = arith.constant 0 : i32
    %c0_i32_1 = arith.constant 0 : i32
    return %arg1, %c0_i32, %c0_i32_0 : i32, i32, i32
  }
  func.func @transform_7(%arg0: i32, %arg1: i32) -> (i32, i32, i32) {
    %c0_i32 = arith.constant 0 : i32
    %c0_i32_0 = arith.constant 0 : i32
    %c0_i32_1 = arith.constant 0 : i32
    return %arg1, %c0_i32, %c0_i32_0 : i32, i32, i32
  }
  func.func @transform_8(%arg0: i32, %arg1: i32) -> (i32, i32, i32) {
    %c0_i32 = arith.constant 0 : i32
    %c0_i32_0 = arith.constant 0 : i32
    %c0_i32_1 = arith.constant 0 : i32
    return %arg1, %c0_i32, %c0_i32_0 : i32, i32, i32
  }
  func.func @transform_9(%arg0: i32, %arg1: i32) -> (i32, i32, i32) {
    %c0_i32 = arith.constant 0 : i32
    %c0_i32_0 = arith.constant 0 : i32
    %c0_i32_1 = arith.constant 0 : i32
    return %arg1, %c0_i32, %c0_i32_0 : i32, i32, i32
  }
  func.func @transform_10(%arg0: i32, %arg1: i32) -> (i32, i32, i32) {
    %c0_i32 = arith.constant 0 : i32
    %c0_i32_0 = arith.constant 0 : i32
    %c0_i32_1 = arith.constant 0 : i32
    return %arg1, %c0_i32, %c0_i32_0 : i32, i32, i32
  }
  func.func @transform_11(%arg0: i32, %arg1: i32) -> (i32, i32, i32) {
    %c0_i32 = arith.constant 0 : i32
    %c0_i32_0 = arith.constant 0 : i32
    %c0_i32_1 = arith.constant 0 : i32
    return %arg1, %c0_i32, %c0_i32_0 : i32, i32, i32
  }
  func.func @transform_12(%arg0: i32, %arg1: i32) -> (i32, i32, i32) {
    %c0_i32 = arith.constant 0 : i32
    %c0_i32_0 = arith.constant 0 : i32
    %c0_i32_1 = arith.constant 0 : i32
    return %arg1, %c0_i32, %c0_i32_0 : i32, i32, i32
  }
  func.func @transform_13(%arg0: i32, %arg1: i32) -> (i32, i32, i32) {
    %c0_i32 = arith.constant 0 : i32
    %c0_i32_0 = arith.constant 0 : i32
    %c0_i32_1 = arith.constant 0 : i32
    return %arg1, %c0_i32, %c0_i32_0 : i32, i32, i32
  }
  func.func @transform_14(%arg0: i32, %arg1: i32) -> (i32, i32, i32) {
    %c0_i32 = arith.constant 0 : i32
    %c0_i32_0 = arith.constant 0 : i32
    %c0_i32_1 = arith.constant 0 : i32
    return %arg1, %c0_i32, %c0_i32_0 : i32, i32, i32
  }
  func.func @transform_15(%arg0: i32, %arg1: i32) -> (i32, i32, i32) {
    %c0_i32 = arith.constant 0 : i32
    %c0_i32_0 = arith.constant 0 : i32
    %c0_i32_1 = arith.constant 0 : i32
    return %arg1, %c0_i32, %c0_i32_0 : i32, i32, i32
  }
  func.func @transform_16(%arg0: i32, %arg1: i32) -> (i32, i32, i32) {
    %c0_i32 = arith.constant 0 : i32
    %c0_i32_0 = arith.constant 0 : i32
    %c0_i32_1 = arith.constant 0 : i32
    return %arg1, %c0_i32, %c0_i32_0 : i32, i32, i32
  }
  func.func @transform_17(%arg0: i32, %arg1: i32) -> (i32, i32, i32) {
    %c0_i32 = arith.constant 0 : i32
    %c0_i32_0 = arith.constant 0 : i32
    %c0_i32_1 = arith.constant 0 : i32
    return %arg1, %c0_i32, %c0_i32_0 : i32, i32, i32
  }
  func.func @transform_18(%arg0: i32, %arg1: i32) -> (i32, i32, i32) {
    %c0_i32 = arith.constant 0 : i32
    %c0_i32_0 = arith.constant 0 : i32
    %c0_i32_1 = arith.constant 0 : i32
    return %arg1, %c0_i32, %c0_i32_0 : i32, i32, i32
  }
  func.func @transform_19(%arg0: i32, %arg1: i32) -> (i32, i32, i32) {
    %c0_i32 = arith.constant 0 : i32
    %c0_i32_0 = arith.constant 0 : i32
    %c0_i32_1 = arith.constant 0 : i32
    return %arg1, %c0_i32, %c0_i32_0 : i32, i32, i32
  }
  func.func @transform_20(%arg0: i32, %arg1: i32) -> (i32, i32, i32) {
    %c0_i32 = arith.constant 0 : i32
    %c0_i32_0 = arith.constant 0 : i32
    %c0_i32_1 = arith.constant 0 : i32
    return %arg1, %c0_i32, %c0_i32_0 : i32, i32, i32
  }
  func.func @transform_21(%arg0: i32, %arg1: i32) -> (i32, i32) {
    %c0_i32 = arith.constant 0 : i32
    %c0_i32_0 = arith.constant 0 : i32
    %c0_i32_1 = arith.constant 0 : i32
    return %c0_i32, %c0_i32_0 : i32, i32
  }
  func.func @transform_22(%arg0: i32, %arg1: i32) -> (i32, i32) {
    %c0_i32 = arith.constant 0 : i32
    %c0_i32_0 = arith.constant 0 : i32
    %c0_i32_1 = arith.constant 0 : i32
    return %c0_i32, %c0_i32_0 : i32, i32
  }
  func.func @transform_23(%arg0: i32, %arg1: i32) -> (i32, i32) {
    %c0_i32 = arith.constant 0 : i32
    %c0_i32_0 = arith.constant 0 : i32
    return %arg0, %c0_i32 : i32, i32
  }
}

</mosaic_0001>

<bundles_post_ra>
// kernel: transformer_decoder_forward.1
= control target key start
LH: loop header
LB: loop body
LE: loop exit
PB: predicated region body
PF: predicated region fallthrough
CT: control target
= control target key end

     0   :  { %s4674_s0 = inlined_call_operand.hbm [shape: f32[16,32], index: 0, kind: input, shape index: {}]   ;;  %s4675_s1 = inlined_call_operand.vmem [shape: bf16[2,32,96], index: 1, kind: input, shape index: {}]   ;;  %s4676_s2 = inlined_call_operand.vmem [shape: f32[2,1,96], index: 2, kind: input, shape index: {}]   ;;  %s4677_s3 = inlined_call_operand.vmem [shape: bf16[2,32,32], index: 3, kind: input, shape index: {}]   ;;  %s4678_s4 = inlined_call_operand.vmem [shape: f32[2,1,32], index: 4, kind: input, shape index: {}]   ;;  %s4679_s5 = inlined_call_operand.vmem [shape: f32[2,1,32], index: 5, kind: input, shape index: {}]   ;;  %s4680_s6 = inlined_call_operand.vmem [shape: f32[2,1,32], index: 6, kind: input, shape index: {}]   ;;  %s4681_s7 = inlined_call_operand.vmem [shape: bf16[2,32,32], index: 7, kind: input, shape index: {}]   ;;  %s4682_s8 = inlined_call_operand.hbm [shape: f32[2,1,32], index: 8, kind: input, shape index: {}]   ;;  %s4683_s9 = inlined_call_operand.hbm [shape: bf16[2,32,64], index: 9, kind: input, shape index: {}]   ;;  %s4684_s10 = inlined_call_operand.hbm [shape: f32[2,1,64], index: 10, kind: input, shape index: {}]   ;;  %s4685_s11 = inlined_call_operand.hbm [shape: bf16[2,32,32], index: 11, kind: input, shape index: {}]   ;;  %s4686_s12 = inlined_call_operand.hbm [shape: f32[2,1,32], index: 12, kind: input, shape index: {}]   ;;  %s4687_s13 = inlined_call_operand.vmem [shape: f32[2,1,32], index: 13, kind: input, shape index: {}]   ;;  %s4688_s14 = inlined_call_operand.vmem [shape: f32[2,1,32], index: 14, kind: input, shape index: {}]   ;;  %s4689_s15 = inlined_call_operand.hbm [shape: bf16[2,32,64], index: 15, kind: input, shape index: {}]   ;;  %s4690_s16 = inlined_call_operand.hbm [shape: f32[2,1,64], index: 16, kind: input, shape index: {}]   ;;  %s4691_s17 = inlined_call_operand.vmem [shape: bf16[2,64,32], index: 17, kind: input, shape index: {}]   ;;  %s4692_s18 = inlined_call_operand.hbm [shape: f32[2,1,32], index: 18, kind: input, shape index: {}]   ;;  %s4693_s19 = inlined_call_operand.vmem [shape: f32[2,1,32], index: 19, kind: input, shape index: {}]   ;;  %s4694_s20 = inlined_call_operand.vmem [shape: f32[2,1,32], index: 20, kind: input, shape index: {}]   ;;  %s4695_s21 = inlined_call_operand.hbm [shape: bf16[32,128], index: 21, kind: input, shape index: {}]   ;;  %s4696_s22 = inlined_call_operand.vmem [shape: f32[1,128], index: 22, kind: input, shape index: {}]   ;;  %s4697_s23 = inlined_call_operand.hbm [shape: f32[16,128], index: 23, kind: output, shape index: {}]  }
   0x1   :  { %4707 = sst [smem:[#allocation34_spill]] %s4674_s0 }
   0x2   :  { %4708 = sst [smem:[#allocation35_spill]] %s4675_s1 }
   0x3   :  { %4709 = sst [smem:[#allocation36_spill]] %s4676_s2 }
   0x4   :  { %4710 = sst [smem:[#allocation37_spill]] %s4677_s3 }
   0x5   :  { %4711 = sst [smem:[#allocation38_spill]] %s4678_s4 }
   0x6   :  { %4712 = sst [smem:[#allocation39_spill]] %s4679_s5 }
   0x7   :  { %4713 = sst [smem:[#allocation40_spill]] %s4680_s6 }
   0x8   :  { %4714 = sst [smem:[#allocation41_spill]] %s4681_s7 }
   0x9   :  { %4715 = sst [smem:[#allocation42_spill]] %s4682_s8 }
   0xa   :  { %4716 = sst [smem:[#allocation43_spill]] %s4683_s9 }
   0xb   :  { %4717 = sst [smem:[#allocation44_spill]] %s4684_s10 }
   0xc   :  { %4718 = sst [smem:[#allocation45_spill]] %s4685_s11 }
   0xd   :  { %4719 = sst [smem:[#allocation46_spill]] %s4686_s12 }
   0xe   :  { %4720 = sst [smem:[#allocation47_spill]] %s4687_s13 }
   0xf   :  { %4721 = sst [smem:[#allocation48_spill]] %s4688_s14 }
  0x10   :  { %4722 = sst [smem:[#allocation49_spill]] %s4689_s15 }
  0x11   :  { %4723 = sst [smem:[#allocation50_spill]] %s4690_s16 }
  0x12   :  { %4724 = sst [smem:[#allocation51_spill]] %s4691_s17 }
  0x13   :  { %4725 = sst [smem:[#allocation52_spill]] %s4692_s18 }
  0x14   :  { %4726 = sst [smem:[#allocation53_spill]] %s4693_s19 }
  0x15   :  { %4727 = sst [smem:[#allocation54_spill]] %s4694_s20 }
  0x16   :  { %4728 = sst [smem:[#allocation55_spill]] %s4695_s21 }
  0x17   :  { %4729 = sst [smem:[#allocation56_spill]] %s4696_s22 }
  0x18   :  { %4730 = sst [smem:[#allocation57_spill]] %s4697_s23 }
  0x19   :  { %28 = vsyncpa [#allocation4], 0 }
  0x1a   :  { %29 = vsyncpa [#allocation7], 0 }
  0x1b   :  { %31 = vsyncpa [#allocation7 + $0x1], 0 }
  0x1c   :  { %32 = vsyncpa [#allocation10], 0 }
  0x1d   :  { %34 = vsyncpa [#allocation10 + $0x1], 0 }
  0x1e   :  { %35 = vsyncpa [#allocation13], 0 }
  0x1f   :  { %37 = vsyncpa [#allocation13 + $0x1], 0 }
  0x20   :  { %38 = vsyncpa [#allocation16], 0 }
  0x21   :  { %40 = vsyncpa [#allocation16 + $0x1], 0 }
  0x22   :  { %41 = vsyncpa [#allocation19], 0 }
  0x23   :  { %42 = vsyncpa [#allocation5], 0  ;;  %s4054_s4 = smov 0   ;;  %s4056_s30 = smov 0  }
  0x24   :  { %s4058_s24 = smov 0   ;;  %s4060_s25 = smov 0  }
  0x25   :  { %s4062_s5 = smov 0   ;;  %s4064_s1 = smov 0  }
  0x26 LB: > { %4731 = sst [smem:[#allocation28_spill]] %s3895_s30  ;;  %s57_s26 = sadd.s32 1, %s3907_s5  ;;  %s3911_s1 = sphi %s4064_s1, %s48_s1   ;;  %s3907_s5 = sphi %s4062_s5, %s4793_s5   ;;  %s3903_s25 = sphi %s4060_s25, %s4792_s25   ;;  %s3899_s24 = sphi %s4058_s24, %s4791_s24   ;;  %s3895_s30 = sphi %s4056_s30, %s4790_s30   ;;  %s3891_s4 = sphi %s4054_s4, %s4789_s4  }
  0x27   : > { %4732 = sst [smem:[#allocation29_spill]] %s3899_s24  ;;  %s275_s2 = sadd.s32 1, %s3899_s24 }
  0x28   : > { %4733 = sst [smem:[#allocation30_spill]] %s3907_s5  ;;  %p58_p0 = scmp.ge.s32.totalorder %s57_s26, 2 }
  0x29   : > { %4734 = sst [smem:[#allocation31_spill]] %s3911_s1  ;;  %p282_p1 = scmp.ne.s32.totalorder %s3899_s24, %s3895_s30 }
  0x2a   : > { %p283_p2 = scmp.eq.s32.totalorder %s3911_s1, 0  ;;  %s4795_s26 = smov (%p58_p0, %s57_s26), 0 }
  0x2b   : > { %4735 = sst [smem:[#allocation32_spill]] %s4795_s26  ;;  %p3343_p4 = scmp.lt.s32.totalorder %s3911_s1, 2 }
  0x2c   : > { %p4091_p3 = por %p283_p2, %p282_p1  ;;  %s272_s27 = ssub.s32 %s3907_s5, %s4795_s26 }
  0x2d   : > { %s4099_s7 = sand.u32 1, %s3911_s1   ;;  %p273_p5 = scmp.eq.s32.totalorder %s272_s27, 0 }
  0x2e   : > { %s4102_s28 = sand.u32 1, %s3899_s24   ;;  %s4737_s8 = sld [smem:[#allocation42_spill]] }
  0x2f   : > { %s4109_s23 = scalar_select %p273_p5, %s3899_s24, %s275_s2  }
  0x30   : > { %s777_s26 = scalar_lea.vmem [#allocation6], %s4102_s28  ;;  %p4114_p6 = pnand %p3343_p4, %p4091_p3 }
  0x31   : > { %4738 = sst [smem:[#allocation33_spill]] %s4109_s23  ;;  %s784_s20 = sshll.u32 %s777_s26, 4  ;;  %s785_s20 = int_to_ptr.vmem [resolvable:$true] %s784_s20 }
  0x32   : > { %s4740_s10 = sld [smem:[#allocation44_spill]]  ;;  %s816_s6 = scalar_lea.vmem [#allocation9], %s4102_s28 }
  0x33   : > { %s4699_s23 = scalar_lea.sflag [#allocation10], %s4099_s7  ;;  %s4741_s12 = sld [smem:[#allocation46_spill]] }
  0x34   : > { %s780_s0 = scalar_lea.hbm %s4737_s8, %s3907_s5  ;;  %s4700_s8 = scalar_lea.sflag [#allocation7], %s4099_s7 }
  0x35   : > { %s782_s22 = sshll.u32 %s780_s0, 4  ;;  %s823_s0 = sshll.u32 %s816_s6, 4  ;;  %s783_s22 = int_to_ptr.hbm [resolvable:$true] %s782_s22  ;;  %s824_s0 = int_to_ptr.vmem [resolvable:$true] %s823_s0 }
  0x36   : > { %3319 = dma.hbm_to_vmem [thread:$0]  (!%p4114_p6), %s783_s22, 16, %s785_s20, %s4700_s8  }
  0x37   : > { %s855_s20 = scalar_lea.vmem [#allocation12], %s4102_s28  ;;  %s4702_s6 = scalar_lea.sflag [#allocation13], %s4099_s7 }
  0x38   : > { %s819_s2 = scalar_lea.hbm %s4740_s10, %s3907_s5  ;;  %s862_s22 = sshll.u32 %s855_s20, 4  ;;  %s863_s22 = int_to_ptr.vmem [resolvable:$true] %s862_s22 }
  0x39   : > { %s821_s26 = sshll.u32 %s819_s2, 4  ;;  %s858_s10 = scalar_lea.hbm %s4741_s12, %s3907_s5  ;;  %s822_s26 = int_to_ptr.hbm [resolvable:$true] %s821_s26 }
  0x3a   : > { %3325 = dma.hbm_to_vmem [thread:$0]  (!%p4114_p6), %s822_s26, 16, %s824_s0, %s4699_s23  }
  0x3b   : > { %s860_s2 = sshll.u32 %s858_s10, 4  ;;  %s4742_s16 = sld [smem:[#allocation50_spill]]  ;;  %s861_s2 = int_to_ptr.hbm [resolvable:$true] %s860_s2 }
  0x3c   : > { %3331 = dma.hbm_to_vmem [thread:$0]  (!%p4114_p6), %s861_s2, 16, %s863_s22, %s4702_s6  }
  0x3d   : > { %s906_s23 = scalar_lea.vmem [#allocation15], %s4102_s28  ;;  %s4701_s12 = scalar_lea.sflag [#allocation16], %s4099_s7 }
  0x3e   : > { %s913_s8 = sshll.u32 %s906_s23, 4  ;;  %s4154_s10 = sadd.s32 4294967295, %s3911_s1   ;;  %s914_s8 = int_to_ptr.vmem [resolvable:$true] %s913_s8 }
  0x3f   : > { %p288_p7 = scmp.ne.s32.totalorder %s3895_s30, %s3891_s4  ;;  %p289_p8 = scmp.eq.s32.totalorder %s4154_s10, 0 }
  0x40   : > { %p3125_p9 = scmp.ge.s32.totalorder %s3911_s1, 1  ;;  %p679_p10 = scmp.lt.s32.totalorder %s3911_s1, 3 }
  0x41   : > { %s909_s29 = scalar_lea.hbm %s4742_s16, %s3907_s5  ;;  %p4163_p11 = por %p289_p8, %p288_p7 }
  0x42   : > { %s911_s3 = sshll.u32 %s909_s29, 4  ;;  %s4744_s2 = sld [smem:[#allocation34_spill]]  ;;  %s912_s3 = int_to_ptr.hbm [resolvable:$true] %s911_s3 }
  0x43   : > { %3337 = dma.hbm_to_vmem [thread:$0]  (!%p4114_p6), %s912_s3, 16, %s914_s8, %s4701_s12  }
  0x44   : > { %p4170_p12 = pnand %p3125_p9, %p679_p10  ;;  %s3913_s4 = smov [#allocation3]  }
  0x45   : > { %s695_s0 = sshll.u32 %s3913_s4, 4  ;;  %s4746_s21 = sld [smem:[#allocation55_spill]]  ;;  %s696_s0 = int_to_ptr.vmem [resolvable:$true] %s695_s0 }
  0x46   : > { %p3309_p13 = pneg %p4170_p12  ;;  %s3914_s22 = smov [#allocation18]  }
  0x47   : > { %s3915_s12 = smov 128   ;;  %s3916_s6 = smov 8  }
  0x48   : > { %s693_s26 = sshll.u32 %s4744_s2, 4  ;;  %p3310_p0 = pnand %p3309_p13, %p289_p8  ;;  %s694_s26 = int_to_ptr.hbm [resolvable:$true] %s693_s26 }
  0x49   : > { %s709_s2 = sshll.u32 %s3914_s22, 4  ;;  %s3129_s16 = sshll.u32 %s4102_s28, 4  ;;  %s710_s2 = int_to_ptr.vmem [resolvable:$true] %s709_s2 }
  0x4a   : > { %3312 = dma.hbm_to_vmem [thread:$0]  (!%p3310_p0), %s694_s26, 256, %s696_s0, [#allocation4], %s3915_s12, %s3915_s12, %s3916_s6  }
  0x4b   : > { %s707_s23 = sshll.u32 %s4746_s21, 4  ;;  %s3917_s24 = smov 64   ;;  %s708_s23 = int_to_ptr.hbm [resolvable:$true] %s707_s23 }
  0x4c   : > { %s3918_s1 = smov 4   ;;  %s3260_s4 = sshll.u32 %s3907_s5, 4 }
  0x4d   : > { %3315 = dma.hbm_to_vmem [thread:$0]  (!%p3310_p0), %s708_s23, 256, %s710_s2, [#allocation19], %s3917_s24, %s3917_s24, %s3918_s1  }
  0x4e   : > { %s4747_s9 = sld [smem:[#allocation43_spill]]  ;;  %s795_s3 = scalar_lea.vmem [#allocation8], %s3129_s16 }
  0x4f   : > { %s803_s21 = sshll.u32 %s795_s3, 4  ;;  %s4748_s12 = scalar_lea.sflag [#allocation7], %s4099_s7  ;;  %s804_s21 = int_to_ptr.vmem [resolvable:$true] %s803_s21 }
  0x50   : > { %s4749_s11 = sld [smem:[#allocation45_spill]]  ;;  %s834_s23 = scalar_lea.vmem [#allocation11], %s3129_s16 }
  0x51   : > { %s842_s2 = sshll.u32 %s834_s23, 4  ;;  %s4750_s19 = scalar_lea.sflag [#allocation10], %s4099_s7  ;;  %s843_s2 = int_to_ptr.vmem [resolvable:$true] %s842_s2 }
  0x52   : > { %s4751_s15 = sld [smem:[#allocation49_spill]]  ;;  %s4752_s6 = scalar_lea.sflag [#allocation13], %s4099_s7 }
  0x53   : > { %s4753_s18 = sld [smem:[#allocation52_spill]] }
  0x54   : > { %s800_s29 = scalar_lea.hbm %s4747_s9, %s3260_s4 }
  0x55   : > { %s801_s22 = sshll.u32 %s800_s29, 4  ;;  %s802_s22 = int_to_ptr.hbm [resolvable:$true] %s801_s22 }
  0x56   : > { %3322 = dma.hbm_to_vmem [thread:$0]  (!%p4114_p6), %s802_s22, 256, %s804_s21, %s4748_s12, %s3917_s24, %s3917_s24, %s3918_s1  }
  0x57   : > { %s839_s0 = scalar_lea.hbm %s4749_s11, %s3260_s4  ;;  %s885_s21 = scalar_lea.vmem [#allocation14], %s3129_s16 }
  0x58   : > { %s840_s17 = sshll.u32 %s839_s0, 4  ;;  %s890_s9 = scalar_lea.hbm %s4751_s15, %s3260_s4  ;;  %s841_s17 = int_to_ptr.hbm [resolvable:$true] %s840_s17 }
  0x59   : > { %3328 = dma.hbm_to_vmem [thread:$0]  (!%p4114_p6), %s841_s17, 256, %s843_s2, %s4750_s19, %s3917_s24, %s3917_s24, %s3918_s1  }
  0x5a   : > { %s893_s22 = sshll.u32 %s885_s21, 4  ;;  %s891_s12 = sshll.u32 %s890_s9, 4  ;;  %s894_s22 = int_to_ptr.vmem [resolvable:$true] %s893_s22  ;;  %s892_s12 = int_to_ptr.hbm [resolvable:$true] %s891_s12 }
  0x5b   : > { %3334 = dma.hbm_to_vmem [thread:$0]  (!%p4114_p6), %s892_s12, 256, %s894_s22, %s4752_s6, %s3917_s24, %s3917_s24, %s3918_s1  }
  0x5c   : > { %s934_s23 = scalar_lea.hbm %s4753_s18, %s3907_s5  ;;  %s931_s11 = scalar_lea.vmem [#allocation17], %s4102_s28 }
  0x5d   : > { %s938_s14 = sshll.u32 %s931_s11, 4  ;;  %s936_s13 = sshll.u32 %s934_s23, 4  ;;  %s939_s14 = int_to_ptr.vmem [resolvable:$true] %s938_s14  ;;  %s937_s13 = int_to_ptr.hbm [resolvable:$true] %s936_s13 }
  0x5e   : > { %s4754_s2 = scalar_lea.sflag [#allocation16], %s4099_s7  ;;  %959 = sbr.rel (%p4170_p12) target bundleno = 5141 (0x1415), region = 112 }
  0x5f   : > { %3340 = dma.hbm_to_vmem [thread:$0]  (!%p4114_p6), %s937_s13, 16, %s939_s14, %s4754_s2  }
  0x63   : > { %3862 = dma.done.wait (%p289_p8), [#allocation4], 256  }
  0x64   : > { %3864 = vsyncadd (%p289_p8), [#allocation4], 4294967040  ;;  %s966_s9 = sand.u32 1, %s4154_s10   ;;  %s4221_s11 = sand.u32 1, %s3895_s30  }
  0x65   : > { %s967_s16 = scalar_lea.sflag [#allocation7], %s966_s9 }
  0x66   : > { %3866 = dma.done.wait (%p4163_p11), %s967_s16, 272  }
  0x67   : > { %3868 = vsyncadd (%p4163_p11), %s967_s16, 4294967024  ;;  %s4229_s13 = sshll.u32 %s4221_s11, 4  ;;  %s986_s1 = scalar_lea.sflag [#allocation10], %s966_s9 }
  0x68   : > { %3870 = dma.done.wait (%p4163_p11), %s986_s1, 272  }
  0x69   : > { %3872 = vsyncadd (%p4163_p11), %s986_s1, 4294967024  ;;  %s4238_s28 = scalar_lea.vmem [#allocation11], %s4229_s13  ;;  %s1005_s27 = scalar_lea.sflag [#allocation13], %s966_s9 }
  0x6a   : > { %3874 = dma.done.wait (%p4163_p11), %s1005_s27, 272  }
  0x6b   : > { %3876 = vsyncadd (%p4163_p11), %s1005_s27, 4294967024  ;;  %s1024_s17 = scalar_lea.sflag [#allocation16], %s966_s9 }
  0x6c   : > { %3878 = dma.done.wait (%p4163_p11), %s1024_s17, 32  }
  0x6d   : > { %3880 = vsyncadd (%p4163_p11), %s1024_s17, 4294967264 }
  0x6e   : > { %3882 = dma.done.wait (%p289_p8), [#allocation19], 256  }
  0x6f   : > { %3884 = vsyncadd (%p289_p8), [#allocation19], 4294967040  ;;  %p1174_p1 = scmp.lt.s32.totalorder %s3903_s25, 1  ;;  %s4755_s12 = sld [smem:[#allocation36_spill]] }
  0x70   : > { %s4756_s23 = sld [smem:[#allocation35_spill]]  ;;  %p3152_p2 = scmp.ne.s32.totalorder %s3903_s25, 0 }
  0x71   : > { %s4258_s3 = scalar_select %p1174_p1, %s3903_s25, 1 }
  0x72   : > { %s4757_s1 = sld [smem:[#allocation37_spill]] }
  0x73   : > { %s3263_s20 = sshll.u32 %s4258_s3, 4  ;;  %s4761_s0 = sld [smem:[#allocation41_spill]] }
  0x74   : > { %s4763_s19 = sld [smem:[#allocation48_spill]]  ;;  %s3266_s4 = sshll.u32 %s4258_s3, 5 }
  0x75   : > { %s1181_s6 = scalar_lea.vmem %s4755_s12, %s4258_s3  ;;  %s4764_s8 = sld [smem:[#allocation53_spill]] }
  0x76   : > { %s1178_s2 = scalar_lea.vmem %s4756_s23, %s3263_s20  ;;  %s4765_s22 = sld [smem:[#allocation51_spill]] }
  0x77   : > { %s4766_s26 = sld [smem:[#allocation54_spill]] }
  0x78   : > { %s4271_s27 = scalar_lea.vmem %s4757_s1, %s3263_s20  ;;  %s4762_s1 = sld [smem:[#allocation47_spill]] }
  0x79   : > { %s4288_s23 = scalar_lea.vmem %s4761_s0, %s3263_s20 }
  0x7a   : > { %s1206_s17 = scalar_lea.vmem %s4763_s19, %s4258_s3  ;;  %1223 = sbr.rel (%p3152_p2) target bundleno = 130 (0x82), region = 156 }
  0x7b   : > { %s1214_s14 = scalar_lea.vmem %s4764_s8, %s4258_s3 }
  0x7c   : > { %s4306_s12 = scalar_lea.vmem %s4765_s22, %s3266_s4 }
  0x7d   : > { %s1217_s0 = scalar_lea.vmem %s4766_s26, %s4258_s3 }
  0x7e   : > { %s1203_s5 = scalar_lea.vmem %s4762_s1, %s4258_s3 }
  0x7f   : > { %v1224_v0 = vld [vmem:[#allocation3] sm:$0xff]  ;;  %vm1226_vm0 = vcmask 261120   ;;  %v1225_v1 = vld [vmem:[#allocation3 + $0x8] sm:$0xff] }
  0x80   : > { %1227 = vst.msk [vmem:[#allocation2] sm:$0xff] %vm1226_vm0, %v1224_v0 }
  0x81   : > { %1228 = vst.msk [vmem:[#allocation2 + $0x8] sm:$0xff] %vm1226_vm0, %v1225_v1 }
  0x82 PF: > { %v3268_v2 = vld [vmem:[%s1178_s2 + $0x8] sm:$0xff]  ;;  %v3267_v3 = vld [vmem:[%s1178_s2] sm:$0xff]  ;;  %vm1254_vm1 = vcmask 261120   ;;  %s3919_s30 = smov 88   ;;  %s3920_s4 = smov 96   ;;  %vm1284_vm2 = vcmask 64512  }
  0x83   : > { %1264 = vmatpush.bf16.msra.mxu0 %v3268_v2  ;;  %v3417_v7 = vld [vmem:[%s1181_s6] ss:$0 sm:$0xff]  ;;  %s3921_s6 = smov 120   ;;  %s3922_s2 = smov 64   ;;  %vm1321_vm3 = vcmask 1043456  }
  0x84   : > { %s3923_s9 = smov 56   ;;  %s3924_s16 = smov 80   ;;  %v1273_v48 = vld [vmem:[%s4271_s27 + $0x4] sm:$0xf] }
  0x85   : > { %s3925_s1 = smov 112   ;;  %v1513_v49 = vsel %vm1321_vm3, %v1273_v48, 0  ;;  %s3926_s29 = smov 48  }
  0x86   : > { %s3927_s19 = smov 72   ;;  %s3928_s24 = smov 104  }
  0x87   : > { %v4313_v4 = vld [vmem:[#allocation2] sm:$0xff]  ;;  %1265 = vmatpush.bf16.msra.mxu0 %v3267_v3  ;;  %s3929_s7 = smov 40   ;;  %s4767_s21 = sld [smem:[#allocation38_spill]] }
  0x88   : > { %v4315_v5 = vld [vmem:[#allocation2 + $0x8] sm:$0xff]  ;;  %s4771_s26 = sld [smem:[#allocation39_spill]]  ;;  %s4775_s15 = scalar_lea.vmem [#allocation9], %s4221_s11 }
  0x89   : > { %v1238_v6 = vpack.c.bf16 %v4315_v5, %v4313_v4  ;;  %p3246_p3 = scmp.ne.s32.totalorder %s3903_s25, 1 }
  0x8b   : > { %3161 = vmatmul.msk.bf16.vlgmr.msra.gmra.mxu0 %vm1254_vm1, %v1238_v6 }
  0x8d   : > { %s4768_s22 = scalar_lea.vmem %s4767_s21, %s4258_s3  ;;  %s4776_s21 = scalar_lea.vmem [#allocation6], %s4221_s11 }
 0x108   : > { %v1267_v8 = vpop.f32.mrf.mxu0 }
 0x109   : > { %v1268_v9 = vadd.f32 %v3417_v7, %v1267_v8 }
 0x10b   : > { %v1277_v10 = vpack.c.bf16 %v1268_v9, %v1268_v9 }
 0x10d   : > { %v1280_v11 = vunpack.c.l.b16 %v1277_v10 }
 0x10f   : > { %v4320_v12 = vpack.c.b16 %v1280_v11, %v1280_v11 }
 0x110   : > { %v1269_v13 = vpop.f32.mrf.mxu0 }
 0x111   : > { %v1270_v14 = vadd.f32 %v3417_v7, %v1269_v13  ;;  %1398 = vrot.lane.b32.xlu2 %v4320_v12, %s3919_s30  ;;  %1282 = vrot.lane.b32.xlu0 %v4320_v12, %s3920_s4 }
 0x113   : > { %v1278_v15 = vpack.c.bf16 %v1270_v14, %v1270_v14 }
 0x115   : > { %v1339_v16 = vunpack.c.l.b16 %v1278_v15 }
 0x117   : > { %v4326_v17 = vpack.c.b16 %v1339_v16, %v1339_v16 }
 0x119   : > { %1454 = vrot.lane.b32.xlu1 %v4326_v17, %s3919_s30  ;;  %1396 = vrot.lane.b32.xlu2 %v4320_v12, %s3921_s6 }
 0x11a   : > { %1341 = vrot.lane.b32.xlu0 %v4326_v17, %s3920_s4 }
 0x121   : > { %1452 = vrot.lane.b32.xlu1 %v4326_v17, %s3921_s6 }
 0x16b   : > { %v1399_v18 = vpop.permute.xlu2 %1398 }
 0x16c   : > { %v1404_v19 = vsel %vm1284_vm2, %v1399_v18, 0 }
 0x16d   : > { %1413 = vmatpush.bf16.xpose.msrb.mxu0 %v1404_v19 }
 0x173   : > { %v1397_v20 = vpop.permute.xlu2 %1396 }
 0x174   : > { %3166 = vmatmul.msk.bf16.vlgmr.msrb.gmra.mxu0 %vm1284_vm2, %v1397_v20 }
 0x175   : > { %1522 = vmatpush.bf16.msra.mxu0 %v1513_v49 }
 0x183   : > { %v1283_v21 = vpop.permute.xlu0 %1282 }
 0x184   : > { %v1289_v22 = vsel %vm1284_vm2, %v1283_v21, 0 }
 0x185   : > { %1298 = vmatpush.bf16.xpose.msra.mxu1 %v1289_v22 }
 0x18b   : > { %v1455_v23 = vpop.permute.xlu1 %1454 }
 0x18c   : > { %v1342_v24 = vpop.permute.xlu0 %1341  ;;  %3162 = vmatmul.msk.bf16.vlgmr.msra.gmra.mxu1 %vm1284_vm2, %v1277_v10  ;;  %v1460_v25 = vsel %vm1284_vm2, %v1455_v23, 0 }
 0x18d   : > { %v1347_v26 = vsel %vm1284_vm2, %v1342_v24, 0 }
 0x18e   : > { %1356 = vmatpush.bf16.xpose.msra.mxu3 %v1347_v26 }
 0x193   : > { %v1453_v27 = vpop.permute.xlu1 %1452 }
 0x195   : > { %3164 = vmatmul.msk.bf16.vlgmr.msra.gmra.mxu3 %vm1284_vm2, %v1278_v15 }
 0x196   : > { %1469 = vmatpush.bf16.xpose.msrb.mxu3 %v1460_v25 }
 0x1a5   : > { %3168 = vmatmul.msk.bf16.vlgmr.msrb.gmra.mxu3 %vm1284_vm2, %v1453_v27 }
 0x1f1   : > { %v1415_v28 = vpop.f32.mrf.mxu0 }
 0x1f2   : > { %v1419_v39 = vsel %vm1284_vm2, %v1415_v28, -inf }
 0x1f9   : > { %v1417_v29 = vpop.f32.mrf.mxu0 }
 0x209   : > { %v1300_v30 = vpop.f32.mrf.mxu1 }
 0x20a   : > { %v1304_v31 = vsel %vm1284_vm2, %v1300_v30, -inf }
 0x20b   : > { %1305 = vmax.xlane.f32.xlu0 %v1304_v31  ;;  %v1272_v31 = vld [vmem:[%s4271_s27] sm:$0xf] }
 0x211   : > { %v1302_v32 = vpop.f32.mrf.mxu1 }
 0x212   : > { %v1533_v32 = vsel %vm1321_vm3, %v1272_v31, 0 }
 0x218   : > { %v1358_v33 = vpop.f32.mrf.mxu3 }
 0x219   : > { %v1362_v34 = vsel %vm1284_vm2, %v1358_v33, -inf }
 0x21a   : > { %1363 = vmax.xlane.f32.xlu1 %v1362_v34 }
 0x220   : > { %v1360_v35 = vpop.f32.mrf.mxu3 }
 0x228   : > { %v1471_v36 = vpop.f32.mrf.mxu3 }
 0x229   : > { %v1475_v37 = vsel %vm1284_vm2, %v1471_v36, -inf }
 0x22a   : > { %1476 = vmax.xlane.f32.xlu2 %v1475_v37 }
 0x230   : > { %v1473_v38 = vpop.f32.mrf.mxu3 }
 0x232   : > { %1420 = vmax.xlane.f32.xlu2 %v1419_v39 }
 0x233   : > { %1316 = vrot.lane.b32.xlu1 %v4320_v12, %s3922_s2 }
 0x23b   : > { %1487 = vrot.lane.b32.xlu1 %v4326_v17, %s3923_s9 }
 0x243   : > { %1607 = vrot.lane.b32.xlu1 %v4326_v17, %s3924_s16 }
 0x24b   : > { %1605 = vrot.lane.b32.xlu1 %v4326_v17, %s3925_s1 }
 0x27e   : > { %v1306_v40 = vpop.xlane.xlu0 %1305 }
 0x27f   : > { %v1307_v41 = vsub.f32 %v1300_v30, %v1306_v40 }
 0x281   : > { %v1308_v42 = vmul.f32 1.442695, %v1307_v41 }
 0x283   : > { %3430 = vpow2.f32 %v1308_v42 }
 0x289   : > { %v3431_v43 = vpop.eup %3430 }
 0x28a   : > { %v1310_v44 = vsel %vm1284_vm2, %v3431_v43, 0.0 }
 0x28b   : > { %1311 = vadd.xlane.f32.xlu0 %v1310_v44 }
 0x28d   : > { %v1364_v45 = vpop.xlane.xlu1 %1363 }
 0x28e   : > { %v1365_v46 = vsub.f32 %v1358_v33, %v1364_v45 }
 0x290   : > { %v1366_v47 = vmul.f32 1.442695, %v1365_v46 }
 0x292   : > { %3432 = vpow2.f32 %v1366_v47 }
 0x298   : > { %v3433_v50 = vpop.eup %3432 }
 0x299   : > { %v1368_v51 = vsel %vm1284_vm2, %v3433_v50, 0.0 }
 0x29a   : > { %1369 = vadd.xlane.f32.xlu2 %v1368_v51 }
 0x29d   : > { %v1477_v52 = vpop.xlane.xlu2 %1476 }
 0x29e   : > { %v1478_v53 = vsub.f32 %v1471_v36, %v1477_v52 }
 0x29f   : > { %1374 = vrot.lane.b32.xlu0 %v4326_v17, %s3922_s2  ;;  %s4772_s2 = scalar_lea.vmem %s4771_s26, %s4258_s3 }
 0x2a0   : > { %v1479_v54 = vmul.f32 1.442695, %v1478_v53 }
 0x2a2   : > { %3434 = vpow2.f32 %v1479_v54 }
 0x2a5   : > { %v1317_v55 = vpop.permute.xlu1 %1316  ;;  %v1421_v56 = vpop.xlane.xlu2 %1420 }
 0x2a6   : > { %v1422_v57 = vsub.f32 %v1415_v28, %v1421_v56  ;;  %v1323_v58 = vsel %vm1321_vm3, %v1317_v55, 0 }
 0x2a7   : > { %1332 = vmatpush.bf16.msra.mxu2 %v1323_v58  ;;  %1431 = vrot.lane.b32.xlu0 %v4320_v12, %s3923_s9 }
 0x2a8   : > { %v3435_v59 = vpop.eup %3434  ;;  %v1423_v60 = vmul.f32 1.442695, %v1422_v57 }
 0x2a9   : > { %v1481_v61 = vsel %vm1284_vm2, %v3435_v59, 0.0 }
 0x2aa   : > { %3436 = vpow2.f32 %v1423_v60  ;;  %1482 = vadd.xlane.f32.xlu2 %v1481_v61 }
 0x2ad   : > { %v1488_v62 = vpop.permute.xlu1 %1487 }
 0x2ae   : > { %v1493_v13 = vsel %vm1321_vm3, %v1488_v62, 0 }
 0x2af   : > { %1549 = vrot.lane.b32.xlu0 %v4320_v12, %s3925_s1 }
 0x2b0   : > { %v3437_v63 = vpop.eup %3436 }
 0x2b1   : > { %v1425_v0 = vsel %vm1284_vm2, %v3437_v63, 0.0 }
 0x2b2   : > { %1426 = vadd.xlane.f32.xlu2 %v1425_v0 }
 0x2b5   : > { %v1608_v1 = vpop.permute.xlu1 %1607 }
 0x2b6   : > { %v1613_v2 = vsel %vm1284_vm2, %v1608_v1, 0 }
 0x2b7   : > { %1622 = vmatpush.bf16.xpose.msrb.mxu0 %v1613_v2 }
 0x2bd   : > { %v1606_v45 = vpop.permute.xlu1 %1605 }
 0x2ca   : > { %1551 = vrot.lane.b32.xlu2 %v4320_v12, %s3924_s16 }
 0x2fe   : > { %v1312_v3 = vpop.xlane.xlu0 %1311 }
 0x2ff   : > { %3438 = vrcp.f32 %v1312_v3 }
 0x305   : > { %v3439_v6 = vpop.eup %3438 }
 0x306   : > { %v1314_v7 = vmul.f32 %v3439_v6, %v3431_v43 }
 0x308   : > { %v1315_v8 = vpack.c.bf16 %v1314_v7, %v1314_v7 }
 0x30a   : > { %3163 = vmatmul.msk.bf16.vlgmr.msra.gmra.mxu2 %vm1284_vm2, %v1315_v8 }
 0x30d   : > { %v1370_v9 = vpop.xlane.xlu2 %1369 }
 0x30e   : > { %3440 = vrcp.f32 %v1370_v9 }
 0x311   : > { %v1375_v10 = vpop.permute.xlu0 %1374 }
 0x312   : > { %v1380_v11 = vsel %vm1321_vm3, %v1375_v10, 0 }
 0x313   : > { %1389 = vmatpush.bf16.msrb.mxu2 %v1380_v11 }
 0x314   : > { %v3441_v14 = vpop.eup %3440 }
 0x315   : > { %v1372_v15 = vmul.f32 %v3441_v14, %v3433_v50 }
 0x317   : > { %1502 = vmatpush.bf16.msra.mxu2 %v1493_v13  ;;  %v1373_v16 = vpack.c.bf16 %v1372_v15, %v1372_v15 }
 0x319   : > { %v1432_v18 = vpop.permute.xlu0 %1431 }
 0x31a   : > { %3165 = vmatmul.msk.bf16.vlgmr.msrb.gmra.mxu2 %vm1284_vm2, %v1373_v16  ;;  %v1437_v19 = vsel %vm1321_vm3, %v1432_v18, 0 }
 0x31b   : > { %1446 = vmatpush.bf16.msrb.mxu1 %v1437_v19 }
 0x31d   : > { %v1483_v20 = vpop.xlane.xlu2 %1482 }
 0x31e   : > { %3442 = vrcp.f32 %v1483_v20 }
 0x31f   : > { %1542 = vmatpush.bf16.msra.mxu1 %v1533_v32 }
 0x321   : > { %v1550_v30 = vpop.permute.xlu0 %1549 }
 0x324   : > { %v3443_v21 = vpop.eup %3442 }
 0x325   : > { %v1485_v22 = vmul.f32 %v3443_v21, %v3435_v59  ;;  %v1427_v23 = vpop.xlane.xlu2 %1426 }
 0x326   : > { %3444 = vrcp.f32 %v1427_v23 }
 0x327   : > { %v1486_v24 = vpack.c.bf16 %v1485_v22, %v1485_v22 }
 0x32a   : > { %3169 = vmatmul.msk.bf16.vlgmr.msra.gmra.mxu2 %vm1284_vm2, %v1486_v24 }
 0x32c   : > { %v3445_v25 = vpop.eup %3444 }
 0x32d   : > { %v1429_v26 = vmul.f32 %v3445_v25, %v3437_v63  ;;  %v1552_v27 = vpop.permute.xlu2 %1551 }
 0x32e   : > { %v1557_v28 = vsel %vm1284_vm2, %v1552_v27, 0  ;;  %v1274_v27 = vld [vmem:[%s4271_s27 + $0x8] sm:$0xf] }
 0x32f   : > { %1566 = vmatpush.bf16.xpose.msra.mxu3 %v1557_v28  ;;  %v1430_v29 = vpack.c.bf16 %v1429_v26, %v1429_v26  ;;  %v1666_v28 = vsel %vm1321_vm3, %v1274_v27, 0 }
 0x331   : > { %3167 = vmatmul.msk.bf16.vlgmr.msrb.gmra.mxu1 %vm1284_vm2, %v1430_v29 }
 0x336   : > { %3172 = vmatmul.msk.bf16.vlgmr.msra.gmra.mxu3 %vm1284_vm2, %v1550_v30 }
 0x337   : > { %1675 = vmatpush.bf16.msrb.mxu3 %v1666_v28 }
 0x38d   : > { %v1334_v33 = vpop.f32.mrf.mxu2 }
 0x395   : > { %v1336_v34 = vpop.f32.mrf.mxu2 }
 0x39d   : > { %v1391_v35 = vpop.f32.mrf.mxu2 }
 0x39e   : > { %v1395_v36 = vpack.c.bf16 %v1391_v35, %v1334_v33 }
 0x3a0   : > { %3171 = vmatmul.msk.bf16.vlgmr.msra.gmra.mxu1 %vm1284_vm2, %v1395_v36 }
 0x3a5   : > { %v1393_v37 = vpop.f32.mrf.mxu2 }
 0x3ad   : > { %v1504_v38 = vpop.f32.mrf.mxu2 }
 0x3ae   : > { %v1448_v39 = vpop.f32.mrf.mxu1 }
 0x3af   : > { %v1508_v40 = vpack.c.bf16 %v1504_v38, %v1448_v39 }
 0x3b1   : > { %3170 = vmatmul.msk.bf16.vlgmr.msra.gmra.mxu0 %vm1284_vm2, %v1508_v40 }
 0x3b5   : > { %v1506_v41 = vpop.f32.mrf.mxu2 }
 0x3b6   : > { %v1450_v42 = vpop.f32.mrf.mxu1 }
 0x3b9   : > { %v1568_v43 = vpop.f32.mrf.mxu3 }
 0x3ba   : > { %v1572_v44 = vsel %vm1284_vm2, %v1568_v43, -inf }
 0x3bb   : > { %1573 = vmax.xlane.f32.xlu0 %v1572_v44 }
 0x3c1   : > { %v1570_v46 = vpop.f32.mrf.mxu3  ;;  %3174 = vmatmul.msk.bf16.vlgmr.msrb.gmra.mxu0 %vm1284_vm2, %v1606_v45 }
 0x3cf   : > { %1640 = vrot.lane.b32.xlu0 %v4326_v17, %s3926_s29 }
 0x41d   : > { %v1544_v47 = vpop.f32.mrf.mxu1 }
 0x425   : > { %v1546_v29 = vpop.f32.mrf.mxu1 }
 0x42e   : > { %v1524_v48 = vpop.f32.mrf.mxu0  ;;  %v1574_v49 = vpop.xlane.xlu0 %1573 }
 0x42f   : > { %v4386_v50 = vadd.f32 %v1544_v47, %v1524_v48  ;;  %v1575_v51 = vsub.f32 %v1568_v43, %v1574_v49 }
 0x431   : > { %v1576_v52 = vmul.f32 1.442695, %v1575_v51 }
 0x433   : > { %3446 = vpow2.f32 %v1576_v52 }
 0x436   : > { %v4388_v53 = vpop.f32.mrf.mxu0 }
 0x439   : > { %v3447_v54 = vpop.eup %3446 }
 0x43a   : > { %v1578_v55 = vsel %vm1284_vm2, %v3447_v54, 0.0 }
 0x43b   : > { %1579 = vadd.xlane.f32.xlu2 %v1578_v55 }
 0x43e   : > { %v1624_v56 = vpop.f32.mrf.mxu0 }
 0x43f   : > { %v1628_v57 = vsel %vm1284_vm2, %v1624_v56, -inf }
 0x440   : > { %1629 = vmax.xlane.f32.xlu1 %v1628_v57 }
 0x441   : > { %v1641_v58 = vpop.permute.xlu0 %1640 }
 0x442   : > { %v1646_v59 = vsel %vm1321_vm3, %v1641_v58, 0 }
 0x443   : > { %1655 = vmatpush.bf16.msrb.mxu1 %v1646_v59 }
 0x446   : > { %v1626_v60 = vpop.f32.mrf.mxu0 }
 0x453   : > { %1686 = vrot.lane.b32.xlu2 %v4320_v12, %s3927_s19 }
 0x459   : > { %1584 = vrot.lane.b32.xlu1 %v4320_v12, %s3926_s29 }
 0x45b   : > { %1740 = vrot.lane.b32.xlu2 %v4326_v17, %s3928_s24 }
 0x461   : > { %1684 = vrot.lane.b32.xlu1 %v4320_v12, %s3928_s24 }
 0x4ae   : > { %v1580_v1 = vpop.xlane.xlu2 %1579 }
 0x4b3   : > { %v1630_v61 = vpop.xlane.xlu1 %1629 }
 0x4b4   : > { %v1631_v62 = vsub.f32 %v1624_v56, %v1630_v61 }
 0x4b6   : > { %v1632_v63 = vmul.f32 1.442695, %v1631_v62  ;;  %v1687_v7 = vpop.permute.xlu2 %1686 }
 0x4b7   : > { %v1692_v10 = vsel %vm1284_vm2, %v1687_v7, 0 }
 0x4b8   : > { %3448 = vpow2.f32 %v1632_v63 }
 0x4b9   : > { %3450 = vrcp.f32 %v1580_v1 }
 0x4be   : > { %v3449_v0 = vpop.eup %3448  ;;  %v1741_v21 = vpop.permute.xlu2 %1740 }
 0x4bf   : > { %v1634_v2 = vsel %vm1284_vm2, %v3449_v0, 0.0  ;;  %v3451_v3 = vpop.eup %3450 }
 0x4c0   : > { %1635 = vadd.xlane.f32.xlu0 %v1634_v2  ;;  %v1582_v6 = vmul.f32 %v3451_v3, %v3447_v54  ;;  %v3418_v3 = vld [vmem:[%s4768_s22] ss:$0 sm:$0xff] }
 0x4c2   : > { %v1583_v11 = vpack.c.bf16 %v1582_v6, %v1582_v6 }
 0x4cb   : > { %v1585_v8 = vpop.permute.xlu1 %1584 }
 0x4cc   : > { %v1590_v9 = vsel %vm1321_vm3, %v1585_v8, 0 }
 0x4cd   : > { %1599 = vmatpush.bf16.msrb.mxu2 %v1590_v9  ;;  %v1547_v9 = vadd.f32 %v1546_v29, %v4388_v53 }
 0x4d0   : > { %3173 = vmatmul.msk.bf16.vlgmr.msrb.gmra.mxu2 %vm1284_vm2, %v1583_v11 }
 0x4d1   : > { %1701 = vmatpush.bf16.xpose.msra.mxu2 %v1692_v10 }
 0x4d3   : > { %v1685_v13 = vpop.permute.xlu1 %1684 }
 0x4d4   : > { %1742 = vrot.lane.b32.xlu0 %v4326_v17, %s3927_s19 }
 0x4e0   : > { %3177 = vmatmul.msk.bf16.vlgmr.msra.gmra.mxu2 %vm1284_vm2, %v1685_v13 }
 0x533   : > { %v1636_v14 = vpop.xlane.xlu0 %1635 }
 0x534   : > { %3452 = vrcp.f32 %v1636_v14 }
 0x53a   : > { %v3453_v15 = vpop.eup %3452 }
 0x53b   : > { %v1638_v16 = vmul.f32 %v3453_v15, %v3449_v0 }
 0x53d   : > { %v1639_v18 = vpack.c.bf16 %v1638_v16, %v1638_v16 }
 0x53f   : > { %3175 = vmatmul.msk.bf16.vlgmr.msrb.gmra.mxu1 %vm1284_vm2, %v1639_v18 }
 0x546   : > { %v1743_v19 = vpop.permute.xlu0 %1742 }
 0x547   : > { %v1748_v20 = vsel %vm1284_vm2, %v1743_v19, 0 }
 0x548   : > { %1757 = vmatpush.bf16.xpose.msra.mxu1 %v1748_v20  ;;  %v3930_v20 = vmov 32.0  }
 0x54f   : > { %3179 = vmatmul.msk.bf16.vlgmr.msra.gmra.mxu1 %vm1284_vm2, %v1741_v21 }
 0x553   : > { %v1601_v22 = vpop.f32.mrf.mxu2 }
 0x55b   : > { %v1603_v23 = vpop.f32.mrf.mxu2 }
 0x563   : > { %v1703_v24 = vpop.f32.mrf.mxu2 }
 0x564   : > { %v1707_v25 = vsel %vm1284_vm2, %v1703_v24, -inf }
 0x565   : > { %1708 = vmax.xlane.f32.xlu1 %v1707_v25 }
 0x56b   : > { %v1705_v26 = vpop.f32.mrf.mxu2 }
 0x57e   : > { %1775 = vrot.lane.b32.xlu1 %v4326_v17, %s3929_s7 }
 0x5bc   : > { %v1657_v30 = vpop.f32.mrf.mxu1 }
 0x5bd   : > { %v1661_v31 = vpack.c.bf16 %v1657_v30, %v1601_v22 }
 0x5bf   : > { %3176 = vmatmul.msk.bf16.vlgmr.msrb.gmra.mxu3 %vm1284_vm2, %v1661_v31 }
 0x5c4   : > { %v1659_v32 = vpop.f32.mrf.mxu1 }
 0x5cc   : > { %v1759_v33 = vpop.f32.mrf.mxu1 }
 0x5cd   : > { %v1763_v34 = vsel %vm1284_vm2, %v1759_v33, -inf }
 0x5ce   : > { %1764 = vmax.xlane.f32.xlu0 %v1763_v34 }
 0x5d4   : > { %v1761_v35 = vpop.f32.mrf.mxu1 }
 0x5d8   : > { %v1709_v36 = vpop.xlane.xlu1 %1708 }
 0x5d9   : > { %v1710_v37 = vsub.f32 %v1703_v24, %v1709_v36  ;;  %v1231_v36 = vld [vmem:[#allocation3] sm:$0xff] }
 0x5db   : > { %v1711_v38 = vmul.f32 1.442695, %v1710_v37  ;;  %v1232_v37 = vld [vmem:[#allocation3 + $0x8] sm:$0xff] }
 0x5dd   : > { %3454 = vpow2.f32 %v1711_v38  ;;  %v1932_v38 = vpack.c.bf16 %v1232_v37, %v1231_v36 }
 0x5e3   : > { %v3455_v17 = vpop.eup %3454 }
 0x5e4   : > { %v1713_v39 = vsel %vm1284_vm2, %v3455_v17, 0.0 }
 0x5e5   : > { %1714 = vadd.xlane.f32.xlu0 %v1713_v39 }
 0x5f0   : > { %v1776_v40 = vpop.permute.xlu1 %1775 }
 0x5f1   : > { %v1781_v41 = vsel %vm1321_vm3, %v1776_v40, 0 }
 0x5f2   : > { %1790 = vmatpush.bf16.msra.mxu3 %v1781_v41  ;;  %v3269_v41 = vld [vmem:[%s4288_s23] sm:$0xff] }
 0x641   : > { %v1765_v42 = vpop.xlane.xlu0 %1764 }
 0x642   : > { %v1766_v43 = vsub.f32 %v1759_v33, %v1765_v42  ;;  %v1677_v44 = vpop.f32.mrf.mxu3 }
 0x643   : > { %v1682_v45 = vadd.f32 %v1677_v44, %v4386_v50 }
 0x644   : > { %v1767_v46 = vmul.f32 1.442695, %v1766_v43 }
 0x646   : > { %3456 = vpow2.f32 %v1767_v46 }
 0x64a   : > { %v1679_v61 = vpop.f32.mrf.mxu3 }
 0x64b   : > { %v1683_v11 = vadd.f32 %v1679_v61, %v1547_v9 }
 0x64c   : > { %v3457_v47 = vpop.eup %3456 }
 0x64d   : > { %v1769_v48 = vsel %vm1284_vm2, %v3457_v47, 0.0 }
 0x64e   : > { %1770 = vadd.xlane.f32.xlu2 %v1769_v48 }
 0x658   : > { %v1715_v49 = vpop.xlane.xlu0 %1714 }
 0x659   : > { %3458 = vrcp.f32 %v1715_v49 }
 0x65f   : > { %v3459_v52 = vpop.eup %3458 }
 0x660   : > { %v1717_v55 = vmul.f32 %v3459_v52, %v3455_v17  ;;  %v3270_v17 = vld [vmem:[%s4288_s23 + $0x8] sm:$0xff] }
 0x662   : > { %v1718_v59 = vpack.c.bf16 %v1717_v55, %v1717_v55 }
 0x666   : > { %1719 = vrot.lane.b32.xlu2 %v4320_v12, %s3929_s7  ;;  %v1275_v12 = vld [vmem:[%s4271_s27 + $0xc] sm:$0xf]  ;;  %s4769_s27 = scalar_lea.vmem [#allocation8], %s4229_s13  ;;  %s4773_s7 = sld [smem:[#allocation40_spill]] }
 0x667   : > { %v1801_v60 = vsel %vm1321_vm3, %v1275_v12, 0  ;;  %v3272_v34 = vld [vmem:[%s4769_s27 + $0x8] sm:$0xff]  ;;  %s4770_s18 = smov %s4769_s27 }
 0x668   : > { %1810 = vmatpush.bf16.msrb.mxu2 %v1801_v60  ;;  %1957 = vmatpush.bf16.msrb.mxu1 %v3272_v34  ;;  %v3271_v35 = vld [vmem:[%s4770_s18] sm:$0xff] }
 0x66c   : > { %1958 = vmatpush.bf16.msrb.mxu1 %v3271_v35  ;;  %s4774_s8 = scalar_lea.vmem %s4773_s7, %s4258_s3 }
 0x66f   : > { %3199 = vmatmul.msk.bf16.vlgmr.msrb.gmra.mxu1 %vm1254_vm1, %v1932_v38 }
 0x6c1   : > { %v1771_v51 = vpop.xlane.xlu2 %1770 }
 0x6c2   : > { %3460 = vrcp.f32 %v1771_v51 }
 0x6c3   : > { %3462 = vrcp.f32 %v3930_v20 }
 0x6c8   : > { %v3461_v54 = vpop.eup %3460 }
 0x6c9   : > { %v1773_v56 = vmul.f32 %v3461_v54, %v3457_v47  ;;  %v1720_v57 = vpop.permute.xlu2 %1719  ;;  %v3463_v21 = vpop.eup %3462 }
 0x6ca   : > { %v1725_v50 = vsel %vm1321_vm3, %v1720_v57, 0  ;;  %v1835_v22 = vmul.f32 32.0, %v3463_v21  ;;  %vm1839_vm4 = vweird.f32 %v3463_v21 }
 0x6cb   : > { %v1774_v58 = vpack.c.bf16 %v1773_v56, %v1773_v56  ;;  %1734 = vmatpush.bf16.msra.mxu0 %v1725_v50 }
 0x6cc   : > { %v1836_v23 = vsub.f32 1.0, %v1835_v22  ;;  %v3422_v22 = vld [vmem:[%s4776_s21] ss:$0 sm:$0xff] }
 0x6cd   : > { %3180 = vmatmul.msk.bf16.vlgmr.msra.gmra.mxu3 %vm1284_vm2, %v1774_v58 }
 0x6ce   : > { %3178 = vmatmul.msk.bf16.vlgmr.msra.gmra.mxu0 %vm1284_vm2, %v1718_v59  ;;  %v1837_v53 = vmul.f32 %v3463_v21, %v1836_v23  ;;  %v3419_v59 = vld [vmem:[%s4772_s2] ss:$0 sm:$0xff] }
 0x6cf   : > { %1919 = vmatpush.bf16.msrb.mxu0 %v3270_v17 }
 0x6d3   : > { %1920 = vmatpush.bf16.msrb.mxu0 %v3269_v41 }
 0x74b   : > { %v1736_v62 = vpop.f32.mrf.mxu0 }
 0x750   : > { %v1792_v63 = vpop.f32.mrf.mxu3 }
 0x751   : > { %v1796_v0 = vpack.c.bf16 %v1792_v63, %v1736_v62  ;;  %v3420_v62 = vld [vmem:[%s4774_s8] ss:$0 sm:$0xff] }
 0x753   : > { %v1738_v1 = vpop.f32.mrf.mxu0  ;;  %3181 = vmatmul.msk.bf16.vlgmr.msrb.gmra.mxu2 %vm1284_vm2, %v1796_v0 }
 0x758   : > { %v1794_v2 = vpop.f32.mrf.mxu3 }
 0x7d6   : > { %v1812_v6 = vpop.f32.mrf.mxu2 }
 0x7d7   : > { %v1817_v7 = vadd.f32 %v1812_v6, %v1682_v45 }
 0x7d9   : > { %v1822_v8 = vadd.f32 %v3418_v3, %v1817_v7  ;;  %v3421_v7 = vld [vmem:[%s4775_s15] ss:$0 sm:$0xff] }
 0x7db   : > { %v1824_v10 = vadd.f32 %v1822_v8, %v4313_v4  ;;  %v1838_v4 = vadd.f32 %v3463_v21, %v1837_v53  ;;  %v1960_v8 = vpop.f32.mrf.mxu1 }
 0x7dc   : > { %v1961_v9 = vadd.f32 %v3421_v7, %v1960_v8 }
 0x7dd   : > { %v1828_v13 = vsel %vm1254_vm1, %v1824_v10, 0.0  ;;  %v4439_v24 = vsel %vm1839_vm4, %v3463_v21, %v1838_v4 }
 0x7de   : > { %1829 = vadd.xlane.f32.xlu0 %v1828_v13  ;;  %v1814_v14 = vpop.f32.mrf.mxu2 }
 0x7df   : > { %v1818_v15 = vadd.f32 %v1814_v14, %v1683_v11 }
 0x7e1   : > { %v1823_v16 = vadd.f32 %v3418_v3, %v1818_v15 }
 0x7e3   : > { %v1825_v18 = vadd.f32 %v1823_v16, %v4315_v5  ;;  %v1962_v15 = vpop.f32.mrf.mxu1 }
 0x7e4   : > { %v1963_v16 = vadd.f32 %v3421_v7, %v1962_v15 }
 0x7e5   : > { %v1831_v19 = vsel %vm1254_vm1, %v1825_v18, 0.0 }
 0x7e6   : > { %1832 = vadd.xlane.f32.xlu0 %v1831_v19 }
 0x851   : > { %v1830_v25 = vpop.xlane.xlu0 %1829 }
 0x852   : > { %v1841_v26 = vmul.f32 %v4439_v24, %v1830_v25 }
 0x854   : > { %v1843_v27 = vsub.f32 %v1824_v10, %v1841_v26  ;;  %v1972_v10 = vpack.c.bf16 %v1961_v9, %v1961_v9 }
 0x856   : > { %v1845_v5 = vmul.f32 %v1843_v27, %v1843_v27  ;;  %v1978_v11 = vsel %vm1284_vm2, %v1972_v10, 0  ;;  %v2006_v13 = vunpack.c.l.b16 %v1972_v10 }
 0x857   : > { %1987 = vmatpush.bf16.xpose.msrb.mxu3 %v1978_v11 }
 0x858   : > { %v1847_v28 = vsel %vm1254_vm1, %v1845_v5, 0.0  ;;  %v4474_v14 = vpack.c.b16 %v2006_v13, %v2006_v13 }
 0x859   : > { %1848 = vadd.xlane.f32.xlu0 %v1847_v28  ;;  %v1833_v29 = vpop.xlane.xlu0 %1832 }
 0x85a   : > { %v1842_v30 = vmul.f32 %v4439_v24, %v1833_v29  ;;  %2090 = vrot.lane.b32.xlu2 %v4474_v14, %s3921_s6 }
 0x85c   : > { %v1844_v31 = vsub.f32 %v1825_v18, %v1842_v30  ;;  %v1973_v18 = vpack.c.bf16 %v1963_v16, %v1963_v16 }
 0x85e   : > { %v1846_v32 = vmul.f32 %v1844_v31, %v1844_v31  ;;  %v2033_v19 = vsel %vm1284_vm2, %v1973_v18, 0  ;;  %v2061_v20 = vunpack.c.l.b16 %v1973_v18 }
 0x85f   : > { %2042 = vmatpush.bf16.xpose.msra.mxu0 %v2033_v19 }
 0x860   : > { %v1850_v33 = vsel %vm1254_vm1, %v1846_v32, 0.0  ;;  %v4479_v21 = vpack.c.b16 %v2061_v20, %v2061_v20 }
 0x861   : > { %1851 = vadd.xlane.f32.xlu1 %v1850_v33 }
 0x862   : > { %2149 = vrot.lane.b32.xlu2 %v4479_v21, %s3921_s6 }
 0x8cc   : > { %v1849_v39 = vpop.xlane.xlu0 %1848 }
 0x8cd   : > { %v1853_v40 = vmul.f32 %v1849_v39, %v4439_v24 }
 0x8cf   : > { %v1855_v42 = vadd.f32 1e-05, %v1853_v40 }
 0x8d1   : > { %3464 = vrsqrt.f32 %v1855_v42  ;;  %vm1863_vm6 = vweird.f32 %v1855_v42 }
 0x8d4   : > { %v1852_v43 = vpop.xlane.xlu1 %1851 }
 0x8d5   : > { %v1854_v44 = vmul.f32 %v1852_v43, %v4439_v24  ;;  %v1966_v43 = vld [vmem:[%s4238_s28 + $0x4] sm:$0xf] }
 0x8d7   : > { %v3465_v45 = vpop.eup %3464  ;;  %v1856_v46 = vadd.f32 1e-05, %v1854_v44  ;;  %v2208_v44 = vsel %vm1321_vm3, %v1966_v43, 0 }
 0x8d8   : > { %v1858_v47 = vmul.f32 %v3465_v45, %v1855_v42  ;;  %vm1864_vm5 = vweird.f32 %v3465_v45 }
 0x8d9   : > { %3466 = vrsqrt.f32 %v1856_v46  ;;  %vm1865_vm7 = vmor %vm1863_vm6, %vm1864_vm5  ;;  %vm1873_vm9 = vweird.f32 %v1856_v46 }
 0x8da   : > { %v1859_v48 = vmul.f32 %v3465_v45, %v1858_v47 }
 0x8dc   : > { %v1860_v49 = vmul.f32 0.5, %v1859_v48 }
 0x8de   : > { %v1861_v51 = vsub.f32 1.5, %v1860_v49 }
 0x8df   : > { %v3467_v52 = vpop.eup %3466 }
 0x8e0   : > { %v1862_v54 = vmul.f32 %v3465_v45, %v1861_v51  ;;  %v1868_v55 = vmul.f32 %v3467_v52, %v1856_v46  ;;  %vm1874_vm8 = vweird.f32 %v3467_v52 }
 0x8e1   : > { %vm1875_vm10 = vmor %vm1873_vm9, %vm1874_vm8 }
 0x8e2   : > { %v1869_v56 = vmul.f32 %v3467_v52, %v1868_v55  ;;  %v1866_v57 = vsel %vm1865_vm7, %v3465_v45, %v1862_v54 }
 0x8e3   : > { %v1877_v12 = vmul.f32 %v1866_v57, %v1843_v27 }
 0x8e4   : > { %v1870_v50 = vmul.f32 0.5, %v1869_v56 }
 0x8e5   : > { %v1882_v63 = vmul.f32 %v3419_v59, %v1877_v12 }
 0x8e6   : > { %v1871_v58 = vsub.f32 1.5, %v1870_v50 }
 0x8e7   : > { %v4464_v2 = vadd.f32 %v3420_v62, %v1882_v63 }
 0x8e8   : > { %v1872_v60 = vmul.f32 %v3467_v52, %v1871_v58 }
 0x8ea   : > { %v1876_v61 = vsel %vm1875_vm10, %v3467_v52, %v1872_v60 }
 0x8eb   : > { %v1878_v0 = vmul.f32 %v1876_v61, %v1844_v31  ;;  %v2091_v31 = vpop.permute.xlu2 %2090 }
 0x8ec   : > { %v2096_v32 = vsel %vm1284_vm2, %v2091_v31, 0 }
 0x8ed   : > { %v1883_v1 = vmul.f32 %v3419_v59, %v1878_v0  ;;  %2105 = vmatpush.bf16.xpose.msra.mxu3 %v2096_v32 }
 0x8ef   : > { %v4466_v3 = vadd.f32 %v3420_v62, %v1883_v1 }
 0x8f1   : > { %v1894_v6 = vpack.c.bf16 %v4466_v3, %v4464_v2 }
 0x8f3   : > { %3190 = vmatmul.msk.bf16.vlgmr.msrb.gmra.mxu0 %vm1254_vm1, %v1894_v6  ;;  %v2150_v33 = vpop.permute.xlu2 %2149 }
 0x8f4   : > { %v2155_v34 = vsel %vm1284_vm2, %v2150_v33, 0 }
 0x8f5   : > { %2164 = vmatpush.bf16.xpose.msrb.mxu0 %v2155_v34 }
 0x970   : > { %v1922_v23 = vpop.f32.mrf.mxu0 }
 0x971   : > { %v1923_v53 = vadd.f32 %v3422_v22, %v1922_v23 }
 0x973   : > { %v1970_v4 = vpack.c.bf16 %v1923_v53, %v1923_v53 }
 0x975   : > { %v2086_v25 = vunpack.c.l.b16 %v1970_v4  ;;  %3200 = vmatmul.msk.bf16.vlgmr.msrb.gmra.mxu3 %vm1284_vm2, %v1970_v4 }
 0x976   : > { %2217 = vmatpush.bf16.msrb.mxu3 %v2208_v44 }
 0x977   : > { %v4486_v26 = vpack.c.b16 %v2086_v25, %v2086_v25 }
 0x978   : > { %v1924_v27 = vpop.f32.mrf.mxu0 }
 0x979   : > { %v1925_v5 = vadd.f32 %v3422_v22, %v1924_v27  ;;  %2088 = vrot.lane.b32.xlu0 %v4486_v26, %s3921_s6 }
 0x97b   : > { %v1971_v28 = vpack.c.bf16 %v1925_v5, %v1925_v5 }
 0x97d   : > { %v2145_v29 = vunpack.c.l.b16 %v1971_v28  ;;  %3202 = vmatmul.msk.bf16.vlgmr.msra.gmra.mxu0 %vm1284_vm2, %v1971_v28 }
 0x97f   : > { %v4491_v30 = vpack.c.b16 %v2145_v29, %v2145_v29 }
 0x981   : > { %2147 = vrot.lane.b32.xlu2 %v4491_v30, %s3921_s6 }
 0x9db   : > { %v2148_v35 = vpop.permute.xlu2 %2147 }
 0x9dc   : > { %3206 = vmatmul.msk.bf16.vlgmr.msrb.gmra.mxu0 %vm1284_vm2, %v2148_v35 }
 0x9eb   : > { %v2089_v36 = vpop.permute.xlu0 %2088 }
 0x9ec   : > { %3204 = vmatmul.msk.bf16.vlgmr.msra.gmra.mxu3 %vm1284_vm2, %v2089_v36  ;;  %v1965_v36 = vld [vmem:[%s4238_s28] sm:$0xf] }
 0x9f8   : > { %v1989_v37 = vpop.f32.mrf.mxu3 }
 0x9f9   : > { %v1993_v38 = vsel %vm1284_vm2, %v1989_v37, -inf }
 0x9fa   : > { %v2044_v17 = vpop.f32.mrf.mxu0  ;;  %1994 = vmax.xlane.f32.xlu0 %v1993_v38  ;;  %v2228_v38 = vsel %vm1321_vm3, %v1965_v36, 0  ;;  %v1967_v36 = vld [vmem:[%s4238_s28 + $0x8] sm:$0xf] }
 0x9fb   : > { %v2048_v39 = vsel %vm1284_vm2, %v2044_v17, -inf }
 0x9fc   : > { %2049 = vmax.xlane.f32.xlu2 %v2048_v39 }
 0xa00   : > { %v1991_v40 = vpop.f32.mrf.mxu3 }
 0xa02   : > { %v2046_v41 = vpop.f32.mrf.mxu0 }
 0xa0e   : > { %2008 = vrot.lane.b32.xlu0 %v4474_v14, %s3920_s4 }
 0xa14   : > { %2063 = vrot.lane.b32.xlu2 %v4479_v21, %s3920_s4 }
 0xa16   : > { %2123 = vrot.lane.b32.xlu0 %v4474_v14, %s3919_s30 }
 0xa1c   : > { %2302 = vrot.lane.b32.xlu2 %v4479_v21, %s3925_s1 }
 0xa1e   : > { %2246 = vrot.lane.b32.xlu0 %v4474_v14, %s3925_s1 }
 0xa24   : > { %2300 = vrot.lane.b32.xlu2 %v4491_v30, %s3925_s1 }
 0xa26   : > { %2244 = vrot.lane.b32.xlu0 %v4486_v26, %s3925_s1 }
 0xa59   : > { %v2166_v42 = vpop.f32.mrf.mxu0 }
 0xa5a   : > { %v2170_v50 = vsel %vm1284_vm2, %v2166_v42, -inf }
 0xa61   : > { %v2168_v45 = vpop.f32.mrf.mxu0 }
 0xa6d   : > { %v1995_v46 = vpop.xlane.xlu0 %1994 }
 0xa6e   : > { %v1996_v47 = vsub.f32 %v1989_v37, %v1995_v46 }
 0xa6f   : > { %v2050_v48 = vpop.xlane.xlu2 %2049  ;;  %v2107_v49 = vpop.f32.mrf.mxu3 }
 0xa70   : > { %v2111_v51 = vsel %vm1284_vm2, %v2107_v49, -inf  ;;  %v1997_v52 = vmul.f32 1.442695, %v1996_v47  ;;  %v2051_v54 = vsub.f32 %v2044_v17, %v2050_v48 }
 0xa71   : > { %2112 = vmax.xlane.f32.xlu1 %v2111_v51 }
 0xa72   : > { %3468 = vpow2.f32 %v1997_v52  ;;  %v2052_v58 = vmul.f32 1.442695, %v2051_v54 }
 0xa74   : > { %3470 = vpow2.f32 %v2052_v58 }
 0xa77   : > { %v2064_v55 = vpop.permute.xlu2 %2063  ;;  %v2109_v56 = vpop.f32.mrf.mxu3 }
 0xa78   : > { %v2069_v57 = vsel %vm1321_vm3, %v2064_v55, 0  ;;  %v3469_v59 = vpop.eup %3468 }
 0xa79   : > { %2078 = vmatpush.bf16.msra.mxu1 %v2069_v57  ;;  %2171 = vmax.xlane.f32.xlu1 %v2170_v50  ;;  %v1999_v62 = vsel %vm1284_vm2, %v3469_v59, 0.0 }
 0xa7a   : > { %v3471_v0 = vpop.eup %3470 }
 0xa7b   : > { %v2054_v6 = vsel %vm1284_vm2, %v3471_v0, 0.0 }
 0xa7f   : > { %v2303_v12 = vpop.permute.xlu2 %2302 }
 0xa80   : > { %v2308_v60 = vsel %vm1284_vm2, %v2303_v12, 0  ;;  %v2009_v61 = vpop.permute.xlu0 %2008 }
 0xa81   : > { %v2014_v63 = vsel %vm1321_vm3, %v2009_v61, 0  ;;  %2317 = vmatpush.bf16.xpose.msra.mxu3 %v2308_v60  ;;  %2000 = vadd.xlane.f32.xlu1 %v1999_v62 }
 0xa82   : > { %2023 = vmatpush.bf16.msra.mxu2 %v2014_v63 }
 0xa87   : > { %v2301_v43 = vpop.permute.xlu2 %2300 }
 0xa88   : > { %v2124_v1 = vpop.permute.xlu0 %2123 }
 0xa89   : > { %v2129_v7 = vsel %vm1321_vm3, %v2124_v1, 0  ;;  %2055 = vadd.xlane.f32.xlu1 %v2054_v6 }
 0xa8a   : > { %2138 = vmatpush.bf16.msrb.mxu2 %v2129_v7 }
 0xa90   : > { %v2247_v8 = vpop.permute.xlu0 %2246 }
 0xa91   : > { %v2252_v9 = vsel %vm1284_vm2, %v2247_v8, 0 }
 0xa92   : > { %2261 = vmatpush.bf16.xpose.msra.mxu0 %v2252_v9 }
 0xa98   : > { %v2245_v10 = vpop.permute.xlu0 %2244 }
 0xa99   : > { %3210 = vmatmul.msk.bf16.vlgmr.msra.gmra.mxu0 %vm1284_vm2, %v2245_v10 }
 0xae4   : > { %v2113_v11 = vpop.xlane.xlu1 %2112 }
 0xae5   : > { %v2114_v13 = vsub.f32 %v2107_v49, %v2113_v11 }
 0xae7   : > { %v2115_v15 = vmul.f32 1.442695, %v2114_v13 }
 0xae9   : > { %3472 = vpow2.f32 %v2115_v15 }
 0xaec   : > { %v2172_v16 = vpop.xlane.xlu1 %2171 }
 0xaed   : > { %v2173_v18 = vsub.f32 %v2166_v42, %v2172_v16 }
 0xaef   : > { %v3473_v19 = vpop.eup %3472  ;;  %v2174_v20 = vmul.f32 1.442695, %v2173_v18 }
 0xaf0   : > { %v2117_v22 = vsel %vm1284_vm2, %v3473_v19, 0.0 }
 0xaf1   : > { %3474 = vpow2.f32 %v2174_v20  ;;  %2118 = vadd.xlane.f32.xlu1 %v2117_v22 }
 0xaf4   : > { %v2001_v23 = vpop.xlane.xlu1 %2000 }
 0xaf5   : > { %3476 = vrcp.f32 %v2001_v23 }
 0xaf7   : > { %v3475_v53 = vpop.eup %3474 }
 0xaf8   : > { %v2176_v4 = vsel %vm1284_vm2, %v3475_v53, 0.0 }
 0xaf9   : > { %2177 = vadd.xlane.f32.xlu1 %v2176_v4 }
 0xafb   : > { %v3477_v25 = vpop.eup %3476 }
 0xafc   : > { %v2003_v27 = vmul.f32 %v3477_v25, %v3469_v59  ;;  %v2056_v5 = vpop.xlane.xlu1 %2055 }
 0xafd   : > { %3478 = vrcp.f32 %v2056_v5 }
 0xafe   : > { %v2004_v28 = vpack.c.bf16 %v2003_v27, %v2003_v27 }
 0xb00   : > { %3201 = vmatmul.msk.bf16.vlgmr.msra.gmra.mxu2 %vm1284_vm2, %v2004_v28 }
 0xb01   : > { %2237 = vmatpush.bf16.msra.mxu2 %v2228_v38 }
 0xb03   : > { %v3479_v29 = vpop.eup %3478 }
 0xb04   : > { %v2058_v31 = vmul.f32 %v3479_v29, %v3471_v0 }
 0xb06   : > { %v2059_v32 = vpack.c.bf16 %v2058_v31, %v2058_v31 }
 0xb08   : > { %3203 = vmatmul.msk.bf16.vlgmr.msra.gmra.mxu1 %vm1284_vm2, %v2059_v32 }
 0xb12   : > { %2182 = vrot.lane.b32.xlu1 %v4479_v21, %s3919_s30  ;;  %s4777_s30 = scalar_lea.vmem [#allocation12], %s4221_s11 }
 0xb16   : > { %v2263_v33 = vpop.f32.mrf.mxu0 }
 0xb17   : > { %v2267_v34 = vsel %vm1284_vm2, %v2263_v33, -inf }
 0xb18   : > { %2268 = vmax.xlane.f32.xlu2 %v2267_v34 }
 0xb1e   : > { %v2265_v35 = vpop.f32.mrf.mxu0 }
 0xb30   : > { %2335 = vrot.lane.b32.xlu2 %v4479_v21, %s3924_s16 }
 0xb64   : > { %v2119_v37 = vpop.xlane.xlu1 %2118 }
 0xb65   : > { %3480 = vrcp.f32 %v2119_v37  ;;  %v2361_v37 = vsel %vm1321_vm3, %v1967_v36, 0 }
 0xb66   : > { %2370 = vmatpush.bf16.msrb.mxu0 %v2361_v37 }
 0xb6b   : > { %v3481_v17 = vpop.eup %3480 }
 0xb6c   : > { %v2121_v39 = vmul.f32 %v3481_v17, %v3473_v19  ;;  %v2178_v41 = vpop.xlane.xlu1 %2177 }
 0xb6d   : > { %3482 = vrcp.f32 %v2178_v41 }
 0xb6e   : > { %v2122_v40 = vpack.c.bf16 %v2121_v39, %v2121_v39 }
 0xb70   : > { %3205 = vmatmul.msk.bf16.vlgmr.msrb.gmra.mxu2 %vm1284_vm2, %v2122_v40 }
 0xb73   : > { %v3483_v42 = vpop.eup %3482 }
 0xb74   : > { %v2180_v44 = vmul.f32 %v3483_v42, %v3475_v53 }
 0xb76   : > { %v2181_v51 = vpack.c.bf16 %v2180_v44, %v2180_v44 }
 0xb83   : > { %v2025_v45 = vpop.f32.mrf.mxu2 }
 0xb84   : > { %v2183_v46 = vpop.permute.xlu1 %2182 }
 0xb85   : > { %v2188_v47 = vsel %vm1321_vm3, %v2183_v46, 0  ;;  %v2080_v48 = vpop.f32.mrf.mxu1 }
 0xb86   : > { %v2084_v49 = vpack.c.bf16 %v2080_v48, %v2025_v45  ;;  %2197 = vmatpush.bf16.msrb.mxu1 %v2188_v47 }
 0xb88   : > { %3209 = vmatmul.msk.bf16.vlgmr.msra.gmra.mxu2 %vm1284_vm2, %v2084_v49 }
 0xb89   : > { %3207 = vmatmul.msk.bf16.vlgmr.msrb.gmra.mxu1 %vm1284_vm2, %v2181_v51 }
 0xb8b   : > { %v2269_v52 = vpop.xlane.xlu2 %2268  ;;  %v2027_v54 = vpop.f32.mrf.mxu2 }
 0xb8c   : > { %v2270_v55 = vsub.f32 %v2263_v33, %v2269_v52 }
 0xb8d   : > { %v2082_v56 = vpop.f32.mrf.mxu1 }
 0xb8e   : > { %v2271_v57 = vmul.f32 1.442695, %v2270_v55 }
 0xb90   : > { %3484 = vpow2.f32 %v2271_v57 }
 0xb93   : > { %v2336_v50 = vpop.permute.xlu2 %2335 }
 0xb94   : > { %v2341_v58 = vsel %vm1321_vm3, %v2336_v50, 0 }
 0xb95   : > { %2350 = vmatpush.bf16.msrb.mxu2 %v2341_v58 }
 0xb96   : > { %v3485_v59 = vpop.eup %3484 }
 0xb97   : > { %v2273_v12 = vsel %vm1284_vm2, %v3485_v59, 0.0 }
 0xb98   : > { %2274 = vadd.xlane.f32.xlu1 %v2273_v12 }
 0xbb1   : > { %2381 = vrot.lane.b32.xlu1 %v4474_v14, %s3928_s24 }
 0xbf3   : > { %v2140_v60 = vpop.f32.mrf.mxu2 }
 0xbfb   : > { %v2142_v61 = vpop.f32.mrf.mxu2 }
 0xc06   : > { %v2199_v62 = vpop.f32.mrf.mxu1 }
 0xc07   : > { %v2203_v63 = vpack.c.bf16 %v2199_v62, %v2140_v60 }
 0xc09   : > { %3208 = vmatmul.msk.bf16.vlgmr.msrb.gmra.mxu3 %vm1284_vm2, %v2203_v63 }
 0xc0b   : > { %v2275_v15 = vpop.xlane.xlu1 %2274 }
 0xc0e   : > { %v2201_v0 = vpop.f32.mrf.mxu1 }
 0xc19   : > { %3212 = vmatmul.msk.bf16.vlgmr.msra.gmra.mxu3 %vm1284_vm2, %v2301_v43 }
 0xc23   : > { %v2382_v22 = vpop.permute.xlu1 %2381 }
 0xc24   : > { %v2387_v4 = vsel %vm1284_vm2, %v2382_v22, 0 }
 0xc8c   : > { %v4548_v1 = vpop.f32.mrf.mxu3 }
 0xc94   : > { %v4550_v6 = vpop.f32.mrf.mxu3 }
 0xc9c   : > { %v2319_v7 = vpop.f32.mrf.mxu3 }
 0xc9d   : > { %v2323_v8 = vsel %vm1284_vm2, %v2319_v7, -inf }
 0xc9e   : > { %2324 = vmax.xlane.f32.xlu0 %v2323_v8 }
 0xca4   : > { %v2321_v9 = vpop.f32.mrf.mxu3 }
 0xcb2   : > { %2279 = vrot.lane.b32.xlu0 %v4474_v14, %s3924_s16 }
 0xcba   : > { %2437 = vrot.lane.b32.xlu0 %v4479_v21, %s3928_s24 }
 0xcc2   : > { %2435 = vrot.lane.b32.xlu0 %v4491_v30, %s3928_s24 }
 0xd11   : > { %v2325_v10 = vpop.xlane.xlu0 %2324 }
 0xd12   : > { %v2326_v11 = vsub.f32 %v2319_v7, %v2325_v10 }
 0xd14   : > { %v2327_v13 = vmul.f32 1.442695, %v2326_v11  ;;  %v1968_v11 = vld [vmem:[%s4238_s28 + $0xc] sm:$0xf]  ;;  %s4778_s28 = scalar_lea.vmem [#allocation14], %s4229_s13 }
 0xd15   : > { %s4779_s4 = smov %s4778_s28 }
 0xd16   : > { %3486 = vpow2.f32 %v2327_v13  ;;  %v2496_v13 = vsel %vm1321_vm3, %v1968_v11, 0  ;;  %v3277_v11 = vld [vmem:[%s4306_s12 + $0x10] sm:$0xff] }
 0xd17   : > { %3488 = vrcp.f32 %v2275_v15 }
 0xd1c   : > { %v3487_v16 = vpop.eup %3486 }
 0xd1d   : > { %v2329_v18 = vsel %vm1284_vm2, %v3487_v16, 0.0  ;;  %v3489_v19 = vpop.eup %3488 }
 0xd1e   : > { %2330 = vadd.xlane.f32.xlu2 %v2329_v18  ;;  %v2277_v20 = vmul.f32 %v3489_v19, %v3485_v59 }
 0xd20   : > { %v2278_v30 = vpack.c.bf16 %v2277_v20, %v2277_v20 }
 0xd24   : > { %v2280_v23 = vpop.permute.xlu0 %2279 }
 0xd25   : > { %v2285_v53 = vsel %vm1321_vm3, %v2280_v23, 0  ;;  %v3423_v23 = vld [vmem:[%s4777_s30] ss:$0 sm:$0xff] }
 0xd26   : > { %2294 = vmatpush.bf16.msra.mxu1 %v2285_v53 }
 0xd29   : > { %3211 = vmatmul.msk.bf16.vlgmr.msra.gmra.mxu1 %vm1284_vm2, %v2278_v30 }
 0xd2a   : > { %2396 = vmatpush.bf16.xpose.msrb.mxu1 %v2387_v4 }
 0xd2c   : > { %v2438_v25 = vpop.permute.xlu0 %2437 }
 0xd2d   : > { %v2443_v27 = vsel %vm1284_vm2, %v2438_v25, 0 }
 0xd2e   : > { %2452 = vmatpush.bf16.xpose.msra.mxu2 %v2443_v27 }
 0xd32   : > { %2505 = vmatpush.bf16.msra.mxu1 %v2496_v13  ;;  %v3276_v13 = vld [vmem:[%s4306_s12 + $0x8] sm:$0xff] }
 0xd34   : > { %v2436_v34 = vpop.permute.xlu0 %2435 }
 0xd36   : > { %2379 = vrot.lane.b32.xlu2 %v4486_v26, %s3928_s24  ;;  %v2239_v26 = vpop.f32.mrf.mxu2 }
 0xd37   : > { %v2240_v54 = vadd.f32 %v2239_v26, %v4548_v1 }
 0xd3e   : > { %v4571_v17 = vpop.f32.mrf.mxu2 }
 0xd3f   : > { %v2242_v25 = vadd.f32 %v4571_v17, %v4550_v6 }
 0xd91   : > { %v2331_v5 = vpop.xlane.xlu2 %2330 }
 0xd92   : > { %3490 = vrcp.f32 %v2331_v5 }
 0xd98   : > { %v3491_v28 = vpop.eup %3490 }
 0xd99   : > { %v2333_v29 = vmul.f32 %v3491_v28, %v3487_v16  ;;  %v2380_v31 = vpop.permute.xlu2 %2379 }
 0xd9a   : > { %3215 = vmatmul.msk.bf16.vlgmr.msrb.gmra.mxu1 %vm1284_vm2, %v2380_v31 }
 0xd9b   : > { %v2334_v32 = vpack.c.bf16 %v2333_v29, %v2333_v29 }
 0xd9d   : > { %3213 = vmatmul.msk.bf16.vlgmr.msrb.gmra.mxu2 %vm1284_vm2, %v2334_v32 }
 0xda6   : > { %v2296_v33 = vpop.f32.mrf.mxu1 }
 0xdad   : > { %3217 = vmatmul.msk.bf16.vlgmr.msra.gmra.mxu2 %vm1284_vm2, %v2436_v34 }
 0xdae   : > { %v2298_v35 = vpop.f32.mrf.mxu1 }
 0xe17   : > { %v2398_v38 = vpop.f32.mrf.mxu1 }
 0xe18   : > { %v2402_v39 = vsel %vm1284_vm2, %v2398_v38, -inf }
 0xe19   : > { %2403 = vmax.xlane.f32.xlu1 %v2402_v39 }
 0xe1f   : > { %v2400_v40 = vpop.f32.mrf.mxu1 }
 0xe20   : > { %v2352_v41 = vpop.f32.mrf.mxu2 }
 0xe21   : > { %v2356_v42 = vpack.c.bf16 %v2352_v41, %v2296_v33 }
 0xe23   : > { %3214 = vmatmul.msk.bf16.vlgmr.msrb.gmra.mxu0 %vm1284_vm2, %v2356_v42 }
 0xe28   : > { %v2354_v43 = vpop.f32.mrf.mxu2 }
 0xe29   : > { %v3273_v43 = vld [vmem:[%s4779_s4] sm:$0xff] }
 0xe30   : > { %v2454_v44 = vpop.f32.mrf.mxu2 }
 0xe31   : > { %v2458_v45 = vsel %vm1284_vm2, %v2454_v44, -inf }
 0xe32   : > { %2459 = vmax.xlane.f32.xlu2 %v2458_v45 }
 0xe38   : > { %v2456_v46 = vpop.f32.mrf.mxu2 }
 0xe4a   : > { %2414 = vrot.lane.b32.xlu2 %v4474_v14, %s3927_s19 }
 0xe8c   : > { %v2404_v47 = vpop.xlane.xlu1 %2403 }
 0xe8d   : > { %v2405_v48 = vsub.f32 %v2398_v38, %v2404_v47 }
 0xe8f   : > { %v2406_v49 = vmul.f32 1.442695, %v2405_v48 }
 0xe91   : > { %3492 = vpow2.f32 %v2406_v49 }
 0xe97   : > { %v3493_v51 = vpop.eup %3492 }
 0xe98   : > { %v2408_v52 = vsel %vm1284_vm2, %v3493_v51, 0.0 }
 0xe99   : > { %2409 = vadd.xlane.f32.xlu0 %v2408_v52 }
 0xea0   : > { %v2372_v55 = vpop.f32.mrf.mxu0 }
 0xea1   : > { %v2377_v56 = vadd.f32 %v2372_v55, %v2240_v54 }
 0xea5   : > { %v2460_v57 = vpop.xlane.xlu2 %2459 }
 0xea6   : > { %v2461_v50 = vsub.f32 %v2454_v44, %v2460_v57 }
 0xea8   : > { %v2462_v58 = vmul.f32 1.442695, %v2461_v50  ;;  %v2374_v18 = vpop.f32.mrf.mxu0 }
 0xea9   : > { %v2378_v5 = vadd.f32 %v2374_v18, %v2242_v25 }
 0xeaa   : > { %3494 = vpow2.f32 %v2462_v58 }
 0xead   : > { %2470 = vrot.lane.b32.xlu0 %v4479_v21, %s3927_s19  ;;  %v2415_v14 = vpop.permute.xlu2 %2414 }
 0xeae   : > { %v2420_v59 = vsel %vm1321_vm3, %v2415_v14, 0 }
 0xeaf   : > { %2429 = vmatpush.bf16.msrb.mxu3 %v2420_v59 }
 0xeb0   : > { %v3495_v12 = vpop.eup %3494 }
 0xeb1   : > { %v2464_v60 = vsel %vm1284_vm2, %v3495_v12, 0.0 }
 0xeb2   : > { %2465 = vadd.xlane.f32.xlu1 %v2464_v60 }
 0xf0c   : > { %v2410_v61 = vpop.xlane.xlu0 %2409 }
 0xf0d   : > { %3496 = vrcp.f32 %v2410_v61 }
 0xf13   : > { %v3497_v62 = vpop.eup %3496 }
 0xf14   : > { %v2412_v63 = vmul.f32 %v3497_v62, %v3493_v51 }
 0xf16   : > { %v2413_v0 = vpack.c.bf16 %v2412_v63, %v2412_v63  ;;  %v3425_v63 = vld [vmem:[%s1206_s17] ss:$0 sm:$0xff]  ;;  %s4783_s17 = scalar_lea.vmem [#allocation17], %s4221_s11 }
 0xf18   : > { %3216 = vmatmul.msk.bf16.vlgmr.msrb.gmra.mxu3 %vm1284_vm2, %v2413_v0 }
 0xf1f   : > { %v2471_v1 = vpop.permute.xlu0 %2470 }
 0xf20   : > { %v2476_v7 = vsel %vm1321_vm3, %v2471_v1, 0 }
 0xf21   : > { %2485 = vmatpush.bf16.msra.mxu0 %v2476_v7 }
 0xf25   : > { %v2466_v21 = vpop.xlane.xlu1 %2465 }
 0xf26   : > { %3498 = vrcp.f32 %v2466_v21 }
 0xf2c   : > { %v3499_v8 = vpop.eup %3498 }
 0xf2d   : > { %v2468_v9 = vmul.f32 %v3499_v8, %v3495_v12  ;;  %v3424_v12 = vld [vmem:[%s1203_s5] ss:$0 sm:$0xff]  ;;  %s4782_s5 = scalar_lea.vmem [#allocation15], %s4221_s11 }
 0xf2e   : > { %v3426_v18 = vld [vmem:[%s4782_s5] ss:$0 sm:$0xff] }
 0xf2f   : > { %v2469_v10 = vpack.c.bf16 %v2468_v9, %v2468_v9 }
 0xf31   : > { %3218 = vmatmul.msk.bf16.vlgmr.msra.gmra.mxu0 %vm1284_vm2, %v2469_v10  ;;  %v3278_v10 = vld [vmem:[%s4306_s12 + $0x18] sm:$0xff] }
 0xf32   : > { %2662 = vmatpush.bf16.msrb.mxu2 %v3278_v10 }
 0xf36   : > { %2663 = vmatpush.bf16.msrb.mxu2 %v3277_v11 }
 0xf3a   : > { %2664 = vmatpush.bf16.msrb.mxu2 %v3276_v13 }
 0xf9b   : > { %v2431_v15 = vpop.f32.mrf.mxu3 }
 0xfa3   : > { %v2433_v16 = vpop.f32.mrf.mxu3 }
 0xfae   : > { %v2487_v19 = vpop.f32.mrf.mxu0 }
 0xfaf   : > { %v2491_v20 = vpack.c.bf16 %v2487_v19, %v2431_v15  ;;  %v3275_v15 = vld [vmem:[%s4306_s12] sm:$0xff] }
 0xfb0   : > { %2665 = vmatpush.bf16.msrb.mxu2 %v3275_v15 }
 0xfb1   : > { %3219 = vmatmul.msk.bf16.vlgmr.msra.gmra.mxu1 %vm1284_vm2, %v2491_v20  ;;  %vm2654_vm2 = vcmask 523264  }
 0xfb6   : > { %v2489_v22 = vpop.f32.mrf.mxu0 }
0x102e   : > { %v2507_v53 = vpop.f32.mrf.mxu1 }
0x102f   : > { %v2512_v4 = vadd.f32 %v2507_v53, %v2377_v56 }
0x1031   : > { %v2517_v30 = vadd.f32 %v3423_v23, %v2512_v4 }
0x1033   : > { %v2519_v27 = vadd.f32 %v2517_v30, %v4464_v2  ;;  %v3427_v30 = vld [vmem:[%s4783_s17] ss:$0 sm:$0xff] }
0x1035   : > { %v2523_v28 = vsel %vm1254_vm1, %v2519_v27, 0.0 }
0x1036   : > { %2524 = vadd.xlane.f32.xlu1 %v2523_v28  ;;  %v2509_v29 = vpop.f32.mrf.mxu1 }
0x1037   : > { %v2513_v31 = vadd.f32 %v2509_v29, %v2378_v5 }
0x1039   : > { %v2518_v32 = vadd.f32 %v3423_v23, %v2513_v31 }
0x103b   : > { %v2520_v33 = vadd.f32 %v2518_v32, %v4466_v3  ;;  %v3274_v3 = vld [vmem:[%s4778_s28 + $0x8] sm:$0xff] }
0x103c   : > { %2607 = vmatpush.bf16.msra.mxu3 %v3274_v3 }
0x103d   : > { %v2526_v34 = vsel %vm1254_vm1, %v2520_v33, 0.0 }
0x103e   : > { %2527 = vadd.xlane.f32.xlu1 %v2526_v34 }
0x1040   : > { %2608 = vmatpush.bf16.msra.mxu3 %v3273_v43 }
0x10a9   : > { %v2525_v35 = vpop.xlane.xlu1 %2524 }
0x10aa   : > { %v2529_v36 = vmul.f32 %v2525_v35, %v4439_v24 }
0x10ac   : > { %v2531_v6 = vsub.f32 %v2519_v27, %v2529_v36 }
0x10ae   : > { %v2533_v37 = vmul.f32 %v2531_v6, %v2531_v6 }
0x10b0   : > { %v2535_v2 = vsel %vm1254_vm1, %v2533_v37, 0.0 }
0x10b1   : > { %2536 = vadd.xlane.f32.xlu1 %v2535_v2  ;;  %v2528_v26 = vpop.xlane.xlu1 %2527 }
0x10b2   : > { %v2530_v38 = vmul.f32 %v2528_v26, %v4439_v24 }
0x10b4   : > { %v2532_v17 = vsub.f32 %v2520_v33, %v2530_v38 }
0x10b6   : > { %v2534_v39 = vmul.f32 %v2532_v17, %v2532_v17 }
0x10b8   : > { %v2538_v40 = vsel %vm1254_vm1, %v2534_v39, 0.0 }
0x10b9   : > { %2539 = vadd.xlane.f32.xlu0 %v2538_v40 }
0x1124   : > { %v2537_v41 = vpop.xlane.xlu1 %2536 }
0x1125   : > { %v2541_v42 = vmul.f32 %v2537_v41, %v4439_v24 }
0x1127   : > { %v2543_v44 = vadd.f32 1e-05, %v2541_v42 }
0x1129   : > { %3500 = vrsqrt.f32 %v2543_v44  ;;  %vm2551_vm12 = vweird.f32 %v2543_v44 }
0x112c   : > { %v2540_v45 = vpop.xlane.xlu0 %2539 }
0x112d   : > { %v2542_v46 = vmul.f32 %v2540_v45, %v4439_v24 }
0x112f   : > { %v3501_v47 = vpop.eup %3500  ;;  %v2544_v48 = vadd.f32 1e-05, %v2542_v46 }
0x1130   : > { %v2546_v49 = vmul.f32 %v3501_v47, %v2543_v44  ;;  %vm2552_vm11 = vweird.f32 %v3501_v47 }
0x1131   : > { %3502 = vrsqrt.f32 %v2544_v48  ;;  %vm2553_vm13 = vmor %vm2551_vm12, %vm2552_vm11  ;;  %vm2561_vm15 = vweird.f32 %v2544_v48 }
0x1132   : > { %v2547_v51 = vmul.f32 %v3501_v47, %v2546_v49 }
0x1134   : > { %v2548_v52 = vmul.f32 0.5, %v2547_v51 }
0x1136   : > { %v2549_v54 = vsub.f32 1.5, %v2548_v52 }
0x1137   : > { %v3503_v55 = vpop.eup %3502 }
0x1138   : > { %v2550_v56 = vmul.f32 %v3501_v47, %v2549_v54  ;;  %v2556_v57 = vmul.f32 %v3503_v55, %v2544_v48  ;;  %vm2562_vm14 = vweird.f32 %v3503_v55 }
0x1139   : > { %vm2563_vm0 = vmor %vm2561_vm15, %vm2562_vm14 }
0x113a   : > { %v2557_v50 = vmul.f32 %v3503_v55, %v2556_v57  ;;  %v2554_v58 = vsel %vm2553_vm13, %v3501_v47, %v2550_v56  ;;  %v3429_v57 = vld [vmem:[%s1217_s0] ss:$0 sm:$0xff]  ;;  %s4786_s0 = sld [smem:[#allocation56_spill]] (!%p3246_p3) }
0x113b   : > { %v2565_v60 = vmul.f32 %v2554_v58, %v2531_v6 }
0x113c   : > { %v2558_v14 = vmul.f32 0.5, %v2557_v50 }
0x113d   : > { %v2570_v0 = vmul.f32 %v3424_v12, %v2565_v60 }
0x113e   : > { %v2559_v59 = vsub.f32 1.5, %v2558_v14 }
0x113f   : > { %v2575_v21 = vadd.f32 %v3425_v63, %v2570_v0 }
0x1140   : > { %v2560_v61 = vmul.f32 %v3503_v55, %v2559_v59 }
0x1142   : > { %v2564_v62 = vsel %vm2563_vm0, %v3503_v55, %v2560_v61  ;;  %v3428_v55 = vld [vmem:[%s1214_s14] ss:$0 sm:$0xff] }
0x1143   : > { %v2566_v1 = vmul.f32 %v2564_v62, %v2532_v17 }
0x1145   : > { %v2571_v7 = vmul.f32 %v3424_v12, %v2566_v1 }
0x1147   : > { %v2576_v8 = vadd.f32 %v3425_v63, %v2571_v7 }
0x1149   : > { %v2582_v9 = vpack.c.bf16 %v2576_v8, %v2575_v21 }
0x114b   : > { %3228 = vmatmul.msk.bf16.vlgmr.msra.gmra.mxu3 %vm1254_vm1, %v2582_v9 }
0x11ce   : > { %v2610_v16 = vpop.f32.mrf.mxu3 }
0x11cf   : > { %v2611_v19 = vadd.f32 %v3426_v18, %v2610_v16 }
0x11d1   : > { %v2615_v23 = vmax.f32 %v2611_v19, 0.0 }
0x11d6   : > { %v2612_v20 = vpop.f32.mrf.mxu3 }
0x11d7   : > { %v2613_v22 = vadd.f32 %v3426_v18, %v2612_v20 }
0x11d9   : > { %v2616_v53 = vmax.f32 %v2613_v22, 0.0 }
0x11db   : > { %v2626_v4 = vpack.c.bf16 %v2616_v53, %v2615_v23 }
0x11dd   : > { %3245 = vmatmul.msk.bf16.vlgmr.msrb.gmra.mxu2 %vm2654_vm2, %v2626_v4 }
0x1260   : > { %v2667_v25 = vpop.f32.mrf.mxu2 }
0x1261   : > { %v2668_v27 = vadd.f32 %v3427_v30, %v2667_v25 }
0x1263   : > { %v2672_v5 = vadd.f32 %v2668_v27, %v2575_v21 }
0x1265   : > { %v2676_v28 = vsel %vm1254_vm1, %v2672_v5, 0.0 }
0x1266   : > { %2677 = vadd.xlane.f32.xlu2 %v2676_v28 }
0x1268   : > { %v2669_v29 = vpop.f32.mrf.mxu2 }
0x1269   : > { %v2670_v31 = vadd.f32 %v3427_v30, %v2669_v29 }
0x126b   : > { %v2673_v32 = vadd.f32 %v2670_v31, %v2576_v8 }
0x126d   : > { %v2679_v33 = vsel %vm1254_vm1, %v2673_v32, 0.0 }
0x126e   : > { %2680 = vadd.xlane.f32.xlu1 %v2679_v33 }
0x12d9   : > { %v2678_v34 = vpop.xlane.xlu2 %2677 }
0x12da   : > { %v2682_v35 = vmul.f32 %v2678_v34, %v4439_v24 }
0x12dc   : > { %v2684_v36 = vsub.f32 %v2672_v5, %v2682_v35 }
0x12de   : > { %v2686_v6 = vmul.f32 %v2684_v36, %v2684_v36 }
0x12e0   : > { %v2688_v37 = vsel %vm1254_vm1, %v2686_v6, 0.0 }
0x12e1   : > { %v2681_v2 = vpop.xlane.xlu1 %2680  ;;  %2689 = vadd.xlane.f32.xlu1 %v2688_v37 }
0x12e2   : > { %v2683_v26 = vmul.f32 %v2681_v2, %v4439_v24 }
0x12e4   : > { %v2685_v38 = vsub.f32 %v2673_v32, %v2683_v26 }
0x12e6   : > { %v2687_v17 = vmul.f32 %v2685_v38, %v2685_v38 }
0x12e8   : > { %v2691_v39 = vsel %vm1254_vm1, %v2687_v17, 0.0 }
0x12e9   : > { %2692 = vadd.xlane.f32.xlu1 %v2691_v39 }
0x1354   : > { %v2690_v40 = vpop.xlane.xlu1 %2689 }
0x1355   : > { %v2694_v3 = vmul.f32 %v2690_v40, %v4439_v24 }
0x1357   : > { %v2696_v41 = vadd.f32 1e-05, %v2694_v3 }
0x1359   : > { %3504 = vrsqrt.f32 %v2696_v41  ;;  %vm2704_vm4 = vweird.f32 %v2696_v41 }
0x135c   : > { %v2693_v42 = vpop.xlane.xlu1 %2692 }
0x135d   : > { %v2695_v43 = vmul.f32 %v2693_v42, %v4439_v24 }
0x135f   : > { %v3505_v44 = vpop.eup %3504  ;;  %v2697_v45 = vadd.f32 1e-05, %v2695_v43 }
0x1360   : > { %v2699_v46 = vmul.f32 %v3505_v44, %v2696_v41  ;;  %vm2705_vm3 = vweird.f32 %v3505_v44 }
0x1361   : > { %3506 = vrsqrt.f32 %v2697_v45  ;;  %vm2706_vm5 = vmor %vm2704_vm4, %vm2705_vm3  ;;  %vm2714_vm7 = vweird.f32 %v2697_v45 }
0x1362   : > { %v2700_v47 = vmul.f32 %v3505_v44, %v2699_v46 }
0x1364   : > { %v2701_v48 = vmul.f32 0.5, %v2700_v47 }
0x1366   : > { %v2702_v49 = vsub.f32 1.5, %v2701_v48 }
0x1367   : > { %v3507_v51 = vpop.eup %3506 }
0x1368   : > { %v2703_v52 = vmul.f32 %v3505_v44, %v2702_v49  ;;  %v2709_v54 = vmul.f32 %v3507_v51, %v2697_v45  ;;  %vm2715_vm6 = vweird.f32 %v3507_v51 }
0x1369   : > { %vm2716_vm8 = vmor %vm2714_vm7, %vm2715_vm6 }
0x136a   : > { %v2707_v24 = vsel %vm2706_vm5, %v3505_v44, %v2703_v52  ;;  %v2710_v56 = vmul.f32 %v3507_v51, %v2709_v54 }
0x136b   : > { %v2718_v50 = vmul.f32 %v2707_v24, %v2684_v36 }
0x136c   : > { %v2711_v58 = vmul.f32 0.5, %v2710_v56 }
0x136d   : > { %v2723_v14 = vmul.f32 %v3428_v55, %v2718_v50 }
0x136e   : > { %v2712_v59 = vsub.f32 1.5, %v2711_v58 }
0x136f   : > { %v2728_v12 = vadd.f32 %v3429_v57, %v2723_v14 }
0x1370   : > { %v2713_v60 = vmul.f32 %v3507_v51, %v2712_v59 }
0x1371   : > { %2730 = vst.msk [vmem:[#allocation2] sm:$0xff] %vm1254_vm1, %v2728_v12 }
0x1372   : > { %v2717_v61 = vsel %vm2716_vm8, %v3507_v51, %v2713_v60 }
0x1373   : > { %v2719_v62 = vmul.f32 %v2717_v61, %v2685_v38 }
0x1375   : > { %v2724_v63 = vmul.f32 %v3428_v55, %v2719_v62  ;;  %2735 = sbr.rel (%p3246_p3) target bundleno = 5131 (0x140b), region = 160 }
0x1377   : > { %v2729_v0 = vadd.f32 %v3429_v57, %v2724_v63 }
0x1379   : > { %2731 = vst.msk [vmem:[#allocation2 + $0x8] sm:$0xff] %vm1254_vm1, %v2729_v0 }
0x137a   : > { %v3280_v1 = vld [vmem:[#allocation18 + $0x8] sm:$0xff]  ;;  %v3279_v7 = vld [vmem:[#allocation18] sm:$0xff]  ;;  %v2736_v21 = vpack.c.bf16 %v2729_v0, %v2728_v12  ;;  %v3508_v8 = vld [vmem:[%s4786_s0] ss:$0 sm:$0xff] }
0x137b   : > { %2766 = vmatpush.bf16.msra.mxu0 %v3280_v1 }
0x137f   : > { %2767 = vmatpush.bf16.msra.mxu0 %v3279_v7 }
0x1382   : > { %3255 = vmatmul.msk.bf16.vlgmr.msra.gmra.mxu0 %vm1254_vm1, %v2736_v21 }
0x13ff   : > { %v2769_v9 = vpop.f32.mrf.mxu0 }
0x1400   : > { %v2770_v10 = vadd.f32 %v3508_v8, %v2769_v9 }
0x1402   : > { %2774 = vst [vmem:[#allocation20] sm:$0xff] %v2770_v10 }
0x1407   : > { %v2771_v11 = vpop.f32.mrf.mxu0 }
0x1408   : > { %v2772_v13 = vadd.f32 %v3508_v8, %v2771_v11 }
0x140a   : > { %2775 = vst [vmem:[#allocation20 + $0x8] sm:$0xff] %v2772_v13 }
0x140b PF: > { %p3346_p4 = scmp.eq.s32.totalorder %s4154_s10, 1  ;;  %s4787_s26 = sld [smem:[#allocation57_spill]] }
0x140c   : > { %s3931_s9 = smov [#allocation20]   ;;  %s3932_s7 = smov 128  }
0x140d   : > { %s2784_s29 = sshll.u32 %s3931_s9, 4  ;;  %s3933_s8 = smov 8   ;;  %s2785_s29 = int_to_ptr.vmem [resolvable:$true] %s2784_s29 }
0x1411   : > { %s2786_s2 = sshll.u32 %s4787_s26, 4  ;;  %s2787_s2 = int_to_ptr.hbm [resolvable:$true] %s2786_s2 }
0x1412   : > { %3306 = dma.vmem_to_hbm [thread:$0]  (%p3346_p4), %s2785_s29, 256, %s2787_s2, [#allocation5], %s3932_s7, %s3932_s7, %s3933_s8  }
0x1413   : > { %3886 = dma.done.wait (%p3346_p4), [#allocation5], 256  }
0x1414   : > { %3888 = vsyncadd (%p3346_p4), [#allocation5], 4294967040 }
0x1415 PF: > { %s4788_s15 = sld [smem:[#allocation31_spill]] }
0x1416   : > { %s4789_s4 = sld [smem:[#allocation28_spill]] }
0x1417   : > { %s4790_s30 = sld [smem:[#allocation29_spill]] }
0x1418   : > { %s4791_s24 = sld [smem:[#allocation33_spill]] }
0x1419   : > { %s4792_s25 = sld [smem:[#allocation30_spill]] }
0x141a   : > { %s4793_s5 = sld [smem:[#allocation32_spill]] }
0x141b   : > { %s48_s1 = sadd.s32 1, %s4788_s15  }
0x141c   : > { %p45_p5 = scmp.ge.s32.totalorder %s48_s1, 4  }
0x141e   :  { %47 = sbr.rel (!%p45_p5) target bundleno = 38 (0x26), region = 287 }
0x1423   :  { %2803 = vsyncpa [#allocation4], 1 }
0x1424   :  { %2805 = vsyncpa [#allocation4 + $0x1], 1 }
0x1425   :  { %2806 = vsyncpa [#allocation7], 1 }
0x1426   :  { %2808 = vsyncpa [#allocation7 + $0x1], 1 }
0x1427   :  { %2809 = vsyncpa [#allocation10], 1 }
0x1428   :  { %2811 = vsyncpa [#allocation10 + $0x1], 1 }
0x1429   :  { %2812 = vsyncpa [#allocation13], 1 }
0x142a   :  { %2814 = vsyncpa [#allocation13 + $0x1], 1 }
0x142b   :  { %2815 = vsyncpa [#allocation16], 1 }
0x142c   :  { %2817 = vsyncpa [#allocation16 + $0x1], 1 }
0x142d   :  { %2818 = vsyncpa [#allocation19], 1 }
0x142e   :  { %2819 = vsyncpa [#allocation5], 1 }
0x142f   :  { %2821 = vsyncpa [#allocation5 + $0x1], 1 }

</bundles_post_ra>
